<compile_context>
chip_gen: v5e
topology: v5e:2x2
jax: 0.10.0
libtpu: 0.0.40
codegen_flags: <defaults>
</compile_context>

<pallas_src>
import functools

import jax
import jax.numpy as jnp
from jax.experimental import pallas as pl
from jax.experimental.pallas import tpu as pltpu


def _round_up(x, m):
    return (x + m - 1) // m * m


def _choose_tile(N):
    """Largest power-of-two tile (<=1024) that still leaves >=2 row tiles (v7x)."""
    for t in (1024, 512, 256):
        if _round_up(N, t) // t >= 2:
            return t
    return 128


# Keep the fully VMEM-resident E (bf16) at or below this size; with double
# buffering and the 1024x1024 bf16 G tiles this stays well inside the 32 MiB
# scoped-VMEM limit we set (v7x physical VMEM is 64 MiB).
_E_RESIDENT_BYTES = 8 * 1024 * 1024

_PAIRS_PER_STEP = 8  # gather/score pairs handled per grid step (8-sublane blocks)


# ---------------------------------------------------------------------------
# Pallas kernels
# ---------------------------------------------------------------------------
def _layer_kernel(g_ref, e_ref, acc_in_ref, acc_out_ref, e_out_ref, *,
                  tile_k, e_resident, scale):
    """One fused LightGCN layer tile:
         e_new   = G @ E            (bf16 feed, f32 accumulation in the out block)
         acc_out = (acc_in + e_new) * scale      (scale folds in the final mean)
         e_out   = bf16(e_new)                    (next layer's MXU operand)
    """
    k = pl.program_id(1)

    @pl.when(k == 0)
    def _():
        acc_out_ref[...] = jnp.zeros_like(acc_out_ref)

    if e_resident:
        start = pl.multiple_of(k * tile_k, tile_k)
        e_blk = e_ref[pl.ds(start, tile_k), :]          # slice resident E in VMEM
    else:
        e_blk = e_ref[...]                              # streamed k-slab

    acc_out_ref[...] += jnp.dot(g_ref[...], e_blk,
                                preferred_element_type=jnp.float32)

    @pl.when(k == pl.num_programs(1) - 1)
    def _():
        e_new = acc_out_ref[...]
        e_out_ref[...] = e_new.astype(e_out_ref.dtype)
        out = acc_in_ref[...] + e_new
        if scale != 1.0:
            out = out * scale
        acc_out_ref[...] = out


def _gather_score_kernel(u_idx_ref, i_idx_ref, table_ref, out_ref, rows, sems):
    """gamma[b] = <table[users[b]], table[items[b]]> for 8 pairs per grid step.

    Rows are DMA-gathered from HBM into an (16, d_pad) VMEM scratch using the
    scalar-prefetched indices, then reduced with one VPU multiply + lane reduce.
    """
    b0 = pl.program_id(0) * _PAIRS_PER_STEP

    # Issue all 16 row DMAs (8 user rows + 8 item rows) before waiting on any.
    for j in range(_PAIRS_PER_STEP):
        u = u_idx_ref[b0 + j]
        i = i_idx_ref[b0 + j]
        pltpu.make_async_copy(table_ref.at[pl.ds(u, 1), :],
                              rows.at[pl.ds(j, 1), :],
                              sems.at[j]).start()
        pltpu.make_async_copy(table_ref.at[pl.ds(i, 1), :],
                              rows.at[pl.ds(_PAIRS_PER_STEP + j, 1), :],
                              sems.at[_PAIRS_PER_STEP + j]).start()
    for j in range(2 * _PAIRS_PER_STEP):
        pltpu.make_async_copy(table_ref.at[pl.ds(0, 1), :],
                              rows.at[pl.ds(j, 1), :],
                              sems.at[j]).wait()

    u_rows = rows[0:_PAIRS_PER_STEP, :]
    i_rows = rows[_PAIRS_PER_STEP:2 * _PAIRS_PER_STEP, :]
    s = jnp.sum(u_rows * i_rows, axis=-1, keepdims=True)          # (8, 1)
    out_ref[...] = jnp.broadcast_to(s, out_ref.shape)             # (8, 128) unmasked


# ---------------------------------------------------------------------------
# Wrappers
# ---------------------------------------------------------------------------
def _propagate_one_layer(g_bf16, e_bf16, acc_f32, *, tile, e_resident, scale):
    n_pad, d_pad = acc_f32.shape
    grid = (n_pad // tile, n_pad // tile)

    if e_resident:
        e_spec = pl.BlockSpec((n_pad, d_pad), lambda i, k: (0, 0))   # fetched once
    else:
        e_spec = pl.BlockSpec((tile, d_pad), lambda i, k: (k, 0))

    kernel = functools.partial(_layer_kernel, tile_k=tile,
                               e_resident=e_resident, scale=scale)
    return pl.pallas_call(
        kernel,
        out_shape=(jax.ShapeDtypeStruct((n_pad, d_pad), jnp.float32),   # new running acc
                   jax.ShapeDtypeStruct((n_pad, d_pad), jnp.bfloat16)), # next-layer E
        grid_spec=pltpu.PrefetchScalarGridSpec(
            num_scalar_prefetch=0,
            grid=grid,
            in_specs=[
                pl.BlockSpec((tile, tile), lambda i, k: (i, k)),     # G tile (bf16)
                e_spec,                                              # E (bf16)
                pl.BlockSpec((tile, d_pad), lambda i, k: (i, 0)),    # running acc (f32)
            ],
            out_specs=(
                pl.BlockSpec((tile, d_pad), lambda i, k: (i, 0)),
                pl.BlockSpec((tile, d_pad), lambda i, k: (i, 0)),
            ),
        ),
        input_output_aliases={2: 0},          # running acc updated in place
        compiler_params=pltpu.CompilerParams(
            dimension_semantics=("parallel", "arbitrary"),
            vmem_limit_bytes=32 * 1024 * 1024),
    )(g_bf16, e_bf16, acc_f32)


def lightgcn_propagate(graph, emb0, n_layers):
    """mean(E_0, G E_0, ..., G^L E_0), zero-padded to (N_pad, 128*ceil(D/128))."""
    N, D = emb0.shape
    d_pad = _round_up(D, 128)
    tile = _choose_tile(N)
    n_pad = _round_up(N, tile)
    assert n_pad % tile == 0

    # Zero pad rows/cols of G and E are mathematically neutral for the valid
    # first N rows / first D columns.
    g_pad = jnp.zeros((n_pad, n_pad), jnp.bfloat16).at[:N, :N].set(
        graph.astype(jnp.bfloat16))
    e0 = jnp.zeros((n_pad, d_pad), jnp.float32).at[:N, :D].set(
        emb0.astype(jnp.float32))

    if n_layers == 0:
        return e0

    e_resident = n_pad * d_pad * 2 <= _E_RESIDENT_BYTES
    inv = 1.0 / float(n_layers + 1)

    acc = e0                                  # f32 running sum (includes E0 exactly)
    e = e0.astype(jnp.bfloat16)
    for layer in range(n_layers):
        scale = inv if layer == n_layers - 1 else 1.0   # fold the mean into last layer
        acc, e = _propagate_one_layer(g_pad, e, acc, tile=tile,
                                      e_resident=e_resident, scale=scale)
    return acc                                # padded light_out, f32


def score_gather_pairs(table, user_idx, item_idx):
    """Fused row-gather + per-pair dot product, 8 pairs per grid step."""
    B = user_idx.shape[0]
    _, d_pad = table.shape
    b_pad = _round_up(B, _PAIRS_PER_STEP)
    u = jnp.zeros((b_pad,), jnp.int32).at[:B].set(user_idx.astype(jnp.int32))
    i = jnp.zeros((b_pad,), jnp.int32).at[:B].set(item_idx.astype(jnp.int32))

    out = pl.pallas_call(
        _gather_score_kernel,
        out_shape=jax.ShapeDtypeStruct((b_pad, 128), jnp.float32),
        grid_spec=pltpu.PrefetchScalarGridSpec(
            num_scalar_prefetch=2,                       # user_idx, item_idx -> SMEM
            grid=(b_pad // _PAIRS_PER_STEP,),
            in_specs=[pl.BlockSpec(memory_space=pl.ANY)],   # table stays in HBM
            out_specs=pl.BlockSpec((_PAIRS_PER_STEP, 128), lambda b, u, i: (b, 0)),
            scratch_shapes=[
                pltpu.VMEM((2 * _PAIRS_PER_STEP, d_pad), jnp.float32),
                pltpu.SemaphoreType.DMA((2 * _PAIRS_PER_STEP,)),
            ],
        ),
        compiler_params=pltpu.CompilerParams(
            dimension_semantics=("parallel",)),
    )(u, i, table)
    return out[:B, 0]


@functools.partial(jax.jit, static_argnames=("n_layers", "K"))
def dlightgcn_forward(graph, user_emb, item_emb, users, items, n_layers, K):
    """Equivalent of DLightGCN.forward(users, items)."""
    num_users, D = user_emb.shape
    assert D % K == 0

    # computer(): propagate the concatenated embedding table through the graph.
    emb0 = jnp.concatenate([user_emb, item_emb], axis=0)          # (N, D)
    light_out_pad = lightgcn_propagate(graph, emb0, n_layers)     # (N_pad, D_pad) f32

    # forward(): fused gather + factor-wise dot products.  Item rows live at
    # offset num_users in the combined table; padded columns are zero so the
    # dot over D_pad equals the dot over D.
    gamma = score_gather_pairs(
        light_out_pad,
        users.astype(jnp.int32),
        (items + num_users).astype(jnp.int32),
    )
    return gamma                                                  # (B,)


# ---------------------------------------------------------------------------
# Pure-JAX reference (f32, for sanity check)
# ---------------------------------------------------------------------------
def reference_forward(graph, user_emb, item_emb, users, items, n_layers, K):
    emb0 = jnp.concatenate([user_emb, item_emb], axis=0)
    e = emb0
    acc = emb0
    for _ in range(n_layers):
        e = graph @ e
        acc = acc + e
    light_out = acc / (n_layers + 1)
    num_users = user_emb.shape[0]
    u = light_out[:num_users][users].reshape(users.shape[0], K, -1)
    i = light_out[num_users:][items].reshape(items.shape[0], K, -1)
    return jnp.sum(u * i, axis=(1, 2))


# ---------------------------------------------------------------------------
# Main
# ---------------------------------------------------------------------------
if __name__ == "__main__":
    # Small synthetic config (consistent with DLightGCN.__init_weight); N chosen so
    # the tiled propagation grid is exercised (N = 512, tile = 256 -> 2x2 grid).
    num_users = 192
    num_items = 320
    latent_dim = 32          # config['latent_dim_rec']
    K = 4                    # config['num_factors'];  latent_dim % K == 0
    n_layers = 3             # config['lightGCN_n_layers']
    batch = 8
    N = num_users + num_items

    key = jax.random.PRNGKey(0)
    k_u, k_i, k_r, k_users, k_items = jax.random.split(key, 5)

    # Xavier-uniform embedding init (deterministic), as in nn.init.xavier_uniform_
    def xavier_uniform(k, fan_in, fan_out):
        bound = (6.0 / (fan_in + fan_out)) ** 0.5
        return jax.random.uniform(k, (fan_in, fan_out), jnp.float32, -bound, bound)

    user_emb = xavier_uniform(k_u, num_users, latent_dim)
    item_emb = xavier_uniform(k_i, num_items, latent_dim)

    # Synthetic normalized bipartite adjacency (dense stand-in for the sparse Graph).
    # TODO(synk): the real model uses torch.sparse.mm on a sparse normalized graph;
    # here we densify it (semantically identical matmul).
    R = (jax.random.uniform(k_r, (num_users, num_items)) < 0.05).astype(jnp.float32)
    A = jnp.zeros((N, N), jnp.float32)
    A = A.at[:num_users, num_users:].set(R)
    A = A.at[num_users:, :num_users].set(R.T)
    deg = jnp.sum(A, axis=1)
    d_inv_sqrt = jnp.where(deg > 0, 1.0 / jnp.sqrt(deg), 0.0)
    graph = A * d_inv_sqrt[:, None] * d_inv_sqrt[None, :]

    users = jax.random.randint(k_users, (batch,), 0, num_users)
    items = jax.random.randint(k_items, (batch,), 0, num_items)

    gamma = dlightgcn_forward(graph, user_emb, item_emb, users, items, n_layers, K)
    gamma = jax.block_until_ready(gamma)

    ref = reference_forward(graph, user_emb, item_emb, users, items, n_layers, K)
    assert gamma.shape == (batch,)
    # bf16 graph/E feed into the MXU -> tolerance loosened vs. the pure-f32 reference
    # (accumulation, running sum and the final mean are all kept in f32).
    assert jnp.allclose(gamma, ref, atol=5e-3, rtol=5e-2), (gamma, ref)

    print("KERNEL_OK")
</pallas_src>

<mosaic_0001>
module attributes {stable_mosaic.version = 11 : i64} {
  func.func @_layer_kernel(%arg0: i32, %arg1: i32, %arg2: memref<256x256xbf16, #tpu.memory_space<vmem>>, %arg3: memref<512x128xbf16, #tpu.memory_space<vmem>>, %arg4: memref<256x128xf32, #tpu.memory_space<vmem>>, %arg5: memref<256x128xf32, #tpu.memory_space<vmem>>, %arg6: memref<256x128xbf16, #tpu.memory_space<vmem>>) attributes {dimension_semantics = [#tpu.dimension_semantics<parallel>, #tpu.dimension_semantics<arbitrary>], iteration_bounds = array<i64: 2, 2>, scalar_prefetch = 0 : i64, scratch_operands = 0 : i64, tpu.core_type = #tpu.core_type<tc>, window_params = [{transform_indices = @transform_0, window_bounds = array<i64: 256, 256>}, {pipeline_mode = #tpu.pipeline_mode<synchronous>, transform_indices = @transform_1, window_bounds = array<i64: 512, 128>}, {transform_indices = @transform_2, window_bounds = array<i64: 256, 128>}, {transform_indices = @transform_3, window_bounds = array<i64: 256, 128>}, {transform_indices = @transform_4, window_bounds = array<i64: 256, 128>}]} {
    %c0_i32 = arith.constant 0 : i32
    %0 = arith.cmpi eq, %arg1, %c0_i32 : i32
    %1 = arith.extui %0 : i1 to i32
    %c0_i32_0 = arith.constant 0 : i32
    %2 = arith.cmpi ne, %1, %c0_i32_0 : i32
    scf.if %2 {
      %cst_8 = arith.constant 0.000000e+00 : f32
      %15 = vector.broadcast %cst_8 : f32 to vector<256x128xf32>
      %c0_9 = arith.constant 0 : index
      %c0_10 = arith.constant 0 : index
      %16 = vector.load %arg5[%c0_9, %c0_10] : memref<256x128xf32, #tpu.memory_space<vmem>>, vector<256x128xf32>
      tpu.vector_store %arg5[%c0_9, %c0_10], %15 {strides = array<i32>} : memref<256x128xf32, #tpu.memory_space<vmem>>, vector<256x128xf32>,
    } else {
    }
    %c256_i32 = arith.constant 256 : i32
    %3 = arith.muli %arg1, %c256_i32 : i32
    %4 = tpu.assume_multiple %3, 256 : i32
    %5 = arith.index_cast %4 : i32 to index
    %c0 = arith.constant 0 : index
    %6 = vector.load %arg3[%5, %c0] : memref<512x128xbf16, #tpu.memory_space<vmem>>, vector<256x128xbf16>
    %c0_1 = arith.constant 0 : index
    %c0_2 = arith.constant 0 : index
    %7 = vector.load %arg5[%c0_1, %c0_2] : memref<256x128xf32, #tpu.memory_space<vmem>>, vector<256x128xf32>
    %c0_3 = arith.constant 0 : index
    %c0_4 = arith.constant 0 : index
    %8 = vector.load %arg2[%c0_3, %c0_4] : memref<256x256xbf16, #tpu.memory_space<vmem>>, vector<256x256xbf16>
    %cst = arith.constant dense<0.000000e+00> : vector<256x128xf32>
    %9 = tpu.matmul %8, %6, %cst {dimension_numbers = #tpu.dot_dimension_numbers<[1], [0], [0], [1], [0, 0, 1, 1], [], []>} : vector<256x256xbf16>, vector<256x128xbf16>, vector<256x128xf32> -> vector<256x128xf32>
    %10 = arith.addf %7, %9 : vector<256x128xf32>
    %c0_5 = arith.constant 0 : index
    %c0_6 = arith.constant 0 : index
    %11 = vector.load %arg5[%c0_5, %c0_6] : memref<256x128xf32, #tpu.memory_space<vmem>>, vector<256x128xf32>
    tpu.vector_store %arg5[%c0_5, %c0_6], %10 {strides = array<i32>} : memref<256x128xf32, #tpu.memory_space<vmem>>, vector<256x128xf32>,
    %c1_i32 = arith.constant 1 : i32
    %12 = arith.cmpi eq, %arg1, %c1_i32 : i32
    %13 = arith.extui %12 : i1 to i32
    %c0_i32_7 = arith.constant 0 : i32
    %14 = arith.cmpi ne, %13, %c0_i32_7 : i32
    scf.if %14 {
      %c0_8 = arith.constant 0 : index
      %c0_9 = arith.constant 0 : index
      %15 = vector.load %arg5[%c0_8, %c0_9] : memref<256x128xf32, #tpu.memory_space<vmem>>, vector<256x128xf32>
      %16 = arith.truncf %15 : vector<256x128xf32> to vector<256x128xbf16>
      %c0_10 = arith.constant 0 : index
      %c0_11 = arith.constant 0 : index
      %17 = vector.load %arg6[%c0_10, %c0_11] : memref<256x128xbf16, #tpu.memory_space<vmem>>, vector<256x128xbf16>
      tpu.vector_store %arg6[%c0_10, %c0_11], %16 {strides = array<i32>} : memref<256x128xbf16, #tpu.memory_space<vmem>>, vector<256x128xbf16>,
      %c0_12 = arith.constant 0 : index
      %c0_13 = arith.constant 0 : index
      %18 = vector.load %arg4[%c0_12, %c0_13] : memref<256x128xf32, #tpu.memory_space<vmem>>, vector<256x128xf32>
      %19 = arith.addf %18, %15 : vector<256x128xf32>
      %cst_14 = arith.constant 2.500000e-01 : f32
      %20 = vector.broadcast %cst_14 : f32 to vector<256x128xf32>
      %21 = arith.mulf %19, %20 : vector<256x128xf32>
      %c0_15 = arith.constant 0 : index
      %c0_16 = arith.constant 0 : index
      %22 = vector.load %arg5[%c0_15, %c0_16] : memref<256x128xf32, #tpu.memory_space<vmem>>, vector<256x128xf32>
      tpu.vector_store %arg5[%c0_15, %c0_16], %21 {strides = array<i32>} : memref<256x128xf32, #tpu.memory_space<vmem>>, vector<256x128xf32>,
    } else {
    }
    return
  }
  func.func @transform_0(%arg0: i32, %arg1: i32) -> (i32, i32) {
    %c0_i32 = arith.constant 0 : i32
    return %arg0, %arg1 : i32, i32
  }
  func.func @transform_1(%arg0: i32, %arg1: i32) -> (i32, i32) {
    %c0_i32 = arith.constant 0 : i32
    %c0_i32_0 = arith.constant 0 : i32
    %c0_i32_1 = arith.constant 0 : i32
    return %c0_i32, %c0_i32_0 : i32, i32
  }
  func.func @transform_2(%arg0: i32, %arg1: i32) -> (i32, i32) {
    %c0_i32 = arith.constant 0 : i32
    %c0_i32_0 = arith.constant 0 : i32
    return %arg0, %c0_i32 : i32, i32
  }
  func.func @transform_3(%arg0: i32, %arg1: i32) -> (i32, i32) {
    %c0_i32 = arith.constant 0 : i32
    %c0_i32_0 = arith.constant 0 : i32
    return %arg0, %c0_i32 : i32, i32
  }
  func.func @transform_4(%arg0: i32, %arg1: i32) -> (i32, i32) {
    %c0_i32 = arith.constant 0 : i32
    %c0_i32_0 = arith.constant 0 : i32
    return %arg0, %c0_i32 : i32, i32
  }
}

module attributes {stable_mosaic.version = 11 : i64} {
  func.func @_layer_kernel(%arg0: i32, %arg1: i32, %arg2: memref<256x256xbf16, #tpu.memory_space<vmem>>, %arg3: memref<512x128xbf16, #tpu.memory_space<vmem>>, %arg4: memref<256x128xf32, #tpu.memory_space<vmem>>, %arg5: memref<256x128xf32, #tpu.memory_space<vmem>>, %arg6: memref<256x128xbf16, #tpu.memory_space<vmem>>) attributes {dimension_semantics = [#tpu.dimension_semantics<parallel>, #tpu.dimension_semantics<arbitrary>], iteration_bounds = array<i64: 2, 2>, scalar_prefetch = 0 : i64, scratch_operands = 0 : i64, tpu.core_type = #tpu.core_type<tc>, window_params = [{transform_indices = @transform_0, window_bounds = array<i64: 256, 256>}, {pipeline_mode = #tpu.pipeline_mode<synchronous>, transform_indices = @transform_1, window_bounds = array<i64: 512, 128>}, {transform_indices = @transform_2, window_bounds = array<i64: 256, 128>}, {transform_indices = @transform_3, window_bounds = array<i64: 256, 128>}, {transform_indices = @transform_4, window_bounds = array<i64: 256, 128>}]} {
    %c0_i32 = arith.constant 0 : i32
    %0 = arith.cmpi eq, %arg1, %c0_i32 : i32
    %1 = arith.extui %0 : i1 to i32
    %c0_i32_0 = arith.constant 0 : i32
    %2 = arith.cmpi ne, %1, %c0_i32_0 : i32
    scf.if %2 {
      %cst_8 = arith.constant 0.000000e+00 : f32
      %15 = vector.broadcast %cst_8 : f32 to vector<256x128xf32>
      %c0_9 = arith.constant 0 : index
      %c0_10 = arith.constant 0 : index
      %16 = vector.load %arg5[%c0_9, %c0_10] : memref<256x128xf32, #tpu.memory_space<vmem>>, vector<256x128xf32>
      tpu.vector_store %arg5[%c0_9, %c0_10], %15 {strides = array<i32>} : memref<256x128xf32, #tpu.memory_space<vmem>>, vector<256x128xf32>,
    } else {
    }
    %c256_i32 = arith.constant 256 : i32
    %3 = arith.muli %arg1, %c256_i32 : i32
    %4 = tpu.assume_multiple %3, 256 : i32
    %5 = arith.index_cast %4 : i32 to index
    %c0 = arith.constant 0 : index
    %6 = vector.load %arg3[%5, %c0] : memref<512x128xbf16, #tpu.memory_space<vmem>>, vector<256x128xbf16>
    %c0_1 = arith.constant 0 : index
    %c0_2 = arith.constant 0 : index
    %7 = vector.load %arg5[%c0_1, %c0_2] : memref<256x128xf32, #tpu.memory_space<vmem>>, vector<256x128xf32>
    %c0_3 = arith.constant 0 : index
    %c0_4 = arith.constant 0 : index
    %8 = vector.load %arg2[%c0_3, %c0_4] : memref<256x256xbf16, #tpu.memory_space<vmem>>, vector<256x256xbf16>
    %cst = arith.constant dense<0.000000e+00> : vector<256x128xf32>
    %9 = tpu.matmul %8, %6, %cst {dimension_numbers = #tpu.dot_dimension_numbers<[1], [0], [0], [1], [0, 0, 1, 1], [], []>} : vector<256x256xbf16>, vector<256x128xbf16>, vector<256x128xf32> -> vector<256x128xf32>
    %10 = arith.addf %7, %9 : vector<256x128xf32>
    %c0_5 = arith.constant 0 : index
    %c0_6 = arith.constant 0 : index
    %11 = vector.load %arg5[%c0_5, %c0_6] : memref<256x128xf32, #tpu.memory_space<vmem>>, vector<256x128xf32>
    tpu.vector_store %arg5[%c0_5, %c0_6], %10 {strides = array<i32>} : memref<256x128xf32, #tpu.memory_space<vmem>>, vector<256x128xf32>,
    %c1_i32 = arith.constant 1 : i32
    %12 = arith.cmpi eq, %arg1, %c1_i32 : i32
    %13 = arith.extui %12 : i1 to i32
    %c0_i32_7 = arith.constant 0 : i32
    %14 = arith.cmpi ne, %13, %c0_i32_7 : i32
    scf.if %14 {
      %c0_8 = arith.constant 0 : index
      %c0_9 = arith.constant 0 : index
      %15 = vector.load %arg5[%c0_8, %c0_9] : memref<256x128xf32, #tpu.memory_space<vmem>>, vector<256x128xf32>
      %16 = arith.truncf %15 : vector<256x128xf32> to vector<256x128xbf16>
      %c0_10 = arith.constant 0 : index
      %c0_11 = arith.constant 0 : index
      %17 = vector.load %arg6[%c0_10, %c0_11] : memref<256x128xbf16, #tpu.memory_space<vmem>>, vector<256x128xbf16>
      tpu.vector_store %arg6[%c0_10, %c0_11], %16 {strides = array<i32>} : memref<256x128xbf16, #tpu.memory_space<vmem>>, vector<256x128xbf16>,
      %c0_12 = arith.constant 0 : index
      %c0_13 = arith.constant 0 : index
      %18 = vector.load %arg4[%c0_12, %c0_13] : memref<256x128xf32, #tpu.memory_space<vmem>>, vector<256x128xf32>
      %19 = arith.addf %18, %15 : vector<256x128xf32>
      %c0_14 = arith.constant 0 : index
      %c0_15 = arith.constant 0 : index
      %20 = vector.load %arg5[%c0_14, %c0_15] : memref<256x128xf32, #tpu.memory_space<vmem>>, vector<256x128xf32>
      tpu.vector_store %arg5[%c0_14, %c0_15], %19 {strides = array<i32>} : memref<256x128xf32, #tpu.memory_space<vmem>>, vector<256x128xf32>,
    } else {
    }
    return
  }
  func.func @transform_0(%arg0: i32, %arg1: i32) -> (i32, i32) {
    %c0_i32 = arith.constant 0 : i32
    return %arg0, %arg1 : i32, i32
  }
  func.func @transform_1(%arg0: i32, %arg1: i32) -> (i32, i32) {
    %c0_i32 = arith.constant 0 : i32
    %c0_i32_0 = arith.constant 0 : i32
    %c0_i32_1 = arith.constant 0 : i32
    return %c0_i32, %c0_i32_0 : i32, i32
  }
  func.func @transform_2(%arg0: i32, %arg1: i32) -> (i32, i32) {
    %c0_i32 = arith.constant 0 : i32
    %c0_i32_0 = arith.constant 0 : i32
    return %arg0, %c0_i32 : i32, i32
  }
  func.func @transform_3(%arg0: i32, %arg1: i32) -> (i32, i32) {
    %c0_i32 = arith.constant 0 : i32
    %c0_i32_0 = arith.constant 0 : i32
    return %arg0, %c0_i32 : i32, i32
  }
  func.func @transform_4(%arg0: i32, %arg1: i32) -> (i32, i32) {
    %c0_i32 = arith.constant 0 : i32
    %c0_i32_0 = arith.constant 0 : i32
    return %arg0, %c0_i32 : i32, i32
  }
}

module attributes {stable_mosaic.version = 11 : i64} {
  func.func @_gather_score_kernel(%arg0: i32, %arg1: memref<8xi32, #tpu.memory_space<smem>>, %arg2: memref<8xi32, #tpu.memory_space<smem>>, %arg3: memref<512x128xf32, #tpu.memory_space<any>>, %arg4: memref<8x128xf32, #tpu.memory_space<vmem>>, %arg5: memref<16x128xf32, #tpu.memory_space<vmem>>, %arg6: memref<16x!tpu.dma_semaphore, #tpu.memory_space<semaphore_mem>>) attributes {dimension_semantics = [#tpu.dimension_semantics<parallel>], iteration_bounds = array<i64: 1>, scalar_prefetch = 2 : i64, scratch_operands = 2 : i64, tpu.core_type = #tpu.core_type<tc>, window_params = [{}, {transform_indices = @transform_1, window_bounds = array<i64: 8, 128>}]} {
    %c8_i32 = arith.constant 8 : i32
    %0 = arith.muli %arg0, %c8_i32 : i32
    %c0_i32 = arith.constant 0 : i32
    %1 = arith.addi %0, %c0_i32 : i32
    %2 = arith.index_cast %1 : i32 to index
    %3 = memref.load %arg1[%2] : memref<8xi32, #tpu.memory_space<smem>>
    %c0_i32_0 = arith.constant 0 : i32
    %4 = arith.addi %0, %c0_i32_0 : i32
    %5 = arith.index_cast %4 : i32 to index
    %6 = memref.load %arg2[%5] : memref<8xi32, #tpu.memory_space<smem>>
    %c0_i32_1 = arith.constant 0 : i32
    %c0_i32_2 = arith.constant 0 : i32
    %7 = tpu.memref_slice %arg3[%3, %c0_i32_2] : memref<512x128xf32, #tpu.memory_space<any>> -> memref<1x128xf32, #tpu.memory_space<any>>
    %c0_i32_3 = arith.constant 0 : i32
    %c0_i32_4 = arith.constant 0 : i32
    %8 = tpu.memref_slice %arg5[%c0_i32_3, %c0_i32_4] : memref<16x128xf32, #tpu.memory_space<vmem>> -> memref<1x128xf32, #tpu.memory_space<vmem>>
    %9 = tpu.memref_slice %arg6[%c0_i32_1] : memref<16x!tpu.dma_semaphore, #tpu.memory_space<semaphore_mem>> -> memref<1x!tpu.dma_semaphore, #tpu.memory_space<semaphore_mem>>
    %10 = tpu.memref_squeeze %9 : memref<1x!tpu.dma_semaphore, #tpu.memory_space<semaphore_mem>> -> memref<!tpu.dma_semaphore, #tpu.memory_space<semaphore_mem>>
    tpu.enqueue_dma source(%7 : memref<1x128xf32, #tpu.memory_space<any>>) target(%8 : memref<1x128xf32, #tpu.memory_space<vmem>>) target_semaphore(%10 : memref<!tpu.dma_semaphore, #tpu.memory_space<semaphore_mem>>)
    %c8_i32_5 = arith.constant 8 : i32
    %c0_i32_6 = arith.constant 0 : i32
    %11 = tpu.memref_slice %arg3[%6, %c0_i32_6] : memref<512x128xf32, #tpu.memory_space<any>> -> memref<1x128xf32, #tpu.memory_space<any>>
    %c8_i32_7 = arith.constant 8 : i32
    %c0_i32_8 = arith.constant 0 : i32
    %12 = tpu.memref_slice %arg5[%c8_i32_7, %c0_i32_8] : memref<16x128xf32, #tpu.memory_space<vmem>> -> memref<1x128xf32, #tpu.memory_space<vmem>>
    %13 = tpu.memref_slice %arg6[%c8_i32_5] : memref<16x!tpu.dma_semaphore, #tpu.memory_space<semaphore_mem>> -> memref<1x!tpu.dma_semaphore, #tpu.memory_space<semaphore_mem>>
    %14 = tpu.memref_squeeze %13 : memref<1x!tpu.dma_semaphore, #tpu.memory_space<semaphore_mem>> -> memref<!tpu.dma_semaphore, #tpu.memory_space<semaphore_mem>>
    tpu.enqueue_dma source(%11 : memref<1x128xf32, #tpu.memory_space<any>>) target(%12 : memref<1x128xf32, #tpu.memory_space<vmem>>) target_semaphore(%14 : memref<!tpu.dma_semaphore, #tpu.memory_space<semaphore_mem>>)
    %c1_i32 = arith.constant 1 : i32
    %15 = arith.addi %0, %c1_i32 : i32
    %16 = arith.index_cast %15 : i32 to index
    %17 = memref.load %arg1[%16] : memref<8xi32, #tpu.memory_space<smem>>
    %c1_i32_9 = arith.constant 1 : i32
    %18 = arith.addi %0, %c1_i32_9 : i32
    %19 = arith.index_cast %18 : i32 to index
    %20 = memref.load %arg2[%19] : memref<8xi32, #tpu.memory_space<smem>>
    %c1_i32_10 = arith.constant 1 : i32
    %c0_i32_11 = arith.constant 0 : i32
    %21 = tpu.memref_slice %arg3[%17, %c0_i32_11] : memref<512x128xf32, #tpu.memory_space<any>> -> memref<1x128xf32, #tpu.memory_space<any>>
    %c1_i32_12 = arith.constant 1 : i32
    %c0_i32_13 = arith.constant 0 : i32
    %22 = tpu.memref_slice %arg5[%c1_i32_12, %c0_i32_13] : memref<16x128xf32, #tpu.memory_space<vmem>> -> memref<1x128xf32, #tpu.memory_space<vmem>>
    %23 = tpu.memref_slice %arg6[%c1_i32_10] : memref<16x!tpu.dma_semaphore, #tpu.memory_space<semaphore_mem>> -> memref<1x!tpu.dma_semaphore, #tpu.memory_space<semaphore_mem>>
    %24 = tpu.memref_squeeze %23 : memref<1x!tpu.dma_semaphore, #tpu.memory_space<semaphore_mem>> -> memref<!tpu.dma_semaphore, #tpu.memory_space<semaphore_mem>>
    tpu.enqueue_dma source(%21 : memref<1x128xf32, #tpu.memory_space<any>>) target(%22 : memref<1x128xf32, #tpu.memory_space<vmem>>) target_semaphore(%24 : memref<!tpu.dma_semaphore, #tpu.memory_space<semaphore_mem>>)
    %c9_i32 = arith.constant 9 : i32
    %c0_i32_14 = arith.constant 0 : i32
    %25 = tpu.memref_slice %arg3[%20, %c0_i32_14] : memref<512x128xf32, #tpu.memory_space<any>> -> memref<1x128xf32, #tpu.memory_space<any>>
    %c9_i32_15 = arith.constant 9 : i32
    %c0_i32_16 = arith.constant 0 : i32
    %26 = tpu.memref_slice %arg5[%c9_i32_15, %c0_i32_16] : memref<16x128xf32, #tpu.memory_space<vmem>> -> memref<1x128xf32, #tpu.memory_space<vmem>>
    %27 = tpu.memref_slice %arg6[%c9_i32] : memref<16x!tpu.dma_semaphore, #tpu.memory_space<semaphore_mem>> -> memref<1x!tpu.dma_semaphore, #tpu.memory_space<semaphore_mem>>
    %28 = tpu.memref_squeeze %27 : memref<1x!tpu.dma_semaphore, #tpu.memory_space<semaphore_mem>> -> memref<!tpu.dma_semaphore, #tpu.memory_space<semaphore_mem>>
    tpu.enqueue_dma source(%25 : memref<1x128xf32, #tpu.memory_space<any>>) target(%26 : memref<1x128xf32, #tpu.memory_space<vmem>>) target_semaphore(%28 : memref<!tpu.dma_semaphore, #tpu.memory_space<semaphore_mem>>)
    %c2_i32 = arith.constant 2 : i32
    %29 = arith.addi %0, %c2_i32 : i32
    %30 = arith.index_cast %29 : i32 to index
    %31 = memref.load %arg1[%30] : memref<8xi32, #tpu.memory_space<smem>>
    %c2_i32_17 = arith.constant 2 : i32
    %32 = arith.addi %0, %c2_i32_17 : i32
    %33 = arith.index_cast %32 : i32 to index
    %34 = memref.load %arg2[%33] : memref<8xi32, #tpu.memory_space<smem>>
    %c2_i32_18 = arith.constant 2 : i32
    %c0_i32_19 = arith.constant 0 : i32
    %35 = tpu.memref_slice %arg3[%31, %c0_i32_19] : memref<512x128xf32, #tpu.memory_space<any>> -> memref<1x128xf32, #tpu.memory_space<any>>
    %c2_i32_20 = arith.constant 2 : i32
    %c0_i32_21 = arith.constant 0 : i32
    %36 = tpu.memref_slice %arg5[%c2_i32_20, %c0_i32_21] : memref<16x128xf32, #tpu.memory_space<vmem>> -> memref<1x128xf32, #tpu.memory_space<vmem>>
    %37 = tpu.memref_slice %arg6[%c2_i32_18] : memref<16x!tpu.dma_semaphore, #tpu.memory_space<semaphore_mem>> -> memref<1x!tpu.dma_semaphore, #tpu.memory_space<semaphore_mem>>
    %38 = tpu.memref_squeeze %37 : memref<1x!tpu.dma_semaphore, #tpu.memory_space<semaphore_mem>> -> memref<!tpu.dma_semaphore, #tpu.memory_space<semaphore_mem>>
    tpu.enqueue_dma source(%35 : memref<1x128xf32, #tpu.memory_space<any>>) target(%36 : memref<1x128xf32, #tpu.memory_space<vmem>>) target_semaphore(%38 : memref<!tpu.dma_semaphore, #tpu.memory_space<semaphore_mem>>)
    %c10_i32 = arith.constant 10 : i32
    %c0_i32_22 = arith.constant 0 : i32
    %39 = tpu.memref_slice %arg3[%34, %c0_i32_22] : memref<512x128xf32, #tpu.memory_space<any>> -> memref<1x128xf32, #tpu.memory_space<any>>
    %c10_i32_23 = arith.constant 10 : i32
    %c0_i32_24 = arith.constant 0 : i32
    %40 = tpu.memref_slice %arg5[%c10_i32_23, %c0_i32_24] : memref<16x128xf32, #tpu.memory_space<vmem>> -> memref<1x128xf32, #tpu.memory_space<vmem>>
    %41 = tpu.memref_slice %arg6[%c10_i32] : memref<16x!tpu.dma_semaphore, #tpu.memory_space<semaphore_mem>> -> memref<1x!tpu.dma_semaphore, #tpu.memory_space<semaphore_mem>>
    %42 = tpu.memref_squeeze %41 : memref<1x!tpu.dma_semaphore, #tpu.memory_space<semaphore_mem>> -> memref<!tpu.dma_semaphore, #tpu.memory_space<semaphore_mem>>
    tpu.enqueue_dma source(%39 : memref<1x128xf32, #tpu.memory_space<any>>) target(%40 : memref<1x128xf32, #tpu.memory_space<vmem>>) target_semaphore(%42 : memref<!tpu.dma_semaphore, #tpu.memory_space<semaphore_mem>>)
    %c3_i32 = arith.constant 3 : i32
    %43 = arith.addi %0, %c3_i32 : i32
    %44 = arith.index_cast %43 : i32 to index
    %45 = memref.load %arg1[%44] : memref<8xi32, #tpu.memory_space<smem>>
    %c3_i32_25 = arith.constant 3 : i32
    %46 = arith.addi %0, %c3_i32_25 : i32
    %47 = arith.index_cast %46 : i32 to index
    %48 = memref.load %arg2[%47] : memref<8xi32, #tpu.memory_space<smem>>
    %c3_i32_26 = arith.constant 3 : i32
    %c0_i32_27 = arith.constant 0 : i32
    %49 = tpu.memref_slice %arg3[%45, %c0_i32_27] : memref<512x128xf32, #tpu.memory_space<any>> -> memref<1x128xf32, #tpu.memory_space<any>>
    %c3_i32_28 = arith.constant 3 : i32
    %c0_i32_29 = arith.constant 0 : i32
    %50 = tpu.memref_slice %arg5[%c3_i32_28, %c0_i32_29] : memref<16x128xf32, #tpu.memory_space<vmem>> -> memref<1x128xf32, #tpu.memory_space<vmem>>
    %51 = tpu.memref_slice %arg6[%c3_i32_26] : memref<16x!tpu.dma_semaphore, #tpu.memory_space<semaphore_mem>> -> memref<1x!tpu.dma_semaphore, #tpu.memory_space<semaphore_mem>>
    %52 = tpu.memref_squeeze %51 : memref<1x!tpu.dma_semaphore, #tpu.memory_space<semaphore_mem>> -> memref<!tpu.dma_semaphore, #tpu.memory_space<semaphore_mem>>
    tpu.enqueue_dma source(%49 : memref<1x128xf32, #tpu.memory_space<any>>) target(%50 : memref<1x128xf32, #tpu.memory_space<vmem>>) target_semaphore(%52 : memref<!tpu.dma_semaphore, #tpu.memory_space<semaphore_mem>>)
    %c11_i32 = arith.constant 11 : i32
    %c0_i32_30 = arith.constant 0 : i32
    %53 = tpu.memref_slice %arg3[%48, %c0_i32_30] : memref<512x128xf32, #tpu.memory_space<any>> -> memref<1x128xf32, #tpu.memory_space<any>>
    %c11_i32_31 = arith.constant 11 : i32
    %c0_i32_32 = arith.constant 0 : i32
    %54 = tpu.memref_slice %arg5[%c11_i32_31, %c0_i32_32] : memref<16x128xf32, #tpu.memory_space<vmem>> -> memref<1x128xf32, #tpu.memory_space<vmem>>
    %55 = tpu.memref_slice %arg6[%c11_i32] : memref<16x!tpu.dma_semaphore, #tpu.memory_space<semaphore_mem>> -> memref<1x!tpu.dma_semaphore, #tpu.memory_space<semaphore_mem>>
    %56 = tpu.memref_squeeze %55 : memref<1x!tpu.dma_semaphore, #tpu.memory_space<semaphore_mem>> -> memref<!tpu.dma_semaphore, #tpu.memory_space<semaphore_mem>>
    tpu.enqueue_dma source(%53 : memref<1x128xf32, #tpu.memory_space<any>>) target(%54 : memref<1x128xf32, #tpu.memory_space<vmem>>) target_semaphore(%56 : memref<!tpu.dma_semaphore, #tpu.memory_space<semaphore_mem>>)
    %c4_i32 = arith.constant 4 : i32
    %57 = arith.addi %0, %c4_i32 : i32
    %58 = arith.index_cast %57 : i32 to index
    %59 = memref.load %arg1[%58] : memref<8xi32, #tpu.memory_space<smem>>
    %c4_i32_33 = arith.constant 4 : i32
    %60 = arith.addi %0, %c4_i32_33 : i32
    %61 = arith.index_cast %60 : i32 to index
    %62 = memref.load %arg2[%61] : memref<8xi32, #tpu.memory_space<smem>>
    %c4_i32_34 = arith.constant 4 : i32
    %c0_i32_35 = arith.constant 0 : i32
    %63 = tpu.memref_slice %arg3[%59, %c0_i32_35] : memref<512x128xf32, #tpu.memory_space<any>> -> memref<1x128xf32, #tpu.memory_space<any>>
    %c4_i32_36 = arith.constant 4 : i32
    %c0_i32_37 = arith.constant 0 : i32
    %64 = tpu.memref_slice %arg5[%c4_i32_36, %c0_i32_37] : memref<16x128xf32, #tpu.memory_space<vmem>> -> memref<1x128xf32, #tpu.memory_space<vmem>>
    %65 = tpu.memref_slice %arg6[%c4_i32_34] : memref<16x!tpu.dma_semaphore, #tpu.memory_space<semaphore_mem>> -> memref<1x!tpu.dma_semaphore, #tpu.memory_space<semaphore_mem>>
    %66 = tpu.memref_squeeze %65 : memref<1x!tpu.dma_semaphore, #tpu.memory_space<semaphore_mem>> -> memref<!tpu.dma_semaphore, #tpu.memory_space<semaphore_mem>>
    tpu.enqueue_dma source(%63 : memref<1x128xf32, #tpu.memory_space<any>>) target(%64 : memref<1x128xf32, #tpu.memory_space<vmem>>) target_semaphore(%66 : memref<!tpu.dma_semaphore, #tpu.memory_space<semaphore_mem>>)
    %c12_i32 = arith.constant 12 : i32
    %c0_i32_38 = arith.constant 0 : i32
    %67 = tpu.memref_slice %arg3[%62, %c0_i32_38] : memref<512x128xf32, #tpu.memory_space<any>> -> memref<1x128xf32, #tpu.memory_space<any>>
    %c12_i32_39 = arith.constant 12 : i32
    %c0_i32_40 = arith.constant 0 : i32
    %68 = tpu.memref_slice %arg5[%c12_i32_39, %c0_i32_40] : memref<16x128xf32, #tpu.memory_space<vmem>> -> memref<1x128xf32, #tpu.memory_space<vmem>>
    %69 = tpu.memref_slice %arg6[%c12_i32] : memref<16x!tpu.dma_semaphore, #tpu.memory_space<semaphore_mem>> -> memref<1x!tpu.dma_semaphore, #tpu.memory_space<semaphore_mem>>
    %70 = tpu.memref_squeeze %69 : memref<1x!tpu.dma_semaphore, #tpu.memory_space<semaphore_mem>> -> memref<!tpu.dma_semaphore, #tpu.memory_space<semaphore_mem>>
    tpu.enqueue_dma source(%67 : memref<1x128xf32, #tpu.memory_space<any>>) target(%68 : memref<1x128xf32, #tpu.memory_space<vmem>>) target_semaphore(%70 : memref<!tpu.dma_semaphore, #tpu.memory_space<semaphore_mem>>)
    %c5_i32 = arith.constant 5 : i32
    %71 = arith.addi %0, %c5_i32 : i32
    %72 = arith.index_cast %71 : i32 to index
    %73 = memref.load %arg1[%72] : memref<8xi32, #tpu.memory_space<smem>>
    %c5_i32_41 = arith.constant 5 : i32
    %74 = arith.addi %0, %c5_i32_41 : i32
    %75 = arith.index_cast %74 : i32 to index
    %76 = memref.load %arg2[%75] : memref<8xi32, #tpu.memory_space<smem>>
    %c5_i32_42 = arith.constant 5 : i32
    %c0_i32_43 = arith.constant 0 : i32
    %77 = tpu.memref_slice %arg3[%73, %c0_i32_43] : memref<512x128xf32, #tpu.memory_space<any>> -> memref<1x128xf32, #tpu.memory_space<any>>
    %c5_i32_44 = arith.constant 5 : i32
    %c0_i32_45 = arith.constant 0 : i32
    %78 = tpu.memref_slice %arg5[%c5_i32_44, %c0_i32_45] : memref<16x128xf32, #tpu.memory_space<vmem>> -> memref<1x128xf32, #tpu.memory_space<vmem>>
    %79 = tpu.memref_slice %arg6[%c5_i32_42] : memref<16x!tpu.dma_semaphore, #tpu.memory_space<semaphore_mem>> -> memref<1x!tpu.dma_semaphore, #tpu.memory_space<semaphore_mem>>
    %80 = tpu.memref_squeeze %79 : memref<1x!tpu.dma_semaphore, #tpu.memory_space<semaphore_mem>> -> memref<!tpu.dma_semaphore, #tpu.memory_space<semaphore_mem>>
    tpu.enqueue_dma source(%77 : memref<1x128xf32, #tpu.memory_space<any>>) target(%78 : memref<1x128xf32, #tpu.memory_space<vmem>>) target_semaphore(%80 : memref<!tpu.dma_semaphore, #tpu.memory_space<semaphore_mem>>)
    %c13_i32 = arith.constant 13 : i32
    %c0_i32_46 = arith.constant 0 : i32
    %81 = tpu.memref_slice %arg3[%76, %c0_i32_46] : memref<512x128xf32, #tpu.memory_space<any>> -> memref<1x128xf32, #tpu.memory_space<any>>
    %c13_i32_47 = arith.constant 13 : i32
    %c0_i32_48 = arith.constant 0 : i32
    %82 = tpu.memref_slice %arg5[%c13_i32_47, %c0_i32_48] : memref<16x128xf32, #tpu.memory_space<vmem>> -> memref<1x128xf32, #tpu.memory_space<vmem>>
    %83 = tpu.memref_slice %arg6[%c13_i32] : memref<16x!tpu.dma_semaphore, #tpu.memory_space<semaphore_mem>> -> memref<1x!tpu.dma_semaphore, #tpu.memory_space<semaphore_mem>>
    %84 = tpu.memref_squeeze %83 : memref<1x!tpu.dma_semaphore, #tpu.memory_space<semaphore_mem>> -> memref<!tpu.dma_semaphore, #tpu.memory_space<semaphore_mem>>
    tpu.enqueue_dma source(%81 : memref<1x128xf32, #tpu.memory_space<any>>) target(%82 : memref<1x128xf32, #tpu.memory_space<vmem>>) target_semaphore(%84 : memref<!tpu.dma_semaphore, #tpu.memory_space<semaphore_mem>>)
    %c6_i32 = arith.constant 6 : i32
    %85 = arith.addi %0, %c6_i32 : i32
    %86 = arith.index_cast %85 : i32 to index
    %87 = memref.load %arg1[%86] : memref<8xi32, #tpu.memory_space<smem>>
    %c6_i32_49 = arith.constant 6 : i32
    %88 = arith.addi %0, %c6_i32_49 : i32
    %89 = arith.index_cast %88 : i32 to index
    %90 = memref.load %arg2[%89] : memref<8xi32, #tpu.memory_space<smem>>
    %c6_i32_50 = arith.constant 6 : i32
    %c0_i32_51 = arith.constant 0 : i32
    %91 = tpu.memref_slice %arg3[%87, %c0_i32_51] : memref<512x128xf32, #tpu.memory_space<any>> -> memref<1x128xf32, #tpu.memory_space<any>>
    %c6_i32_52 = arith.constant 6 : i32
    %c0_i32_53 = arith.constant 0 : i32
    %92 = tpu.memref_slice %arg5[%c6_i32_52, %c0_i32_53] : memref<16x128xf32, #tpu.memory_space<vmem>> -> memref<1x128xf32, #tpu.memory_space<vmem>>
    %93 = tpu.memref_slice %arg6[%c6_i32_50] : memref<16x!tpu.dma_semaphore, #tpu.memory_space<semaphore_mem>> -> memref<1x!tpu.dma_semaphore, #tpu.memory_space<semaphore_mem>>
    %94 = tpu.memref_squeeze %93 : memref<1x!tpu.dma_semaphore, #tpu.memory_space<semaphore_mem>> -> memref<!tpu.dma_semaphore, #tpu.memory_space<semaphore_mem>>
    tpu.enqueue_dma source(%91 : memref<1x128xf32, #tpu.memory_space<any>>) target(%92 : memref<1x128xf32, #tpu.memory_space<vmem>>) target_semaphore(%94 : memref<!tpu.dma_semaphore, #tpu.memory_space<semaphore_mem>>)
    %c14_i32 = arith.constant 14 : i32
    %c0_i32_54 = arith.constant 0 : i32
    %95 = tpu.memref_slice %arg3[%90, %c0_i32_54] : memref<512x128xf32, #tpu.memory_space<any>> -> memref<1x128xf32, #tpu.memory_space<any>>
    %c14_i32_55 = arith.constant 14 : i32
    %c0_i32_56 = arith.constant 0 : i32
    %96 = tpu.memref_slice %arg5[%c14_i32_55, %c0_i32_56] : memref<16x128xf32, #tpu.memory_space<vmem>> -> memref<1x128xf32, #tpu.memory_space<vmem>>
    %97 = tpu.memref_slice %arg6[%c14_i32] : memref<16x!tpu.dma_semaphore, #tpu.memory_space<semaphore_mem>> -> memref<1x!tpu.dma_semaphore, #tpu.memory_space<semaphore_mem>>
    %98 = tpu.memref_squeeze %97 : memref<1x!tpu.dma_semaphore, #tpu.memory_space<semaphore_mem>> -> memref<!tpu.dma_semaphore, #tpu.memory_space<semaphore_mem>>
    tpu.enqueue_dma source(%95 : memref<1x128xf32, #tpu.memory_space<any>>) target(%96 : memref<1x128xf32, #tpu.memory_space<vmem>>) target_semaphore(%98 : memref<!tpu.dma_semaphore, #tpu.memory_space<semaphore_mem>>)
    %c7_i32 = arith.constant 7 : i32
    %99 = arith.addi %0, %c7_i32 : i32
    %100 = arith.index_cast %99 : i32 to index
    %101 = memref.load %arg1[%100] : memref<8xi32, #tpu.memory_space<smem>>
    %c7_i32_57 = arith.constant 7 : i32
    %102 = arith.addi %0, %c7_i32_57 : i32
    %103 = arith.index_cast %102 : i32 to index
    %104 = memref.load %arg2[%103] : memref<8xi32, #tpu.memory_space<smem>>
    %c7_i32_58 = arith.constant 7 : i32
    %c0_i32_59 = arith.constant 0 : i32
    %105 = tpu.memref_slice %arg3[%101, %c0_i32_59] : memref<512x128xf32, #tpu.memory_space<any>> -> memref<1x128xf32, #tpu.memory_space<any>>
    %c7_i32_60 = arith.constant 7 : i32
    %c0_i32_61 = arith.constant 0 : i32
    %106 = tpu.memref_slice %arg5[%c7_i32_60, %c0_i32_61] : memref<16x128xf32, #tpu.memory_space<vmem>> -> memref<1x128xf32, #tpu.memory_space<vmem>>
    %107 = tpu.memref_slice %arg6[%c7_i32_58] : memref<16x!tpu.dma_semaphore, #tpu.memory_space<semaphore_mem>> -> memref<1x!tpu.dma_semaphore, #tpu.memory_space<semaphore_mem>>
    %108 = tpu.memref_squeeze %107 : memref<1x!tpu.dma_semaphore, #tpu.memory_space<semaphore_mem>> -> memref<!tpu.dma_semaphore, #tpu.memory_space<semaphore_mem>>
    tpu.enqueue_dma source(%105 : memref<1x128xf32, #tpu.memory_space<any>>) target(%106 : memref<1x128xf32, #tpu.memory_space<vmem>>) target_semaphore(%108 : memref<!tpu.dma_semaphore, #tpu.memory_space<semaphore_mem>>)
    %c15_i32 = arith.constant 15 : i32
    %c0_i32_62 = arith.constant 0 : i32
    %109 = tpu.memref_slice %arg3[%104, %c0_i32_62] : memref<512x128xf32, #tpu.memory_space<any>> -> memref<1x128xf32, #tpu.memory_space<any>>
    %c15_i32_63 = arith.constant 15 : i32
    %c0_i32_64 = arith.constant 0 : i32
    %110 = tpu.memref_slice %arg5[%c15_i32_63, %c0_i32_64] : memref<16x128xf32, #tpu.memory_space<vmem>> -> memref<1x128xf32, #tpu.memory_space<vmem>>
    %111 = tpu.memref_slice %arg6[%c15_i32] : memref<16x!tpu.dma_semaphore, #tpu.memory_space<semaphore_mem>> -> memref<1x!tpu.dma_semaphore, #tpu.memory_space<semaphore_mem>>
    %112 = tpu.memref_squeeze %111 : memref<1x!tpu.dma_semaphore, #tpu.memory_space<semaphore_mem>> -> memref<!tpu.dma_semaphore, #tpu.memory_space<semaphore_mem>>
    tpu.enqueue_dma source(%109 : memref<1x128xf32, #tpu.memory_space<any>>) target(%110 : memref<1x128xf32, #tpu.memory_space<vmem>>) target_semaphore(%112 : memref<!tpu.dma_semaphore, #tpu.memory_space<semaphore_mem>>)
    %c0_i32_65 = arith.constant 0 : i32
    %c0_i32_66 = arith.constant 0 : i32
    %c0_i32_67 = arith.constant 0 : i32
    %113 = tpu.memref_slice %arg3[%c0_i32_66, %c0_i32_67] : memref<512x128xf32, #tpu.memory_space<any>> -> memref<1x128xf32, #tpu.memory_space<any>>
    %c0_i32_68 = arith.constant 0 : i32
    %c0_i32_69 = arith.constant 0 : i32
    %114 = tpu.memref_slice %arg5[%c0_i32_68, %c0_i32_69] : memref<16x128xf32, #tpu.memory_space<vmem>> -> memref<1x128xf32, #tpu.memory_space<vmem>>
    %115 = tpu.memref_slice %arg6[%c0_i32_65] : memref<16x!tpu.dma_semaphore, #tpu.memory_space<semaphore_mem>> -> memref<1x!tpu.dma_semaphore, #tpu.memory_space<semaphore_mem>>
    %116 = tpu.memref_squeeze %115 : memref<1x!tpu.dma_semaphore, #tpu.memory_space<semaphore_mem>> -> memref<!tpu.dma_semaphore, #tpu.memory_space<semaphore_mem>>
    tpu.wait_dma2 semaphore(%116 : memref<!tpu.dma_semaphore, #tpu.memory_space<semaphore_mem>>) src(%113 : memref<1x128xf32, #tpu.memory_space<any>>) dst(%114 : memref<1x128xf32, #tpu.memory_space<vmem>>)
    %c1_i32_70 = arith.constant 1 : i32
    %c0_i32_71 = arith.constant 0 : i32
    %c0_i32_72 = arith.constant 0 : i32
    %117 = tpu.memref_slice %arg3[%c0_i32_71, %c0_i32_72] : memref<512x128xf32, #tpu.memory_space<any>> -> memref<1x128xf32, #tpu.memory_space<any>>
    %c1_i32_73 = arith.constant 1 : i32
    %c0_i32_74 = arith.constant 0 : i32
    %118 = tpu.memref_slice %arg5[%c1_i32_73, %c0_i32_74] : memref<16x128xf32, #tpu.memory_space<vmem>> -> memref<1x128xf32, #tpu.memory_space<vmem>>
    %119 = tpu.memref_slice %arg6[%c1_i32_70] : memref<16x!tpu.dma_semaphore, #tpu.memory_space<semaphore_mem>> -> memref<1x!tpu.dma_semaphore, #tpu.memory_space<semaphore_mem>>
    %120 = tpu.memref_squeeze %119 : memref<1x!tpu.dma_semaphore, #tpu.memory_space<semaphore_mem>> -> memref<!tpu.dma_semaphore, #tpu.memory_space<semaphore_mem>>
    tpu.wait_dma2 semaphore(%120 : memref<!tpu.dma_semaphore, #tpu.memory_space<semaphore_mem>>) src(%117 : memref<1x128xf32, #tpu.memory_space<any>>) dst(%118 : memref<1x128xf32, #tpu.memory_space<vmem>>)
    %c2_i32_75 = arith.constant 2 : i32
    %c0_i32_76 = arith.constant 0 : i32
    %c0_i32_77 = arith.constant 0 : i32
    %121 = tpu.memref_slice %arg3[%c0_i32_76, %c0_i32_77] : memref<512x128xf32, #tpu.memory_space<any>> -> memref<1x128xf32, #tpu.memory_space<any>>
    %c2_i32_78 = arith.constant 2 : i32
    %c0_i32_79 = arith.constant 0 : i32
    %122 = tpu.memref_slice %arg5[%c2_i32_78, %c0_i32_79] : memref<16x128xf32, #tpu.memory_space<vmem>> -> memref<1x128xf32, #tpu.memory_space<vmem>>
    %123 = tpu.memref_slice %arg6[%c2_i32_75] : memref<16x!tpu.dma_semaphore, #tpu.memory_space<semaphore_mem>> -> memref<1x!tpu.dma_semaphore, #tpu.memory_space<semaphore_mem>>
    %124 = tpu.memref_squeeze %123 : memref<1x!tpu.dma_semaphore, #tpu.memory_space<semaphore_mem>> -> memref<!tpu.dma_semaphore, #tpu.memory_space<semaphore_mem>>
    tpu.wait_dma2 semaphore(%124 : memref<!tpu.dma_semaphore, #tpu.memory_space<semaphore_mem>>) src(%121 : memref<1x128xf32, #tpu.memory_space<any>>) dst(%122 : memref<1x128xf32, #tpu.memory_space<vmem>>)
    %c3_i32_80 = arith.constant 3 : i32
    %c0_i32_81 = arith.constant 0 : i32
    %c0_i32_82 = arith.constant 0 : i32
    %125 = tpu.memref_slice %arg3[%c0_i32_81, %c0_i32_82] : memref<512x128xf32, #tpu.memory_space<any>> -> memref<1x128xf32, #tpu.memory_space<any>>
    %c3_i32_83 = arith.constant 3 : i32
    %c0_i32_84 = arith.constant 0 : i32
    %126 = tpu.memref_slice %arg5[%c3_i32_83, %c0_i32_84] : memref<16x128xf32, #tpu.memory_space<vmem>> -> memref<1x128xf32, #tpu.memory_space<vmem>>
    %127 = tpu.memref_slice %arg6[%c3_i32_80] : memref<16x!tpu.dma_semaphore, #tpu.memory_space<semaphore_mem>> -> memref<1x!tpu.dma_semaphore, #tpu.memory_space<semaphore_mem>>
    %128 = tpu.memref_squeeze %127 : memref<1x!tpu.dma_semaphore, #tpu.memory_space<semaphore_mem>> -> memref<!tpu.dma_semaphore, #tpu.memory_space<semaphore_mem>>
    tpu.wait_dma2 semaphore(%128 : memref<!tpu.dma_semaphore, #tpu.memory_space<semaphore_mem>>) src(%125 : memref<1x128xf32, #tpu.memory_space<any>>) dst(%126 : memref<1x128xf32, #tpu.memory_space<vmem>>)
    %c4_i32_85 = arith.constant 4 : i32
    %c0_i32_86 = arith.constant 0 : i32
    %c0_i32_87 = arith.constant 0 : i32
    %129 = tpu.memref_slice %arg3[%c0_i32_86, %c0_i32_87] : memref<512x128xf32, #tpu.memory_space<any>> -> memref<1x128xf32, #tpu.memory_space<any>>
    %c4_i32_88 = arith.constant 4 : i32
    %c0_i32_89 = arith.constant 0 : i32
    %130 = tpu.memref_slice %arg5[%c4_i32_88, %c0_i32_89] : memref<16x128xf32, #tpu.memory_space<vmem>> -> memref<1x128xf32, #tpu.memory_space<vmem>>
    %131 = tpu.memref_slice %arg6[%c4_i32_85] : memref<16x!tpu.dma_semaphore, #tpu.memory_space<semaphore_mem>> -> memref<1x!tpu.dma_semaphore, #tpu.memory_space<semaphore_mem>>
    %132 = tpu.memref_squeeze %131 : memref<1x!tpu.dma_semaphore, #tpu.memory_space<semaphore_mem>> -> memref<!tpu.dma_semaphore, #tpu.memory_space<semaphore_mem>>
    tpu.wait_dma2 semaphore(%132 : memref<!tpu.dma_semaphore, #tpu.memory_space<semaphore_mem>>) src(%129 : memref<1x128xf32, #tpu.memory_space<any>>) dst(%130 : memref<1x128xf32, #tpu.memory_space<vmem>>)
    %c5_i32_90 = arith.constant 5 : i32
    %c0_i32_91 = arith.constant 0 : i32
    %c0_i32_92 = arith.constant 0 : i32
    %133 = tpu.memref_slice %arg3[%c0_i32_91, %c0_i32_92] : memref<512x128xf32, #tpu.memory_space<any>> -> memref<1x128xf32, #tpu.memory_space<any>>
    %c5_i32_93 = arith.constant 5 : i32
    %c0_i32_94 = arith.constant 0 : i32
    %134 = tpu.memref_slice %arg5[%c5_i32_93, %c0_i32_94] : memref<16x128xf32, #tpu.memory_space<vmem>> -> memref<1x128xf32, #tpu.memory_space<vmem>>
    %135 = tpu.memref_slice %arg6[%c5_i32_90] : memref<16x!tpu.dma_semaphore, #tpu.memory_space<semaphore_mem>> -> memref<1x!tpu.dma_semaphore, #tpu.memory_space<semaphore_mem>>
    %136 = tpu.memref_squeeze %135 : memref<1x!tpu.dma_semaphore, #tpu.memory_space<semaphore_mem>> -> memref<!tpu.dma_semaphore, #tpu.memory_space<semaphore_mem>>
    tpu.wait_dma2 semaphore(%136 : memref<!tpu.dma_semaphore, #tpu.memory_space<semaphore_mem>>) src(%133 : memref<1x128xf32, #tpu.memory_space<any>>) dst(%134 : memref<1x128xf32, #tpu.memory_space<vmem>>)
    %c6_i32_95 = arith.constant 6 : i32
    %c0_i32_96 = arith.constant 0 : i32
    %c0_i32_97 = arith.constant 0 : i32
    %137 = tpu.memref_slice %arg3[%c0_i32_96, %c0_i32_97] : memref<512x128xf32, #tpu.memory_space<any>> -> memref<1x128xf32, #tpu.memory_space<any>>
    %c6_i32_98 = arith.constant 6 : i32
    %c0_i32_99 = arith.constant 0 : i32
    %138 = tpu.memref_slice %arg5[%c6_i32_98, %c0_i32_99] : memref<16x128xf32, #tpu.memory_space<vmem>> -> memref<1x128xf32, #tpu.memory_space<vmem>>
    %139 = tpu.memref_slice %arg6[%c6_i32_95] : memref<16x!tpu.dma_semaphore, #tpu.memory_space<semaphore_mem>> -> memref<1x!tpu.dma_semaphore, #tpu.memory_space<semaphore_mem>>
    %140 = tpu.memref_squeeze %139 : memref<1x!tpu.dma_semaphore, #tpu.memory_space<semaphore_mem>> -> memref<!tpu.dma_semaphore, #tpu.memory_space<semaphore_mem>>
    tpu.wait_dma2 semaphore(%140 : memref<!tpu.dma_semaphore, #tpu.memory_space<semaphore_mem>>) src(%137 : memref<1x128xf32, #tpu.memory_space<any>>) dst(%138 : memref<1x128xf32, #tpu.memory_space<vmem>>)
    %c7_i32_100 = arith.constant 7 : i32
    %c0_i32_101 = arith.constant 0 : i32
    %c0_i32_102 = arith.constant 0 : i32
    %141 = tpu.memref_slice %arg3[%c0_i32_101, %c0_i32_102] : memref<512x128xf32, #tpu.memory_space<any>> -> memref<1x128xf32, #tpu.memory_space<any>>
    %c7_i32_103 = arith.constant 7 : i32
    %c0_i32_104 = arith.constant 0 : i32
    %142 = tpu.memref_slice %arg5[%c7_i32_103, %c0_i32_104] : memref<16x128xf32, #tpu.memory_space<vmem>> -> memref<1x128xf32, #tpu.memory_space<vmem>>
    %143 = tpu.memref_slice %arg6[%c7_i32_100] : memref<16x!tpu.dma_semaphore, #tpu.memory_space<semaphore_mem>> -> memref<1x!tpu.dma_semaphore, #tpu.memory_space<semaphore_mem>>
    %144 = tpu.memref_squeeze %143 : memref<1x!tpu.dma_semaphore, #tpu.memory_space<semaphore_mem>> -> memref<!tpu.dma_semaphore, #tpu.memory_space<semaphore_mem>>
    tpu.wait_dma2 semaphore(%144 : memref<!tpu.dma_semaphore, #tpu.memory_space<semaphore_mem>>) src(%141 : memref<1x128xf32, #tpu.memory_space<any>>) dst(%142 : memref<1x128xf32, #tpu.memory_space<vmem>>)
    %c8_i32_105 = arith.constant 8 : i32
    %c0_i32_106 = arith.constant 0 : i32
    %c0_i32_107 = arith.constant 0 : i32
    %145 = tpu.memref_slice %arg3[%c0_i32_106, %c0_i32_107] : memref<512x128xf32, #tpu.memory_space<any>> -> memref<1x128xf32, #tpu.memory_space<any>>
    %c8_i32_108 = arith.constant 8 : i32
    %c0_i32_109 = arith.constant 0 : i32
    %146 = tpu.memref_slice %arg5[%c8_i32_108, %c0_i32_109] : memref<16x128xf32, #tpu.memory_space<vmem>> -> memref<1x128xf32, #tpu.memory_space<vmem>>
    %147 = tpu.memref_slice %arg6[%c8_i32_105] : memref<16x!tpu.dma_semaphore, #tpu.memory_space<semaphore_mem>> -> memref<1x!tpu.dma_semaphore, #tpu.memory_space<semaphore_mem>>
    %148 = tpu.memref_squeeze %147 : memref<1x!tpu.dma_semaphore, #tpu.memory_space<semaphore_mem>> -> memref<!tpu.dma_semaphore, #tpu.memory_space<semaphore_mem>>
    tpu.wait_dma2 semaphore(%148 : memref<!tpu.dma_semaphore, #tpu.memory_space<semaphore_mem>>) src(%145 : memref<1x128xf32, #tpu.memory_space<any>>) dst(%146 : memref<1x128xf32, #tpu.memory_space<vmem>>)
    %c9_i32_110 = arith.constant 9 : i32
    %c0_i32_111 = arith.constant 0 : i32
    %c0_i32_112 = arith.constant 0 : i32
    %149 = tpu.memref_slice %arg3[%c0_i32_111, %c0_i32_112] : memref<512x128xf32, #tpu.memory_space<any>> -> memref<1x128xf32, #tpu.memory_space<any>>
    %c9_i32_113 = arith.constant 9 : i32
    %c0_i32_114 = arith.constant 0 : i32
    %150 = tpu.memref_slice %arg5[%c9_i32_113, %c0_i32_114] : memref<16x128xf32, #tpu.memory_space<vmem>> -> memref<1x128xf32, #tpu.memory_space<vmem>>
    %151 = tpu.memref_slice %arg6[%c9_i32_110] : memref<16x!tpu.dma_semaphore, #tpu.memory_space<semaphore_mem>> -> memref<1x!tpu.dma_semaphore, #tpu.memory_space<semaphore_mem>>
    %152 = tpu.memref_squeeze %151 : memref<1x!tpu.dma_semaphore, #tpu.memory_space<semaphore_mem>> -> memref<!tpu.dma_semaphore, #tpu.memory_space<semaphore_mem>>
    tpu.wait_dma2 semaphore(%152 : memref<!tpu.dma_semaphore, #tpu.memory_space<semaphore_mem>>) src(%149 : memref<1x128xf32, #tpu.memory_space<any>>) dst(%150 : memref<1x128xf32, #tpu.memory_space<vmem>>)
    %c10_i32_115 = arith.constant 10 : i32
    %c0_i32_116 = arith.constant 0 : i32
    %c0_i32_117 = arith.constant 0 : i32
    %153 = tpu.memref_slice %arg3[%c0_i32_116, %c0_i32_117] : memref<512x128xf32, #tpu.memory_space<any>> -> memref<1x128xf32, #tpu.memory_space<any>>
    %c10_i32_118 = arith.constant 10 : i32
    %c0_i32_119 = arith.constant 0 : i32
    %154 = tpu.memref_slice %arg5[%c10_i32_118, %c0_i32_119] : memref<16x128xf32, #tpu.memory_space<vmem>> -> memref<1x128xf32, #tpu.memory_space<vmem>>
    %155 = tpu.memref_slice %arg6[%c10_i32_115] : memref<16x!tpu.dma_semaphore, #tpu.memory_space<semaphore_mem>> -> memref<1x!tpu.dma_semaphore, #tpu.memory_space<semaphore_mem>>
    %156 = tpu.memref_squeeze %155 : memref<1x!tpu.dma_semaphore, #tpu.memory_space<semaphore_mem>> -> memref<!tpu.dma_semaphore, #tpu.memory_space<semaphore_mem>>
    tpu.wait_dma2 semaphore(%156 : memref<!tpu.dma_semaphore, #tpu.memory_space<semaphore_mem>>) src(%153 : memref<1x128xf32, #tpu.memory_space<any>>) dst(%154 : memref<1x128xf32, #tpu.memory_space<vmem>>)
    %c11_i32_120 = arith.constant 11 : i32
    %c0_i32_121 = arith.constant 0 : i32
    %c0_i32_122 = arith.constant 0 : i32
    %157 = tpu.memref_slice %arg3[%c0_i32_121, %c0_i32_122] : memref<512x128xf32, #tpu.memory_space<any>> -> memref<1x128xf32, #tpu.memory_space<any>>
    %c11_i32_123 = arith.constant 11 : i32
    %c0_i32_124 = arith.constant 0 : i32
    %158 = tpu.memref_slice %arg5[%c11_i32_123, %c0_i32_124] : memref<16x128xf32, #tpu.memory_space<vmem>> -> memref<1x128xf32, #tpu.memory_space<vmem>>
    %159 = tpu.memref_slice %arg6[%c11_i32_120] : memref<16x!tpu.dma_semaphore, #tpu.memory_space<semaphore_mem>> -> memref<1x!tpu.dma_semaphore, #tpu.memory_space<semaphore_mem>>
    %160 = tpu.memref_squeeze %159 : memref<1x!tpu.dma_semaphore, #tpu.memory_space<semaphore_mem>> -> memref<!tpu.dma_semaphore, #tpu.memory_space<semaphore_mem>>
    tpu.wait_dma2 semaphore(%160 : memref<!tpu.dma_semaphore, #tpu.memory_space<semaphore_mem>>) src(%157 : memref<1x128xf32, #tpu.memory_space<any>>) dst(%158 : memref<1x128xf32, #tpu.memory_space<vmem>>)
    %c12_i32_125 = arith.constant 12 : i32
    %c0_i32_126 = arith.constant 0 : i32
    %c0_i32_127 = arith.constant 0 : i32
    %161 = tpu.memref_slice %arg3[%c0_i32_126, %c0_i32_127] : memref<512x128xf32, #tpu.memory_space<any>> -> memref<1x128xf32, #tpu.memory_space<any>>
    %c12_i32_128 = arith.constant 12 : i32
    %c0_i32_129 = arith.constant 0 : i32
    %162 = tpu.memref_slice %arg5[%c12_i32_128, %c0_i32_129] : memref<16x128xf32, #tpu.memory_space<vmem>> -> memref<1x128xf32, #tpu.memory_space<vmem>>
    %163 = tpu.memref_slice %arg6[%c12_i32_125] : memref<16x!tpu.dma_semaphore, #tpu.memory_space<semaphore_mem>> -> memref<1x!tpu.dma_semaphore, #tpu.memory_space<semaphore_mem>>
    %164 = tpu.memref_squeeze %163 : memref<1x!tpu.dma_semaphore, #tpu.memory_space<semaphore_mem>> -> memref<!tpu.dma_semaphore, #tpu.memory_space<semaphore_mem>>
    tpu.wait_dma2 semaphore(%164 : memref<!tpu.dma_semaphore, #tpu.memory_space<semaphore_mem>>) src(%161 : memref<1x128xf32, #tpu.memory_space<any>>) dst(%162 : memref<1x128xf32, #tpu.memory_space<vmem>>)
    %c13_i32_130 = arith.constant 13 : i32
    %c0_i32_131 = arith.constant 0 : i32
    %c0_i32_132 = arith.constant 0 : i32
    %165 = tpu.memref_slice %arg3[%c0_i32_131, %c0_i32_132] : memref<512x128xf32, #tpu.memory_space<any>> -> memref<1x128xf32, #tpu.memory_space<any>>
    %c13_i32_133 = arith.constant 13 : i32
    %c0_i32_134 = arith.constant 0 : i32
    %166 = tpu.memref_slice %arg5[%c13_i32_133, %c0_i32_134] : memref<16x128xf32, #tpu.memory_space<vmem>> -> memref<1x128xf32, #tpu.memory_space<vmem>>
    %167 = tpu.memref_slice %arg6[%c13_i32_130] : memref<16x!tpu.dma_semaphore, #tpu.memory_space<semaphore_mem>> -> memref<1x!tpu.dma_semaphore, #tpu.memory_space<semaphore_mem>>
    %168 = tpu.memref_squeeze %167 : memref<1x!tpu.dma_semaphore, #tpu.memory_space<semaphore_mem>> -> memref<!tpu.dma_semaphore, #tpu.memory_space<semaphore_mem>>
    tpu.wait_dma2 semaphore(%168 : memref<!tpu.dma_semaphore, #tpu.memory_space<semaphore_mem>>) src(%165 : memref<1x128xf32, #tpu.memory_space<any>>) dst(%166 : memref<1x128xf32, #tpu.memory_space<vmem>>)
    %c14_i32_135 = arith.constant 14 : i32
    %c0_i32_136 = arith.constant 0 : i32
    %c0_i32_137 = arith.constant 0 : i32
    %169 = tpu.memref_slice %arg3[%c0_i32_136, %c0_i32_137] : memref<512x128xf32, #tpu.memory_space<any>> -> memref<1x128xf32, #tpu.memory_space<any>>
    %c14_i32_138 = arith.constant 14 : i32
    %c0_i32_139 = arith.constant 0 : i32
    %170 = tpu.memref_slice %arg5[%c14_i32_138, %c0_i32_139] : memref<16x128xf32, #tpu.memory_space<vmem>> -> memref<1x128xf32, #tpu.memory_space<vmem>>
    %171 = tpu.memref_slice %arg6[%c14_i32_135] : memref<16x!tpu.dma_semaphore, #tpu.memory_space<semaphore_mem>> -> memref<1x!tpu.dma_semaphore, #tpu.memory_space<semaphore_mem>>
    %172 = tpu.memref_squeeze %171 : memref<1x!tpu.dma_semaphore, #tpu.memory_space<semaphore_mem>> -> memref<!tpu.dma_semaphore, #tpu.memory_space<semaphore_mem>>
    tpu.wait_dma2 semaphore(%172 : memref<!tpu.dma_semaphore, #tpu.memory_space<semaphore_mem>>) src(%169 : memref<1x128xf32, #tpu.memory_space<any>>) dst(%170 : memref<1x128xf32, #tpu.memory_space<vmem>>)
    %c15_i32_140 = arith.constant 15 : i32
    %c0_i32_141 = arith.constant 0 : i32
    %c0_i32_142 = arith.constant 0 : i32
    %173 = tpu.memref_slice %arg3[%c0_i32_141, %c0_i32_142] : memref<512x128xf32, #tpu.memory_space<any>> -> memref<1x128xf32, #tpu.memory_space<any>>
    %c15_i32_143 = arith.constant 15 : i32
    %c0_i32_144 = arith.constant 0 : i32
    %174 = tpu.memref_slice %arg5[%c15_i32_143, %c0_i32_144] : memref<16x128xf32, #tpu.memory_space<vmem>> -> memref<1x128xf32, #tpu.memory_space<vmem>>
    %175 = tpu.memref_slice %arg6[%c15_i32_140] : memref<16x!tpu.dma_semaphore, #tpu.memory_space<semaphore_mem>> -> memref<1x!tpu.dma_semaphore, #tpu.memory_space<semaphore_mem>>
    %176 = tpu.memref_squeeze %175 : memref<1x!tpu.dma_semaphore, #tpu.memory_space<semaphore_mem>> -> memref<!tpu.dma_semaphore, #tpu.memory_space<semaphore_mem>>
    tpu.wait_dma2 semaphore(%176 : memref<!tpu.dma_semaphore, #tpu.memory_space<semaphore_mem>>) src(%173 : memref<1x128xf32, #tpu.memory_space<any>>) dst(%174 : memref<1x128xf32, #tpu.memory_space<vmem>>)
    %c0 = arith.constant 0 : index
    %c0_145 = arith.constant 0 : index
    %177 = vector.load %arg5[%c0, %c0_145] : memref<16x128xf32, #tpu.memory_space<vmem>>, vector<8x128xf32>
    %c8 = arith.constant 8 : index
    %c0_146 = arith.constant 0 : index
    %178 = vector.load %arg5[%c8, %c0_146] : memref<16x128xf32, #tpu.memory_space<vmem>>, vector<8x128xf32>
    %179 = arith.mulf %177, %178 : vector<8x128xf32>
    %cst = arith.constant dense<0.000000e+00> : vector<8xf32>
    %180 = vector.multi_reduction <add>, %179, %cst [1] : vector<8x128xf32> to vector<8xf32>
    %181 = vector.shape_cast %180 : vector<8xf32> to vector<8x1xf32>
    %182 = vector.shape_cast %181 : vector<8x1xf32> to vector<8x1xf32>
    %183 = vector.broadcast %182 : vector<8x1xf32> to vector<8x128xf32>
    %c0_147 = arith.constant 0 : index
    %c0_148 = arith.constant 0 : index
    %184 = vector.load %arg4[%c0_147, %c0_148] : memref<8x128xf32, #tpu.memory_space<vmem>>, vector<8x128xf32>
    tpu.vector_store %arg4[%c0_147, %c0_148], %183 {strides = array<i32>} : memref<8x128xf32, #tpu.memory_space<vmem>>, vector<8x128xf32>,
    return
  }
  func.func @transform_1(%arg0: i32, %arg1: memref<8xi32, #tpu.memory_space<smem>>, %arg2: memref<8xi32, #tpu.memory_space<smem>>) -> (i32, i32) {
    %c0_i32 = arith.constant 0 : i32
    %c0_i32_0 = arith.constant 0 : i32
    return %arg0, %c0_i32 : i32, i32
  }
}

</mosaic_0001>

<bundles_post_ra>
// kernel: dlightgcn_forward.7
= control target key start
LH: loop header
LB: loop body
LE: loop exit
PB: predicated region body
PF: predicated region fallthrough
CT: control target
= control target key end

     0   :  { %s959_s18 = smov [#allocation5]   ;;  %s960_s19 = smov [#allocation6]   ;;  %s1038_s0 = inlined_call_operand.vmem [shape: s32[8], index: 0, kind: input, shape index: {}]   ;;  %s1039_s2 = inlined_call_operand.vmem [shape: f32[512,128], index: 2, kind: input, shape index: {}]   ;;  %s1040_s3 = inlined_call_operand.vmem [shape: f32[8,128], index: 3, kind: output, shape index: {}]   ;;  %s1041_s1 = inlined_call_operand.vmem [shape: s32[8], index: 1, kind: input, shape index: {}]  }
   0x1   :  { %s9_s14 = sshll.u32 %s1038_s0, 4  ;;  %s14_s17 = sshll.u32 %s1041_s1, 4  ;;  %s10_s14 = int_to_ptr.vmem [resolvable:$true] %s9_s14  ;;  %s15_s17 = int_to_ptr.vmem [resolvable:$true] %s14_s17 }
   0x2   :  { %12 = dma.vmem_to_smem %s10_s14, 16, %s959_s18, [#allocation4] }
   0x3   :  { %17 = dma.vmem_to_smem %s15_s17, 16, %s960_s19, [#allocation4] }
   0x4   :  { %925 = dma.done.wait [#allocation4], 32 }
   0x5   :  { %926 = vsyncadd [#allocation4], 4294967264 }
   0x6   :  { %20 = sfence }
   0x7   :  { %s22_s20 = sld [smem:[#allocation5]] }
   0x8   :  { %s23_s21 = sld [smem:[#allocation6]] }
   0xd   :  { %s24_s24 = scalar_lea.vmem %s1039_s2, %s22_s20 }
   0xe   :  { %v39_v0 = vld [vmem:[%s24_s24] sm:$0x1] }
   0xf   :  { %40 = vst [vmem:[#allocation2] sm:$0x1] %v39_v0 }
  0x10   :  { %58 = vsyncadd [#allocation3], 16  ;;  %s59_s25 = scalar_lea.vmem %s1039_s2, %s23_s21 }
  0x11   :  { %v76_v1 = vld [vmem:[%s59_s25] sm:$0x1] }
  0x12   :  { %77 = vst [vmem:[#allocation2 + $0x8] sm:$0x1] %v76_v1 }
  0x13   :  { %95 = vsyncadd [#allocation3 + $0x8], 16  ;;  %s869_s26 = sld [smem:[#allocation5 + $0x1]] }
  0x14   :  { %s870_s27 = sld [smem:[#allocation6 + $0x1]] }
  0x19   :  { %s99_s30 = scalar_lea.vmem %s1039_s2, %s869_s26 }
  0x1a   :  { %v116_v2 = vld [vmem:[%s99_s30] sm:$0x1] }
  0x1b   :  { %117 = vst [vmem:[#allocation2 + $0x1] sm:$0x1] %v116_v2 }
  0x1c   :  { %135 = vsyncadd [#allocation3 + $0x1], 16  ;;  %s136_s6 = scalar_lea.vmem %s1039_s2, %s870_s27 }
  0x1d   :  { %v153_v3 = vld [vmem:[%s136_s6] sm:$0x1] }
  0x1e   :  { %154 = vst [vmem:[#allocation2 + $0x9] sm:$0x1] %v153_v3 }
  0x1f   :  { %172 = vsyncadd [#allocation3 + $0x9], 16  ;;  %s871_s7 = sld [smem:[#allocation5 + $0x2]] }
  0x20   :  { %s872_s8 = sld [smem:[#allocation6 + $0x2]] }
  0x25   :  { %s176_s11 = scalar_lea.vmem %s1039_s2, %s871_s7 }
  0x26   :  { %v193_v4 = vld [vmem:[%s176_s11] sm:$0x1] }
  0x27   :  { %194 = vst [vmem:[#allocation2 + $0x2] sm:$0x1] %v193_v4 }
  0x28   :  { %212 = vsyncadd [#allocation3 + $0x2], 16  ;;  %s213_s14 = scalar_lea.vmem %s1039_s2, %s872_s8 }
  0x29   :  { %v230_v5 = vld [vmem:[%s213_s14] sm:$0x1] }
  0x2a   :  { %231 = vst [vmem:[#allocation2 + $0xa] sm:$0x1] %v230_v5 }
  0x2b   :  { %249 = vsyncadd [#allocation3 + $0xa], 16  ;;  %s873_s15 = sld [smem:[#allocation5 + $0x3]] }
  0x2c   :  { %s874_s16 = sld [smem:[#allocation6 + $0x3]] }
  0x31   :  { %s253_s19 = scalar_lea.vmem %s1039_s2, %s873_s15 }
  0x32   :  { %v270_v6 = vld [vmem:[%s253_s19] sm:$0x1] }
  0x33   :  { %271 = vst [vmem:[#allocation2 + $0x3] sm:$0x1] %v270_v6 }
  0x34   :  { %289 = vsyncadd [#allocation3 + $0x3], 16  ;;  %s290_s22 = scalar_lea.vmem %s1039_s2, %s874_s16 }
  0x35   :  { %v307_v7 = vld [vmem:[%s290_s22] sm:$0x1] }
  0x36   :  { %308 = vst [vmem:[#allocation2 + $0xb] sm:$0x1] %v307_v7 }
  0x37   :  { %326 = vsyncadd [#allocation3 + $0xb], 16  ;;  %s875_s23 = sld [smem:[#allocation5 + $0x4]] }
  0x38   :  { %s876_s24 = sld [smem:[#allocation6 + $0x4]] }
  0x3d   :  { %s330_s25 = scalar_lea.vmem %s1039_s2, %s875_s23 }
  0x3e   :  { %v347_v8 = vld [vmem:[%s330_s25] sm:$0x1] }
  0x3f   :  { %348 = vst [vmem:[#allocation2 + $0x4] sm:$0x1] %v347_v8 }
  0x40   :  { %366 = vsyncadd [#allocation3 + $0x4], 16  ;;  %s367_s28 = scalar_lea.vmem %s1039_s2, %s876_s24 }
  0x41   :  { %v384_v9 = vld [vmem:[%s367_s28] sm:$0x1] }
  0x42   :  { %385 = vst [vmem:[#allocation2 + $0xc] sm:$0x1] %v384_v9 }
  0x43   :  { %403 = vsyncadd [#allocation3 + $0xc], 16  ;;  %s877_s29 = sld [smem:[#allocation5 + $0x5]] }
  0x44   :  { %s878_s30 = sld [smem:[#allocation6 + $0x5]] }
  0x49   :  { %s407_s6 = scalar_lea.vmem %s1039_s2, %s877_s29 }
  0x4a   :  { %v424_v10 = vld [vmem:[%s407_s6] sm:$0x1] }
  0x4b   :  { %425 = vst [vmem:[#allocation2 + $0x5] sm:$0x1] %v424_v10 }
  0x4c   :  { %443 = vsyncadd [#allocation3 + $0x5], 16  ;;  %s444_s9 = scalar_lea.vmem %s1039_s2, %s878_s30 }
  0x4d   :  { %v461_v11 = vld [vmem:[%s444_s9] sm:$0x1] }
  0x4e   :  { %462 = vst [vmem:[#allocation2 + $0xd] sm:$0x1] %v461_v11 }
  0x4f   :  { %480 = vsyncadd [#allocation3 + $0xd], 16  ;;  %s879_s10 = sld [smem:[#allocation5 + $0x6]] }
  0x50   :  { %s880_s11 = sld [smem:[#allocation6 + $0x6]] }
  0x55   :  { %s484_s14 = scalar_lea.vmem %s1039_s2, %s879_s10 }
  0x56   :  { %v501_v12 = vld [vmem:[%s484_s14] sm:$0x1] }
  0x57   :  { %502 = vst [vmem:[#allocation2 + $0x6] sm:$0x1] %v501_v12 }
  0x58   :  { %520 = vsyncadd [#allocation3 + $0x6], 16  ;;  %s521_s17 = scalar_lea.vmem %s1039_s2, %s880_s11 }
  0x59   :  { %v538_v13 = vld [vmem:[%s521_s17] sm:$0x1] }
  0x5a   :  { %539 = vst [vmem:[#allocation2 + $0xe] sm:$0x1] %v538_v13 }
  0x5b   :  { %557 = vsyncadd [#allocation3 + $0xe], 16  ;;  %s881_s18 = sld [smem:[#allocation5 + $0x7]] }
  0x5c   :  { %s882_s19 = sld [smem:[#allocation6 + $0x7]] }
  0x61   :  { %s561_s22 = scalar_lea.vmem %s1039_s2, %s881_s18 }
  0x62   :  { %v578_v14 = vld [vmem:[%s561_s22] sm:$0x1] }
  0x63   :  { %579 = vst [vmem:[#allocation2 + $0x7] sm:$0x1] %v578_v14 }
  0x64   :  { %597 = vsyncadd [#allocation3 + $0x7], 16  ;;  %s598_s0 = scalar_lea.vmem %s1039_s2, %s882_s19 }
  0x65   :  { %v615_v15 = vld [vmem:[%s598_s0] sm:$0x1] }
  0x66   :  { %616 = vst [vmem:[#allocation2 + $0xf] sm:$0x1] %v615_v15 }
  0x67   :  { %634 = vsyncadd [#allocation3 + $0xf], 16 }
  0x68   :  { %927 = dma.done.wait [#allocation3], 16 }
  0x69   :  { %928 = vsyncadd [#allocation3], 4294967280 }
  0x6a   :  { %929 = dma.done.wait [#allocation3 + $0x1], 16 }
  0x6b   :  { %930 = vsyncadd [#allocation3 + $0x1], 4294967280 }
  0x6c   :  { %931 = dma.done.wait [#allocation3 + $0x2], 16 }
  0x6d   :  { %932 = vsyncadd [#allocation3 + $0x2], 4294967280 }
  0x6e   :  { %933 = dma.done.wait [#allocation3 + $0x3], 16 }
  0x6f   :  { %934 = vsyncadd [#allocation3 + $0x3], 4294967280 }
  0x70   :  { %935 = dma.done.wait [#allocation3 + $0x4], 16 }
  0x71   :  { %936 = vsyncadd [#allocation3 + $0x4], 4294967280 }
  0x72   :  { %937 = dma.done.wait [#allocation3 + $0x5], 16 }
  0x73   :  { %938 = vsyncadd [#allocation3 + $0x5], 4294967280 }
  0x74   :  { %939 = dma.done.wait [#allocation3 + $0x6], 16 }
  0x75   :  { %940 = vsyncadd [#allocation3 + $0x6], 4294967280 }
  0x76   :  { %941 = dma.done.wait [#allocation3 + $0x7], 16 }
  0x77   :  { %942 = vsyncadd [#allocation3 + $0x7], 4294967280 }
  0x78   :  { %943 = dma.done.wait [#allocation3 + $0x8], 16 }
  0x79   :  { %944 = vsyncadd [#allocation3 + $0x8], 4294967280 }
  0x7a   :  { %945 = dma.done.wait [#allocation3 + $0x9], 16 }
  0x7b   :  { %946 = vsyncadd [#allocation3 + $0x9], 4294967280 }
  0x7c   :  { %947 = dma.done.wait [#allocation3 + $0xa], 16 }
  0x7d   :  { %948 = vsyncadd [#allocation3 + $0xa], 4294967280 }
  0x7e   :  { %949 = dma.done.wait [#allocation3 + $0xb], 16 }
  0x7f   :  { %950 = vsyncadd [#allocation3 + $0xb], 4294967280 }
  0x80   :  { %951 = dma.done.wait [#allocation3 + $0xc], 16 }
  0x81   :  { %952 = vsyncadd [#allocation3 + $0xc], 4294967280 }
  0x82   :  { %953 = dma.done.wait [#allocation3 + $0xd], 16 }
  0x83   :  { %954 = vsyncadd [#allocation3 + $0xd], 4294967280 }
  0x84   :  { %955 = dma.done.wait [#allocation3 + $0xe], 16 }
  0x85   :  { %956 = vsyncadd [#allocation3 + $0xe], 4294967280 }
  0x86   :  { %957 = dma.done.wait [#allocation3 + $0xf], 16 }
  0x87   :  { %958 = vsyncadd [#allocation3 + $0xf], 4294967280  ;;  %v668_v16 = vld [vmem:[#allocation2] sm:$0xff]  ;;  %v669_v17 = vld [vmem:[#allocation2 + $0x8] sm:$0xff] }
  0x88   :  { %v670_v18 = vmul.f32 %v669_v17, %v668_v16 }
  0x8a   :  { %671 = vadd.xlane.f32.xlu0 %v670_v18 }
  0xfd   :  { %v672_v19 = vpop.xlane.xlu0 %671 }
  0xfe   :  { %673 = vst [vmem:[%s1040_s3] sm:$0xff] %v672_v19 }
  0xff   :  { %678 = vsyncmov [#allocation3] }
 0x102   :  { %s679_s25 = vpop.sfrf %678 }
 0x103   :  { %p883_p0 = scmp.ne.s32.totalorder %s679_s25, 0 }
 0x105   :  { %683 = shalt.err (%p883_p0)  }
 0x106   :  { %685 = vsyncmov [#allocation3 + $0x1] }
 0x109   :  { %s686_s26 = vpop.sfrf %685 }
 0x10a   :  { %p884_p1 = scmp.ne.s32.totalorder %s686_s26, 0 }
 0x10c   :  { %690 = shalt.err (%p884_p1)  }
 0x10d   :  { %692 = vsyncmov [#allocation3 + $0x2] }
 0x110   :  { %s693_s27 = vpop.sfrf %692 }
 0x111   :  { %p885_p2 = scmp.ne.s32.totalorder %s693_s27, 0 }
 0x113   :  { %697 = shalt.err (%p885_p2)  }
 0x114   :  { %699 = vsyncmov [#allocation3 + $0x3] }
 0x117   :  { %s700_s28 = vpop.sfrf %699 }
 0x118   :  { %p886_p3 = scmp.ne.s32.totalorder %s700_s28, 0 }
 0x11a   :  { %704 = shalt.err (%p886_p3)  }
 0x11b   :  { %706 = vsyncmov [#allocation3 + $0x4] }
 0x11e   :  { %s707_s29 = vpop.sfrf %706 }
 0x11f   :  { %p887_p4 = scmp.ne.s32.totalorder %s707_s29, 0 }
 0x121   :  { %711 = shalt.err (%p887_p4)  }
 0x122   :  { %713 = vsyncmov [#allocation3 + $0x5] }
 0x125   :  { %s714_s3 = vpop.sfrf %713 }
 0x126   :  { %p888_p5 = scmp.ne.s32.totalorder %s714_s3, 0 }
 0x128   :  { %718 = shalt.err (%p888_p5)  }
 0x129   :  { %720 = vsyncmov [#allocation3 + $0x6] }
 0x12c   :  { %s721_s30 = vpop.sfrf %720 }
 0x12d   :  { %p889_p6 = scmp.ne.s32.totalorder %s721_s30, 0 }
 0x12f   :  { %725 = shalt.err (%p889_p6)  }
 0x130   :  { %727 = vsyncmov [#allocation3 + $0x7] }
 0x133   :  { %s728_s4 = vpop.sfrf %727 }
 0x134   :  { %p890_p7 = scmp.ne.s32.totalorder %s728_s4, 0 }
 0x136   :  { %732 = shalt.err (%p890_p7)  }
 0x137   :  { %734 = vsyncmov [#allocation3 + $0x8] }
 0x13a   :  { %s735_s5 = vpop.sfrf %734 }
 0x13b   :  { %p891_p8 = scmp.ne.s32.totalorder %s735_s5, 0 }
 0x13d   :  { %739 = shalt.err (%p891_p8)  }
 0x13e   :  { %741 = vsyncmov [#allocation3 + $0x9] }
 0x141   :  { %s742_s6 = vpop.sfrf %741 }
 0x142   :  { %p892_p9 = scmp.ne.s32.totalorder %s742_s6, 0 }
 0x144   :  { %746 = shalt.err (%p892_p9)  }
 0x145   :  { %748 = vsyncmov [#allocation3 + $0xa] }
 0x148   :  { %s749_s7 = vpop.sfrf %748 }
 0x149   :  { %p893_p10 = scmp.ne.s32.totalorder %s749_s7, 0 }
 0x14b   :  { %753 = shalt.err (%p893_p10)  }
 0x14c   :  { %755 = vsyncmov [#allocation3 + $0xb] }
 0x14f   :  { %s756_s8 = vpop.sfrf %755 }
 0x150   :  { %p894_p11 = scmp.ne.s32.totalorder %s756_s8, 0 }
 0x152   :  { %760 = shalt.err (%p894_p11)  }
 0x153   :  { %762 = vsyncmov [#allocation3 + $0xc] }
 0x156   :  { %s763_s9 = vpop.sfrf %762 }
 0x157   :  { %p895_p12 = scmp.ne.s32.totalorder %s763_s9, 0 }
 0x159   :  { %767 = shalt.err (%p895_p12)  }
 0x15a   :  { %769 = vsyncmov [#allocation3 + $0xd] }
 0x15d   :  { %s770_s10 = vpop.sfrf %769 }
 0x15e   :  { %p896_p13 = scmp.ne.s32.totalorder %s770_s10, 0 }
 0x160   :  { %774 = shalt.err (%p896_p13)  }
 0x161   :  { %776 = vsyncmov [#allocation3 + $0xe] }
 0x164   :  { %s777_s11 = vpop.sfrf %776 }
 0x165   :  { %p897_p0 = scmp.ne.s32.totalorder %s777_s11, 0 }
 0x167   :  { %781 = shalt.err (%p897_p0)  }
 0x168   :  { %783 = vsyncmov [#allocation3 + $0xf] }
 0x16b   :  { %s784_s12 = vpop.sfrf %783 }
 0x16c   :  { %p898_p1 = scmp.ne.s32.totalorder %s784_s12, 0 }
 0x16e   :  { %788 = shalt.err (%p898_p1)  }

// kernel: dlightgcn_forward.6
= control target key start
LH: loop header
LB: loop body
LE: loop exit
PB: predicated region body
PF: predicated region fallthrough
CT: control target
= control target key end

     0   :  { %s2700_s0 = inlined_call_operand.vmem [shape: bf16[512,512], index: 0, kind: input, shape index: {}]   ;;  %s2701_s1 = inlined_call_operand.vmem [shape: bf16[512,128], index: 1, kind: input, shape index: {}]   ;;  %s2702_s2 = inlined_call_operand.vmem [shape: f32[512,128], index: 2, kind: input, shape index: {}, may-alias: {2,3}]   ;;  %s2703_s3 = inlined_call_operand.vmem [shape: f32[512,128], index: 3, kind: output, shape index: {0}, may-alias: {2,3}]   ;;  %s2704_s4 = inlined_call_operand.hbm [shape: bf16[512,128], index: 4, kind: output, shape index: {1}]  }
   0x1   :  { %2707 = sst [smem:[#allocation8_spill]] %s2700_s0 }
   0x2   :  { %10 = vsyncpa [#allocation4], 0 }
   0x3   :  { %12 = vsyncpa [#allocation4 + $0x1], 0  ;;  %s2029_s15 = smov 0   ;;  %s2031_s16 = smov 0  }
   0x4   :  { %s2033_s17 = smov 0   ;;  %s2035_s18 = smov 0  }
   0x5   :  { %s2037_s19 = smov 0   ;;  %s2039_s20 = smov 0  }
   0x6   :  { %s2041_s21 = smov 0   ;;  %s2043_s22 = smov 0  }
   0x7   :  { %s2045_s23 = smov 0   ;;  %s2047_s24 = smov 0  }
   0x8 LB: > { %s1421_s25 = sadd.s32 4294967295, %s1999_s24   ;;  %s1422_s26 = sadd.s32 4294967294, %s1999_s24   ;;  %s1999_s24 = sphi %s2047_s24, %s18_s24   ;;  %s1995_s23 = sphi %s2045_s23, %s2724_s23   ;;  %s1991_s22 = sphi %s2043_s22, %s2723_s22   ;;  %s1987_s21 = sphi %s2041_s21, %s2722_s21   ;;  %s1983_s20 = sphi %s2039_s20, %s2721_s20   ;;  %s1979_s19 = sphi %s2037_s19, %s2720_s19   ;;  %s1975_s18 = sphi %s2035_s18, %s2719_s18   ;;  %s1971_s17 = sphi %s2033_s17, %s2718_s17   ;;  %s1967_s16 = sphi %s2031_s16, %s2717_s16   ;;  %s1963_s15 = sphi %s2029_s15, %s2716_s15  }
   0x9   : > { %s27_s27 = sadd.s32 1, %s1991_s22  ;;  %s30_s28 = sadd.s32 1, %s1995_s23 }
   0xa   : > { %p28_p0 = scmp.ge.s32.totalorder %s27_s27, 2  ;;  %s39_s29 = sadd.s32 1, %s1979_s19 }
   0xb   : > { %p46_p1 = scmp.ne.s32.totalorder %s1979_s19, %s1975_s18  ;;  %p47_p2 = scmp.eq.s32.totalorder %s1999_s24, 0 }
   0xc   : > { %s2726_s27 = smov (%p28_p0, %s27_s27), 0  ;;  %s2728_s28 = smov (!%p28_p0, %s30_s28), %s1995_s23 }
   0xd   : > { %2708 = sst [smem:[#allocation6_spill]] %s2726_s27  ;;  %s35_s30 = ssub.s32 %s1991_s22, %s2726_s27 }
   0xe   : > { %p2092_p3 = por %p47_p2, %p46_p1  ;;  %p32_p4 = scmp.ge.s32.totalorder %s2728_s28, 2 }
   0xf   : > { %s138_s6 = sadd.s32 1, %s1971_s17  ;;  %p148_p5 = scmp.ne.s32.totalorder %s1971_s17, %s1967_s16 }
  0x10   : > { %p149_p6 = scmp.eq.s32.totalorder %s1421_s25, 3  ;;  %s2730_s28 = smov (%p32_p4, %s2728_s28), 0 }
  0x11   : > { %2710 = sst [smem:[#allocation7_spill]] %s2730_s28  ;;  %p154_p8 = scmp.ne.s32.totalorder %s1967_s16, %s1963_s15 }
  0x12   : > { %p2101_p7 = por %p149_p6, %p148_p5  ;;  %s34_s8 = ssub.s32 %s1995_s23, %s2730_s28 }
  0x13   : > { %p155_p9 = scmp.eq.s32.totalorder %s1422_s26, 3  ;;  %s36_s9 = sor.u32 %s35_s30, %s34_s8 }
  0x14   : > { %p136_p10 = scmp.eq.s32.totalorder %s34_s8, 0  ;;  %p37_p11 = scmp.eq.s32.totalorder %s36_s9, 0 }
  0x15   : > { %p2109_p12 = por %p155_p9, %p154_p8  ;;  %p1424_p13 = scmp.ge.s32.totalorder %s1999_s24, 4 }
  0x16   : > { %s2114_s11 = scalar_select %p136_p10, %s1971_s17, %s138_s6  }
  0x17   : > { %s2117_s12 = scalar_select %p37_p11, %s1979_s19, %s39_s29  }
  0x18   : > { %174 = sbr.rel (%p1424_p13) target bundleno = 71 (0x47), region = 20 }
  0x1d   : > { %177 = sbr.rel (!%p2092_p3) target bundleno = 71 (0x47), region = 24  ;;  %s179_s13 = sand.u32 (%p2092_p3), 1, %s1979_s19  }
  0x1e   : > { %s1427_s14 = sshll.u32 (%p2092_p3), %s1991_s22, 1  ;;  %s1425_s25 = sshll.u32 (%p2092_p3), %s179_s13, 8 }
  0x1f   : > { %s1638_s26 = sshll.u32 (%p2092_p3), %s1995_s23, 7  ;;  %s2713_s0 = sld [smem:[#allocation8_spill]] (%p2092_p3) }
  0x20   : > { %s185_s30 = sadd.s32 (%p2092_p3), %s1638_s26, %s1427_s14  ;;  %s2133_s5 = scalar_lea.vmem (%p2092_p3), [#allocation2], %s1425_s25 }
  0x21   : > { %s1429_s8 = sshll.u32 (%p2092_p3), %s185_s30, 2 }
  0x25   : > { %s2128_s29 = scalar_lea.vmem %s2713_s0, %s1429_s8 }
  0x26   : > { %v278_v0 = vld [vmem:[%s2128_s29] sm:$0xff]  ;;  %v280_v1 = vld [vmem:[%s2128_s29 + $0x10] sm:$0xff] }
  0x27   : > { %v282_v2 = vld [vmem:[%s2128_s29 + $0x20] sm:$0xff]  ;;  %279 = vst [vmem:[%s2133_s5] sm:$0xff] %v278_v0  ;;  %v284_v3 = vld [vmem:[%s2128_s29 + $0x30] sm:$0xff] }
  0x28   : > { %281 = vst [vmem:[%s2133_s5 + $0x8] sm:$0xff] %v280_v1  ;;  %v286_v4 = vld [vmem:[%s2128_s29 + $0x40] sm:$0xff]  ;;  %v288_v5 = vld [vmem:[%s2128_s29 + $0x50] sm:$0xff] }
  0x29   : > { %283 = vst [vmem:[%s2133_s5 + $0x10] sm:$0xff] %v282_v2  ;;  %v290_v6 = vld [vmem:[%s2128_s29 + $0x60] sm:$0xff]  ;;  %v292_v7 = vld [vmem:[%s2128_s29 + $0x70] sm:$0xff] }
  0x2a   : > { %285 = vst [vmem:[%s2133_s5 + $0x18] sm:$0xff] %v284_v3  ;;  %v294_v8 = vld [vmem:[%s2128_s29 + $0x80] sm:$0xff]  ;;  %v296_v9 = vld [vmem:[%s2128_s29 + $0x90] sm:$0xff] }
  0x2b   : > { %287 = vst [vmem:[%s2133_s5 + $0x20] sm:$0xff] %v286_v4  ;;  %v298_v10 = vld [vmem:[%s2128_s29 + $0xa0] sm:$0xff]  ;;  %v300_v11 = vld [vmem:[%s2128_s29 + $0xb0] sm:$0xff] }
  0x2c   : > { %289 = vst [vmem:[%s2133_s5 + $0x28] sm:$0xff] %v288_v5  ;;  %v302_v12 = vld [vmem:[%s2128_s29 + $0xc0] sm:$0xff]  ;;  %v304_v13 = vld [vmem:[%s2128_s29 + $0xd0] sm:$0xff] }
  0x2d   : > { %291 = vst [vmem:[%s2133_s5 + $0x30] sm:$0xff] %v290_v6  ;;  %v306_v14 = vld [vmem:[%s2128_s29 + $0xe0] sm:$0xff]  ;;  %v308_v15 = vld [vmem:[%s2128_s29 + $0xf0] sm:$0xff] }
  0x2e   : > { %293 = vst [vmem:[%s2133_s5 + $0x38] sm:$0xff] %v292_v7  ;;  %v310_v16 = vld [vmem:[%s2128_s29 + $0x100] sm:$0xff]  ;;  %v312_v17 = vld [vmem:[%s2128_s29 + $0x110] sm:$0xff] }
  0x2f   : > { %295 = vst [vmem:[%s2133_s5 + $0x40] sm:$0xff] %v294_v8  ;;  %v314_v18 = vld [vmem:[%s2128_s29 + $0x120] sm:$0xff]  ;;  %v316_v19 = vld [vmem:[%s2128_s29 + $0x130] sm:$0xff] }
  0x30   : > { %297 = vst [vmem:[%s2133_s5 + $0x48] sm:$0xff] %v296_v9  ;;  %v318_v20 = vld [vmem:[%s2128_s29 + $0x140] sm:$0xff]  ;;  %v320_v21 = vld [vmem:[%s2128_s29 + $0x150] sm:$0xff] }
  0x31   : > { %299 = vst [vmem:[%s2133_s5 + $0x50] sm:$0xff] %v298_v10  ;;  %v322_v22 = vld [vmem:[%s2128_s29 + $0x160] sm:$0xff]  ;;  %v324_v23 = vld [vmem:[%s2128_s29 + $0x170] sm:$0xff] }
  0x32   : > { %301 = vst [vmem:[%s2133_s5 + $0x58] sm:$0xff] %v300_v11  ;;  %v326_v24 = vld [vmem:[%s2128_s29 + $0x180] sm:$0xff]  ;;  %v328_v25 = vld [vmem:[%s2128_s29 + $0x190] sm:$0xff] }
  0x33   : > { %303 = vst [vmem:[%s2133_s5 + $0x60] sm:$0xff] %v302_v12  ;;  %v330_v26 = vld [vmem:[%s2128_s29 + $0x1a0] sm:$0xff]  ;;  %v332_v27 = vld [vmem:[%s2128_s29 + $0x1b0] sm:$0xff] }
  0x34   : > { %305 = vst [vmem:[%s2133_s5 + $0x68] sm:$0xff] %v304_v13  ;;  %v334_v28 = vld [vmem:[%s2128_s29 + $0x1c0] sm:$0xff]  ;;  %v336_v29 = vld [vmem:[%s2128_s29 + $0x1d0] sm:$0xff] }
  0x35   : > { %307 = vst [vmem:[%s2133_s5 + $0x70] sm:$0xff] %v306_v14  ;;  %v338_v30 = vld [vmem:[%s2128_s29 + $0x1e0] sm:$0xff]  ;;  %v340_v31 = vld [vmem:[%s2128_s29 + $0x1f0] sm:$0xff] }
  0x36   : > { %309 = vst [vmem:[%s2133_s5 + $0x78] sm:$0xff] %v308_v15 }
  0x37   : > { %311 = vst [vmem:[%s2133_s5 + $0x80] sm:$0xff] %v310_v16 }
  0x38   : > { %313 = vst [vmem:[%s2133_s5 + $0x88] sm:$0xff] %v312_v17 }
  0x39   : > { %315 = vst [vmem:[%s2133_s5 + $0x90] sm:$0xff] %v314_v18 }
  0x3a   : > { %317 = vst [vmem:[%s2133_s5 + $0x98] sm:$0xff] %v316_v19 }
  0x3b   : > { %319 = vst [vmem:[%s2133_s5 + $0xa0] sm:$0xff] %v318_v20 }
  0x3c   : > { %321 = vst [vmem:[%s2133_s5 + $0xa8] sm:$0xff] %v320_v21 }
  0x3d   : > { %323 = vst [vmem:[%s2133_s5 + $0xb0] sm:$0xff] %v322_v22 }
  0x3e   : > { %325 = vst [vmem:[%s2133_s5 + $0xb8] sm:$0xff] %v324_v23 }
  0x3f   : > { %327 = vst [vmem:[%s2133_s5 + $0xc0] sm:$0xff] %v326_v24 }
  0x40   : > { %329 = vst [vmem:[%s2133_s5 + $0xc8] sm:$0xff] %v328_v25 }
  0x41   : > { %331 = vst [vmem:[%s2133_s5 + $0xd0] sm:$0xff] %v330_v26 }
  0x42   : > { %333 = vst [vmem:[%s2133_s5 + $0xd8] sm:$0xff] %v332_v27 }
  0x43   : > { %335 = vst [vmem:[%s2133_s5 + $0xe0] sm:$0xff] %v334_v28 }
  0x44   : > { %337 = vst [vmem:[%s2133_s5 + $0xe8] sm:$0xff] %v336_v29 }
  0x45   : > { %339 = vst [vmem:[%s2133_s5 + $0xf0] sm:$0xff] %v338_v30 }
  0x46   : > { %341 = vst [vmem:[%s2133_s5 + $0xf8] sm:$0xff] %v340_v31 }
  0x47 PF: > { %p1430_p0 = scmp.ge.s32.totalorder %s1999_s24, 1  ;;  %p355_p1 = scmp.lt.s32.totalorder %s1999_s24, 5 }
  0x49   : > { %p356_p2 = pnand %p1430_p0, %p355_p1 }
  0x4a   : > { %s362_s13 = sand.u32 (!%p356_p2), 1, %s1975_s18   ;;  %s394_s14 = sand.u32 (!%p356_p2), 1, %s1967_s16  }
  0x4b   : > { %359 = sbr.rel (%p356_p2) target bundleno = 482 (0x1e2), region = 66  ;;  %s1431_s25 = sshll.u32 (!%p356_p2), %s362_s13, 8 }
  0x4c   : > { %s1432_s26 = sshll.u32 (!%p356_p2), %s394_s14, 7  ;;  %s1433_s30 = sshll.u32 (!%p356_p2), %s1987_s21, 5 }
  0x4d   : > { %p400_p3 = scmp.lt.s32.totalorder (!%p356_p2), %s1433_s30, 63  ;;  %s2213_s27 = scalar_lea.vmem (!%p356_p2), [#allocation2], %s1431_s25 }
  0x4e   : > { %s2215_s18 = scalar_lea.vmem (!%p356_p2), [#allocation3], %s1432_s26  ;;  %p1437_p4 = scmp.ne.s32.totalorder (!%p356_p2), %s1983_s20, 0 }
  0x50   : > { %s2732_s30 = smov (!%p400_p3, %s1433_s30), 63  ;;  %415 = sbr.rel (%p1437_p4) target bundleno = 118 (0x76), region = 74 }
  0x51   : > { %s1434_s8 = sshll.u32 %s2732_s30, 3 }
  0x52   : > { %s2206_s29 = scalar_lea.vmem %s2702_s2, %s1434_s8  ;;  %s2211_s28 = scalar_lea.vmem %s2703_s3, %s1434_s8 }
  0x55   : > { %v2001_v32 = vmov 0.0  }
  0x56   : > { %416 = vst [vmem:[%s2211_s28] sm:$0xff] %v2001_v32 }
  0x57   : > { %417 = vst [vmem:[%s2211_s28 + $0x8] sm:$0xff] %v2001_v32 }
  0x58   : > { %418 = vst [vmem:[%s2211_s28 + $0x10] sm:$0xff] %v2001_v32 }
  0x59   : > { %419 = vst [vmem:[%s2211_s28 + $0x18] sm:$0xff] %v2001_v32 }
  0x5a   : > { %420 = vst [vmem:[%s2211_s28 + $0x20] sm:$0xff] %v2001_v32 }
  0x5b   : > { %421 = vst [vmem:[%s2211_s28 + $0x28] sm:$0xff] %v2001_v32 }
  0x5c   : > { %422 = vst [vmem:[%s2211_s28 + $0x30] sm:$0xff] %v2001_v32 }
  0x5d   : > { %423 = vst [vmem:[%s2211_s28 + $0x38] sm:$0xff] %v2001_v32 }
  0x5e   : > { %424 = vst [vmem:[%s2211_s28 + $0x40] sm:$0xff] %v2001_v32 }
  0x5f   : > { %425 = vst [vmem:[%s2211_s28 + $0x48] sm:$0xff] %v2001_v32 }
  0x60   : > { %426 = vst [vmem:[%s2211_s28 + $0x50] sm:$0xff] %v2001_v32 }
  0x61   : > { %427 = vst [vmem:[%s2211_s28 + $0x58] sm:$0xff] %v2001_v32 }
  0x62   : > { %428 = vst [vmem:[%s2211_s28 + $0x60] sm:$0xff] %v2001_v32 }
  0x63   : > { %429 = vst [vmem:[%s2211_s28 + $0x68] sm:$0xff] %v2001_v32 }
  0x64   : > { %430 = vst [vmem:[%s2211_s28 + $0x70] sm:$0xff] %v2001_v32 }
  0x65   : > { %431 = vst [vmem:[%s2211_s28 + $0x78] sm:$0xff] %v2001_v32 }
  0x66   : > { %432 = vst [vmem:[%s2211_s28 + $0x80] sm:$0xff] %v2001_v32 }
  0x67   : > { %433 = vst [vmem:[%s2211_s28 + $0x88] sm:$0xff] %v2001_v32 }
  0x68   : > { %434 = vst [vmem:[%s2211_s28 + $0x90] sm:$0xff] %v2001_v32 }
  0x69   : > { %435 = vst [vmem:[%s2211_s28 + $0x98] sm:$0xff] %v2001_v32 }
  0x6a   : > { %436 = vst [vmem:[%s2211_s28 + $0xa0] sm:$0xff] %v2001_v32 }
  0x6b   : > { %437 = vst [vmem:[%s2211_s28 + $0xa8] sm:$0xff] %v2001_v32 }
  0x6c   : > { %438 = vst [vmem:[%s2211_s28 + $0xb0] sm:$0xff] %v2001_v32 }
  0x6d   : > { %439 = vst [vmem:[%s2211_s28 + $0xb8] sm:$0xff] %v2001_v32 }
  0x6e   : > { %440 = vst [vmem:[%s2211_s28 + $0xc0] sm:$0xff] %v2001_v32 }
  0x6f   : > { %441 = vst [vmem:[%s2211_s28 + $0xc8] sm:$0xff] %v2001_v32 }
  0x70   : > { %442 = vst [vmem:[%s2211_s28 + $0xd0] sm:$0xff] %v2001_v32 }
  0x71   : > { %443 = vst [vmem:[%s2211_s28 + $0xd8] sm:$0xff] %v2001_v32 }
  0x72   : > { %444 = vst [vmem:[%s2211_s28 + $0xe0] sm:$0xff] %v2001_v32 }
  0x73   : > { %445 = vst [vmem:[%s2211_s28 + $0xe8] sm:$0xff] %v2001_v32 }
  0x74   : > { %446 = vst [vmem:[%s2211_s28 + $0xf0] sm:$0xff] %v2001_v32 }
  0x75   : > { %447 = vst [vmem:[%s2211_s28 + $0xf8] sm:$0xff] %v2001_v32 }
  0x76 PF: > { %s1438_s0 = sshll.u32 %s1983_s20, 8  ;;  %v1442_v47 = vld [vmem:[%s2213_s27] sm:$0xf]  ;;  %v1656_v49 = vld [vmem:[%s2213_s27 + $0x4] sm:$0xf0]  ;;  %p1632_p5 = scmp.ne.s32.totalorder %s1983_s20, 1 }
  0x77   : > { %s449_s13 = sshra.s32 %s1438_s0, 3  ;;  %v1506_v50 = vld [vmem:[%s2213_s27 + $0x80] sm:$0xf]  ;;  %v1672_v52 = vld [vmem:[%s2213_s27 + $0x84] sm:$0xf0]  ;;  %v1443_v57 = vor.u32 %v1656_v49, %v1442_v47 }
  0x78   : > { %s1439_s25 = sshll.u32 %s449_s13, 2  ;;  %v1655_v53 = vld [vmem:[%s2213_s27 + $0x4] sm:$0xf]  ;;  %v1444_v54 = vld [vmem:[%s2213_s27 + $0x8] sm:$0xf0]  ;;  %v1507_v58 = vor.u32 %v1672_v52, %v1506_v50 }
  0x79   : > { %s2254_s8 = scalar_lea.vmem %s2701_s1, %s1439_s25  ;;  %v1671_v55 = vld [vmem:[%s2213_s27 + $0x84] sm:$0xf]  ;;  %v1508_v56 = vld [vmem:[%s2213_s27 + $0x88] sm:$0xf0]  ;;  %v1447_v59 = vor.u32 %v1655_v53, %v1444_v54  ;;  %v1450_v61 = vld [vmem:[%s2213_s27 + $0x10] sm:$0xf] }
  0x7a   : > { %v1646_v33 = vld [vmem:[%s2254_s8 + $0x38] sm:$0xff]  ;;  %v1645_v35 = vld [vmem:[%s2254_s8 + $0x30] sm:$0xff]  ;;  %v1644_v37 = vld [vmem:[%s2254_s8 + $0x28] sm:$0xff]  ;;  %v1511_v60 = vor.u32 %v1671_v55, %v1508_v56 }
  0x7b   : > { %v1654_v34 = vld [vmem:[%s2254_s8 + $0x78] sm:$0xff]  ;;  %805 = vmatpush.bf16.msra.mxu0 %v1646_v33  ;;  %1783 = vmatpush.bf16.msra.mxu2 %v1646_v33  ;;  %v1653_v36 = vld [vmem:[%s2254_s8 + $0x70] sm:$0xff]  ;;  %v1652_v38 = vld [vmem:[%s2254_s8 + $0x68] sm:$0xff] }
  0x7c   : > { %894 = vmatpush.bf16.msra.mxu1 %v1654_v34  ;;  %1791 = vmatpush.bf16.msra.mxu3 %v1654_v34  ;;  %v1643_v39 = vld [vmem:[%s2254_s8 + $0x20] sm:$0xff]  ;;  %v1642_v41 = vld [vmem:[%s2254_s8 + $0x18] sm:$0xff]  ;;  %v1641_v43 = vld [vmem:[%s2254_s8 + $0x10] sm:$0xff] }
  0x7d   : > { %v1651_v40 = vld [vmem:[%s2254_s8 + $0x60] sm:$0xff]  ;;  %v1650_v42 = vld [vmem:[%s2254_s8 + $0x58] sm:$0xff]  ;;  %v1649_v44 = vld [vmem:[%s2254_s8 + $0x50] sm:$0xff] }
  0x7e   : > { %v1640_v45 = vld [vmem:[%s2254_s8 + $0x8] sm:$0xff]  ;;  %v1639_v48 = vld [vmem:[%s2254_s8] sm:$0xff]  ;;  %v1658_v62 = vld [vmem:[%s2213_s27 + $0x14] sm:$0xf0] }
  0x7f   : > { %806 = vmatpush.bf16.msra.mxu0 %v1645_v35  ;;  %1784 = vmatpush.bf16.msra.mxu2 %v1645_v35  ;;  %v1648_v46 = vld [vmem:[%s2254_s8 + $0x48] sm:$0xff]  ;;  %v1647_v51 = vld [vmem:[%s2254_s8 + $0x40] sm:$0xff]  ;;  %v1514_v63 = vld [vmem:[%s2213_s27 + $0x90] sm:$0xf]  ;;  %v1451_v5 = vor.u32 %v1658_v62, %v1450_v61 }
  0x80   : > { %895 = vmatpush.bf16.msra.mxu1 %v1653_v36  ;;  %1792 = vmatpush.bf16.msra.mxu3 %v1653_v36  ;;  %v1674_v0 = vld [vmem:[%s2213_s27 + $0x94] sm:$0xf0]  ;;  %v1657_v1 = vld [vmem:[%s2213_s27 + $0x14] sm:$0xf]  ;;  %v1452_v2 = vld [vmem:[%s2213_s27 + $0x18] sm:$0xf0] }
  0x81   : > { %v1673_v3 = vld [vmem:[%s2213_s27 + $0x94] sm:$0xf]  ;;  %v1516_v4 = vld [vmem:[%s2213_s27 + $0x98] sm:$0xf0]  ;;  %v1515_v6 = vor.u32 %v1674_v0, %v1514_v63  ;;  %v1455_v7 = vor.u32 %v1657_v1, %v1452_v2  ;;  %v1458_v9 = vld [vmem:[%s2213_s27 + $0x20] sm:$0xf] }
  0x82   : > { %v1519_v8 = vor.u32 %v1673_v3, %v1516_v4  ;;  %v1660_v10 = vld [vmem:[%s2213_s27 + $0x24] sm:$0xf0]  ;;  %v1522_v11 = vld [vmem:[%s2213_s27 + $0xa0] sm:$0xf]  ;;  %v1659_v13 = vld [vmem:[%s2213_s27 + $0x24] sm:$0xf] }
  0x83   : > { %807 = vmatpush.bf16.msra.mxu0 %v1644_v37  ;;  %1785 = vmatpush.bf16.msra.mxu2 %v1644_v37  ;;  %v1676_v12 = vld [vmem:[%s2213_s27 + $0xa4] sm:$0xf0]  ;;  %v1460_v14 = vld [vmem:[%s2213_s27 + $0x28] sm:$0xf0]  ;;  %v1675_v15 = vld [vmem:[%s2213_s27 + $0xa4] sm:$0xf]  ;;  %v1459_v17 = vor.u32 %v1660_v10, %v1458_v9 }
  0x84   : > { %896 = vmatpush.bf16.msra.mxu1 %v1652_v38  ;;  %1793 = vmatpush.bf16.msra.mxu3 %v1652_v38  ;;  %v1524_v16 = vld [vmem:[%s2213_s27 + $0xa8] sm:$0xf0]  ;;  %v1523_v18 = vor.u32 %v1676_v12, %v1522_v11  ;;  %v1463_v19 = vor.u32 %v1659_v13, %v1460_v14  ;;  %v1466_v21 = vld [vmem:[%s2213_s27 + $0x30] sm:$0xf]  ;;  %v1662_v22 = vld [vmem:[%s2213_s27 + $0x34] sm:$0xf0] }
  0x85   : > { %v1527_v20 = vor.u32 %v1675_v15, %v1524_v16  ;;  %v1530_v23 = vld [vmem:[%s2213_s27 + $0xb0] sm:$0xf]  ;;  %v1678_v24 = vld [vmem:[%s2213_s27 + $0xb4] sm:$0xf0]  ;;  %v1661_v25 = vld [vmem:[%s2213_s27 + $0x34] sm:$0xf]  ;;  %v1467_v29 = vor.u32 %v1662_v22, %v1466_v21 }
  0x86   : > { %v1468_v26 = vld [vmem:[%s2213_s27 + $0x38] sm:$0xf0]  ;;  %v1677_v27 = vld [vmem:[%s2213_s27 + $0xb4] sm:$0xf]  ;;  %v1531_v30 = vor.u32 %v1678_v24, %v1530_v23  ;;  %v1474_v33 = vld [vmem:[%s2213_s27 + $0x40] sm:$0xf] }
  0x87   : > { %808 = vmatpush.bf16.msra.mxu0 %v1643_v39  ;;  %1786 = vmatpush.bf16.msra.mxu2 %v1643_v39  ;;  %v1532_v28 = vld [vmem:[%s2213_s27 + $0xb8] sm:$0xf0]  ;;  %v1471_v31 = vor.u32 %v1661_v25, %v1468_v26  ;;  %v1664_v34 = vld [vmem:[%s2213_s27 + $0x44] sm:$0xf0]  ;;  %v1538_v35 = vld [vmem:[%s2213_s27 + $0xc0] sm:$0xf] }
  0x88   : > { %897 = vmatpush.bf16.msra.mxu1 %v1651_v40  ;;  %1794 = vmatpush.bf16.msra.mxu3 %v1651_v40  ;;  %v1535_v32 = vor.u32 %v1677_v27, %v1532_v28  ;;  %v1680_v36 = vld [vmem:[%s2213_s27 + $0xc4] sm:$0xf0]  ;;  %v1663_v37 = vld [vmem:[%s2213_s27 + $0x44] sm:$0xf]  ;;  %v1476_v38 = vld [vmem:[%s2213_s27 + $0x48] sm:$0xf0] }
  0x89   : > { %v1679_v39 = vld [vmem:[%s2213_s27 + $0xc4] sm:$0xf]  ;;  %v1540_v40 = vld [vmem:[%s2213_s27 + $0xc8] sm:$0xf0]  ;;  %v1546_v47 = vld [vmem:[%s2213_s27 + $0xd0] sm:$0xf] }
  0x8a   : > { %v1665_v49 = vld [vmem:[%s2213_s27 + $0x54] sm:$0xf]  ;;  %v1484_v50 = vld [vmem:[%s2213_s27 + $0x58] sm:$0xf0]  ;;  %v1667_v61 = vld [vmem:[%s2213_s27 + $0x64] sm:$0xf] }
  0x8b   : > { %809 = vmatpush.bf16.msra.mxu0 %v1642_v41  ;;  %1787 = vmatpush.bf16.msra.mxu2 %v1642_v41  ;;  %v1475_v41 = vor.u32 %v1664_v34, %v1474_v33  ;;  %v1548_v52 = vld [vmem:[%s2213_s27 + $0xd8] sm:$0xf0]  ;;  %v1487_v55 = vor.u32 %v1665_v49, %v1484_v50  ;;  %v1492_v62 = vld [vmem:[%s2213_s27 + $0x68] sm:$0xf0]  ;;  %v1683_v63 = vld [vmem:[%s2213_s27 + $0xe4] sm:$0xf] }
  0x8c   : > { %898 = vmatpush.bf16.msra.mxu1 %v1650_v42  ;;  %1795 = vmatpush.bf16.msra.mxu3 %v1650_v42  ;;  %v1539_v42 = vor.u32 %v1680_v36, %v1538_v35  ;;  %v1556_v0 = vld [vmem:[%s2213_s27 + $0xe8] sm:$0xf0]  ;;  %v1495_v3 = vor.u32 %v1667_v61, %v1492_v62  ;;  %v1669_v9 = vld [vmem:[%s2213_s27 + $0x74] sm:$0xf]  ;;  %v1500_v10 = vld [vmem:[%s2213_s27 + $0x78] sm:$0xf0] }
  0x8d   : > { %v1559_v4 = vor.u32 %v1683_v63, %v1556_v0  ;;  %v1685_v11 = vld [vmem:[%s2213_s27 + $0xf4] sm:$0xf]  ;;  %v1564_v12 = vld [vmem:[%s2213_s27 + $0xf8] sm:$0xf0]  ;;  %v1503_v15 = vor.u32 %v1669_v9, %v1500_v10  ;;  %v501_v23 = vld [vmem:[%s2211_s28 + $0x80] sm:$0xff] }
  0x8e   : > { %v1567_v16 = vor.u32 %v1685_v11, %v1564_v12  ;;  %v486_v27 = vld [vmem:[%s2211_s28 + $0x8] sm:$0xff]  ;;  %v505_v63 = vld [vmem:[%s2211_s28 + $0xa0] sm:$0xff] }
  0x8f   : > { %810 = vmatpush.bf16.msra.mxu0 %v1641_v43  ;;  %1788 = vmatpush.bf16.msra.mxu2 %v1641_v43  ;;  %v1479_v43 = vor.u32 %v1663_v37, %v1476_v38  ;;  %v502_v33 = vld [vmem:[%s2211_s28 + $0x88] sm:$0xff]  ;;  %v487_v37 = vld [vmem:[%s2211_s28 + $0x10] sm:$0xff] }
  0x90   : > { %899 = vmatpush.bf16.msra.mxu1 %v1649_v44  ;;  %1796 = vmatpush.bf16.msra.mxu3 %v1649_v44  ;;  %v1543_v44 = vor.u32 %v1679_v39, %v1540_v40  ;;  %v506_v9 = vld [vmem:[%s2211_s28 + $0xa8] sm:$0xff] }
  0x93   : > { %811 = vmatpush.bf16.msra.mxu0 %v1640_v45  ;;  %1789 = vmatpush.bf16.msra.mxu2 %v1640_v45  ;;  %v1482_v45 = vld [vmem:[%s2213_s27 + $0x50] sm:$0xf] }
  0x94   : > { %900 = vmatpush.bf16.msra.mxu1 %v1648_v46  ;;  %1797 = vmatpush.bf16.msra.mxu3 %v1648_v46  ;;  %v1666_v46 = vld [vmem:[%s2213_s27 + $0x54] sm:$0xf0] }
  0x95   : > { %v1483_v53 = vor.u32 %v1666_v46, %v1482_v45 }
  0x97   : > { %812 = vmatpush.bf16.msra.mxu0 %v1639_v48  ;;  %1790 = vmatpush.bf16.msra.mxu2 %v1639_v48  ;;  %v1682_v48 = vld [vmem:[%s2213_s27 + $0xd4] sm:$0xf0] }
  0x98   : > { %901 = vmatpush.bf16.msra.mxu1 %v1647_v51  ;;  %1798 = vmatpush.bf16.msra.mxu3 %v1647_v51  ;;  %v1681_v51 = vld [vmem:[%s2213_s27 + $0xd4] sm:$0xf]  ;;  %v1547_v54 = vor.u32 %v1682_v48, %v1546_v47  ;;  %v488_v47 = vld [vmem:[%s2211_s28 + $0x18] sm:$0xff] }
  0x99   : > { %v1551_v56 = vor.u32 %v1681_v51, %v1548_v52 }
  0x9a   : > { %813 = vmatmul.bf16.vlgmr.msra.gmra.mxu0 %v1443_v57  ;;  %853 = vmatmul.bf16.vlgmr.msra.gmra.mxu2 %v1507_v58  ;;  %v1490_v57 = vld [vmem:[%s2213_s27 + $0x60] sm:$0xf]  ;;  %v1668_v58 = vld [vmem:[%s2213_s27 + $0x64] sm:$0xf0] }
  0x9b   : > { %902 = vmatmul.bf16.vlgmr.msra.gmra.mxu1 %v1447_v59  ;;  %942 = vmatmul.bf16.vlgmr.msra.gmra.mxu3 %v1511_v60  ;;  %v1554_v59 = vld [vmem:[%s2213_s27 + $0xe0] sm:$0xf]  ;;  %v1684_v60 = vld [vmem:[%s2213_s27 + $0xe4] sm:$0xf0]  ;;  %v1491_v1 = vor.u32 %v1668_v58, %v1490_v57 }
  0x9c   : > { %v1555_v2 = vor.u32 %v1684_v60, %v1554_v59  ;;  %v489_v57 = vld [vmem:[%s2211_s28 + $0x20] sm:$0xff] }
  0xaa   : > { %818 = vmatmul.bf16.gmra.mxu0 %v1451_v5  ;;  %858 = vmatmul.bf16.gmra.mxu2 %v1515_v6  ;;  %v1498_v5 = vld [vmem:[%s2213_s27 + $0x70] sm:$0xf]  ;;  %v1670_v6 = vld [vmem:[%s2213_s27 + $0x74] sm:$0xf0] }
  0xab   : > { %907 = vmatmul.bf16.gmra.mxu1 %v1455_v7  ;;  %947 = vmatmul.bf16.gmra.mxu3 %v1519_v8  ;;  %v1562_v7 = vld [vmem:[%s2213_s27 + $0xf0] sm:$0xf]  ;;  %v1686_v8 = vld [vmem:[%s2213_s27 + $0xf4] sm:$0xf0]  ;;  %v1499_v13 = vor.u32 %v1670_v6, %v1498_v5 }
  0xac   : > { %v1563_v14 = vor.u32 %v1686_v8, %v1562_v7 }
  0xba   : > { %823 = vmatmul.bf16.gmra.mxu0 %v1459_v17  ;;  %863 = vmatmul.bf16.gmra.mxu2 %v1523_v18  ;;  %v485_v18 = vld [vmem:[%s2211_s28] sm:$0xff] }
  0xbb   : > { %912 = vmatmul.bf16.gmra.mxu1 %v1463_v19  ;;  %952 = vmatmul.bf16.gmra.mxu3 %v1527_v20 }
  0xca   : > { %828 = vmatmul.bf16.gmra.mxu0 %v1467_v29  ;;  %868 = vmatmul.bf16.gmra.mxu2 %v1531_v30 }
  0xcb   : > { %917 = vmatmul.bf16.gmra.mxu1 %v1471_v31  ;;  %957 = vmatmul.bf16.gmra.mxu3 %v1535_v32 }
  0xda   : > { %833 = vmatmul.bf16.gmra.mxu0 %v1475_v41  ;;  %873 = vmatmul.bf16.gmra.mxu2 %v1539_v42 }
  0xdb   : > { %922 = vmatmul.bf16.gmra.mxu1 %v1479_v43  ;;  %962 = vmatmul.bf16.gmra.mxu3 %v1543_v44  ;;  %v503_v43 = vld [vmem:[%s2211_s28 + $0x90] sm:$0xff] }
  0xea   : > { %838 = vmatmul.bf16.gmra.mxu0 %v1483_v53  ;;  %878 = vmatmul.bf16.gmra.mxu2 %v1547_v54  ;;  %v504_v53 = vld [vmem:[%s2211_s28 + $0x98] sm:$0xff] }
  0xeb   : > { %927 = vmatmul.bf16.gmra.mxu1 %v1487_v55  ;;  %967 = vmatmul.bf16.gmra.mxu3 %v1551_v56 }
  0xfa   : > { %843 = vmatmul.bf16.gmra.mxu0 %v1491_v1  ;;  %883 = vmatmul.bf16.gmra.mxu2 %v1555_v2 }
  0xfb   : > { %932 = vmatmul.bf16.gmra.mxu1 %v1495_v3  ;;  %972 = vmatmul.bf16.gmra.mxu3 %v1559_v4  ;;  %v490_v3 = vld [vmem:[%s2211_s28 + $0x28] sm:$0xff] }
 0x10a   : > { %848 = vmatmul.bf16.gmra.mxu0 %v1499_v13  ;;  %888 = vmatmul.bf16.gmra.mxu2 %v1563_v14  ;;  %v491_v13 = vld [vmem:[%s2211_s28 + $0x30] sm:$0xff] }
 0x10b   : > { %937 = vmatmul.bf16.gmra.mxu1 %v1503_v15  ;;  %977 = vmatmul.bf16.gmra.mxu3 %v1567_v16 }
 0x117   : > { %v814_v17 = vpop.f32.mrf.mxu0 }
 0x118   : > { %v903_v19 = vpop.f32.mrf.mxu1 }
 0x119   : > { %v904_v20 = vadd.f32 %v903_v19, %v814_v17  ;;  %v507_v19 = vld [vmem:[%s2211_s28 + $0xb0] sm:$0xff] }
 0x11b   : > { %v983_v21 = vadd.f32 %v904_v20, %v485_v18 }
 0x11d   : > { %1015 = vst [vmem:[%s2211_s28] sm:$0xff] %v983_v21  ;;  %v854_v22 = vpop.f32.mrf.mxu2 }
 0x11e   : > { %v943_v24 = vpop.f32.mrf.mxu3 }
 0x11f   : > { %v944_v25 = vadd.f32 %v943_v24, %v854_v22  ;;  %v816_v26 = vpop.f32.mrf.mxu0 }
 0x120   : > { %v905_v28 = vpop.f32.mrf.mxu1 }
 0x121   : > { %v999_v29 = vadd.f32 %v944_v25, %v501_v23  ;;  %v906_v30 = vadd.f32 %v905_v28, %v816_v26  ;;  %v492_v23 = vld [vmem:[%s2211_s28 + $0x38] sm:$0xff] }
 0x123   : > { %1031 = vst [vmem:[%s2211_s28 + $0x80] sm:$0xff] %v999_v29  ;;  %v984_v31 = vadd.f32 %v906_v30, %v486_v27  ;;  %v508_v29 = vld [vmem:[%s2211_s28 + $0xb8] sm:$0xff] }
 0x125   : > { %1016 = vst [vmem:[%s2211_s28 + $0x8] sm:$0xff] %v984_v31  ;;  %v856_v32 = vpop.f32.mrf.mxu2 }
 0x126   : > { %v945_v34 = vpop.f32.mrf.mxu3 }
 0x127   : > { %v946_v35 = vadd.f32 %v945_v34, %v856_v32  ;;  %v819_v36 = vpop.f32.mrf.mxu0 }
 0x128   : > { %v908_v38 = vpop.f32.mrf.mxu1 }
 0x129   : > { %v1000_v39 = vadd.f32 %v946_v35, %v502_v33  ;;  %v909_v40 = vadd.f32 %v908_v38, %v819_v36  ;;  %v493_v33 = vld [vmem:[%s2211_s28 + $0x40] sm:$0xff] }
 0x12b   : > { %1032 = vst [vmem:[%s2211_s28 + $0x88] sm:$0xff] %v1000_v39  ;;  %v985_v41 = vadd.f32 %v909_v40, %v487_v37  ;;  %v509_v39 = vld [vmem:[%s2211_s28 + $0xc0] sm:$0xff] }
 0x12d   : > { %1017 = vst [vmem:[%s2211_s28 + $0x10] sm:$0xff] %v985_v41  ;;  %v859_v42 = vpop.f32.mrf.mxu2 }
 0x12e   : > { %v948_v44 = vpop.f32.mrf.mxu3 }
 0x12f   : > { %v949_v45 = vadd.f32 %v948_v44, %v859_v42  ;;  %v821_v46 = vpop.f32.mrf.mxu0 }
 0x130   : > { %v910_v48 = vpop.f32.mrf.mxu1 }
 0x131   : > { %v1001_v49 = vadd.f32 %v949_v45, %v503_v43  ;;  %v911_v50 = vadd.f32 %v910_v48, %v821_v46  ;;  %v494_v43 = vld [vmem:[%s2211_s28 + $0x48] sm:$0xff] }
 0x133   : > { %1033 = vst [vmem:[%s2211_s28 + $0x90] sm:$0xff] %v1001_v49  ;;  %v986_v51 = vadd.f32 %v911_v50, %v488_v47  ;;  %v510_v49 = vld [vmem:[%s2211_s28 + $0xc8] sm:$0xff] }
 0x135   : > { %1018 = vst [vmem:[%s2211_s28 + $0x18] sm:$0xff] %v986_v51  ;;  %v861_v52 = vpop.f32.mrf.mxu2 }
 0x136   : > { %v950_v54 = vpop.f32.mrf.mxu3 }
 0x137   : > { %v951_v55 = vadd.f32 %v950_v54, %v861_v52  ;;  %v824_v56 = vpop.f32.mrf.mxu0 }
 0x138   : > { %v913_v58 = vpop.f32.mrf.mxu1 }
 0x139   : > { %v1002_v59 = vadd.f32 %v951_v55, %v504_v53  ;;  %v914_v60 = vadd.f32 %v913_v58, %v824_v56  ;;  %v495_v53 = vld [vmem:[%s2211_s28 + $0x50] sm:$0xff] }
 0x13b   : > { %1034 = vst [vmem:[%s2211_s28 + $0x98] sm:$0xff] %v1002_v59  ;;  %v987_v61 = vadd.f32 %v914_v60, %v489_v57  ;;  %v511_v59 = vld [vmem:[%s2211_s28 + $0xd0] sm:$0xff] }
 0x13d   : > { %1019 = vst [vmem:[%s2211_s28 + $0x20] sm:$0xff] %v987_v61  ;;  %v864_v62 = vpop.f32.mrf.mxu2 }
 0x13e   : > { %v953_v0 = vpop.f32.mrf.mxu3 }
 0x13f   : > { %v954_v1 = vadd.f32 %v953_v0, %v864_v62  ;;  %v826_v2 = vpop.f32.mrf.mxu0 }
 0x140   : > { %v915_v4 = vpop.f32.mrf.mxu1 }
 0x141   : > { %v1003_v5 = vadd.f32 %v954_v1, %v505_v63  ;;  %v916_v6 = vadd.f32 %v915_v4, %v826_v2  ;;  %v496_v63 = vld [vmem:[%s2211_s28 + $0x58] sm:$0xff] }
 0x143   : > { %1035 = vst [vmem:[%s2211_s28 + $0xa0] sm:$0xff] %v1003_v5  ;;  %v988_v7 = vadd.f32 %v916_v6, %v490_v3  ;;  %v512_v5 = vld [vmem:[%s2211_s28 + $0xd8] sm:$0xff] }
 0x145   : > { %1020 = vst [vmem:[%s2211_s28 + $0x28] sm:$0xff] %v988_v7  ;;  %v866_v8 = vpop.f32.mrf.mxu2 }
 0x146   : > { %v955_v10 = vpop.f32.mrf.mxu3 }
 0x147   : > { %v956_v11 = vadd.f32 %v955_v10, %v866_v8  ;;  %v829_v12 = vpop.f32.mrf.mxu0 }
 0x148   : > { %v918_v14 = vpop.f32.mrf.mxu1 }
 0x149   : > { %v1004_v15 = vadd.f32 %v956_v11, %v506_v9  ;;  %v919_v16 = vadd.f32 %v918_v14, %v829_v12  ;;  %v497_v9 = vld [vmem:[%s2211_s28 + $0x60] sm:$0xff] }
 0x14b   : > { %1036 = vst [vmem:[%s2211_s28 + $0xa8] sm:$0xff] %v1004_v15  ;;  %v989_v17 = vadd.f32 %v919_v16, %v491_v13  ;;  %v513_v15 = vld [vmem:[%s2211_s28 + $0xe0] sm:$0xff] }
 0x14d   : > { %1021 = vst [vmem:[%s2211_s28 + $0x30] sm:$0xff] %v989_v17  ;;  %v869_v18 = vpop.f32.mrf.mxu2 }
 0x14e   : > { %v958_v20 = vpop.f32.mrf.mxu3 }
 0x14f   : > { %v959_v21 = vadd.f32 %v958_v20, %v869_v18  ;;  %v831_v22 = vpop.f32.mrf.mxu0 }
 0x150   : > { %v920_v24 = vpop.f32.mrf.mxu1 }
 0x151   : > { %v1005_v25 = vadd.f32 %v959_v21, %v507_v19  ;;  %v921_v26 = vadd.f32 %v920_v24, %v831_v22  ;;  %v498_v19 = vld [vmem:[%s2211_s28 + $0x68] sm:$0xff] }
 0x153   : > { %1037 = vst [vmem:[%s2211_s28 + $0xb0] sm:$0xff] %v1005_v25  ;;  %v990_v27 = vadd.f32 %v921_v26, %v492_v23  ;;  %v514_v25 = vld [vmem:[%s2211_s28 + $0xe8] sm:$0xff] }
 0x155   : > { %1022 = vst [vmem:[%s2211_s28 + $0x38] sm:$0xff] %v990_v27  ;;  %v871_v28 = vpop.f32.mrf.mxu2 }
 0x156   : > { %v960_v30 = vpop.f32.mrf.mxu3 }
 0x157   : > { %v961_v31 = vadd.f32 %v960_v30, %v871_v28  ;;  %v834_v32 = vpop.f32.mrf.mxu0 }
 0x158   : > { %v923_v34 = vpop.f32.mrf.mxu1 }
 0x159   : > { %v1006_v35 = vadd.f32 %v961_v31, %v508_v29  ;;  %v924_v36 = vadd.f32 %v923_v34, %v834_v32  ;;  %v499_v29 = vld [vmem:[%s2211_s28 + $0x70] sm:$0xff] }
 0x15b   : > { %1038 = vst [vmem:[%s2211_s28 + $0xb8] sm:$0xff] %v1006_v35  ;;  %v991_v37 = vadd.f32 %v924_v36, %v493_v33  ;;  %v515_v35 = vld [vmem:[%s2211_s28 + $0xf0] sm:$0xff] }
 0x15d   : > { %1023 = vst [vmem:[%s2211_s28 + $0x40] sm:$0xff] %v991_v37  ;;  %v874_v38 = vpop.f32.mrf.mxu2 }
 0x15e   : > { %v963_v40 = vpop.f32.mrf.mxu3 }
 0x15f   : > { %v964_v41 = vadd.f32 %v963_v40, %v874_v38  ;;  %v836_v42 = vpop.f32.mrf.mxu0 }
 0x160   : > { %v925_v44 = vpop.f32.mrf.mxu1 }
 0x161   : > { %v1007_v45 = vadd.f32 %v964_v41, %v509_v39  ;;  %v926_v46 = vadd.f32 %v925_v44, %v836_v42  ;;  %v500_v39 = vld [vmem:[%s2211_s28 + $0x78] sm:$0xff] }
 0x163   : > { %1039 = vst [vmem:[%s2211_s28 + $0xc0] sm:$0xff] %v1007_v45  ;;  %v992_v47 = vadd.f32 %v926_v46, %v494_v43  ;;  %v516_v45 = vld [vmem:[%s2211_s28 + $0xf8] sm:$0xff] }
 0x165   : > { %1024 = vst [vmem:[%s2211_s28 + $0x48] sm:$0xff] %v992_v47  ;;  %v876_v48 = vpop.f32.mrf.mxu2 }
 0x166   : > { %v965_v50 = vpop.f32.mrf.mxu3 }
 0x167   : > { %v966_v51 = vadd.f32 %v965_v50, %v876_v48  ;;  %v839_v52 = vpop.f32.mrf.mxu0 }
 0x168   : > { %v928_v54 = vpop.f32.mrf.mxu1 }
 0x169   : > { %v1008_v55 = vadd.f32 %v966_v51, %v510_v49  ;;  %v929_v56 = vadd.f32 %v928_v54, %v839_v52 }
 0x16b   : > { %1040 = vst [vmem:[%s2211_s28 + $0xc8] sm:$0xff] %v1008_v55  ;;  %v993_v57 = vadd.f32 %v929_v56, %v495_v53 }
 0x16d   : > { %1025 = vst [vmem:[%s2211_s28 + $0x50] sm:$0xff] %v993_v57  ;;  %v879_v58 = vpop.f32.mrf.mxu2 }
 0x16e   : > { %v968_v60 = vpop.f32.mrf.mxu3 }
 0x16f   : > { %v969_v61 = vadd.f32 %v968_v60, %v879_v58  ;;  %v841_v62 = vpop.f32.mrf.mxu0 }
 0x170   : > { %v930_v0 = vpop.f32.mrf.mxu1 }
 0x171   : > { %v1009_v1 = vadd.f32 %v969_v61, %v511_v59  ;;  %v931_v2 = vadd.f32 %v930_v0, %v841_v62 }
 0x173   : > { %1041 = vst [vmem:[%s2211_s28 + $0xd0] sm:$0xff] %v1009_v1  ;;  %v994_v3 = vadd.f32 %v931_v2, %v496_v63 }
 0x175   : > { %1026 = vst [vmem:[%s2211_s28 + $0x58] sm:$0xff] %v994_v3  ;;  %v881_v4 = vpop.f32.mrf.mxu2 }
 0x176   : > { %v970_v6 = vpop.f32.mrf.mxu3 }
 0x177   : > { %v971_v7 = vadd.f32 %v970_v6, %v881_v4  ;;  %v844_v8 = vpop.f32.mrf.mxu0 }
 0x178   : > { %v933_v10 = vpop.f32.mrf.mxu1 }
 0x179   : > { %v1010_v11 = vadd.f32 %v971_v7, %v512_v5  ;;  %v934_v12 = vadd.f32 %v933_v10, %v844_v8 }
 0x17b   : > { %1042 = vst [vmem:[%s2211_s28 + $0xd8] sm:$0xff] %v1010_v11  ;;  %v995_v13 = vadd.f32 %v934_v12, %v497_v9 }
 0x17d   : > { %1027 = vst [vmem:[%s2211_s28 + $0x60] sm:$0xff] %v995_v13  ;;  %v884_v14 = vpop.f32.mrf.mxu2 }
 0x17e   : > { %v973_v16 = vpop.f32.mrf.mxu3 }
 0x17f   : > { %v974_v17 = vadd.f32 %v973_v16, %v884_v14  ;;  %v846_v18 = vpop.f32.mrf.mxu0 }
 0x180   : > { %v935_v20 = vpop.f32.mrf.mxu1 }
 0x181   : > { %v1011_v21 = vadd.f32 %v974_v17, %v513_v15  ;;  %v936_v22 = vadd.f32 %v935_v20, %v846_v18 }
 0x183   : > { %1043 = vst [vmem:[%s2211_s28 + $0xe0] sm:$0xff] %v1011_v21  ;;  %v996_v23 = vadd.f32 %v936_v22, %v498_v19 }
 0x185   : > { %1028 = vst [vmem:[%s2211_s28 + $0x68] sm:$0xff] %v996_v23  ;;  %v886_v24 = vpop.f32.mrf.mxu2 }
 0x186   : > { %v975_v26 = vpop.f32.mrf.mxu3 }
 0x187   : > { %v976_v27 = vadd.f32 %v975_v26, %v886_v24  ;;  %v849_v28 = vpop.f32.mrf.mxu0 }
 0x188   : > { %v938_v30 = vpop.f32.mrf.mxu1 }
 0x189   : > { %v1012_v31 = vadd.f32 %v976_v27, %v514_v25  ;;  %v939_v32 = vadd.f32 %v938_v30, %v849_v28 }
 0x18b   : > { %1044 = vst [vmem:[%s2211_s28 + $0xe8] sm:$0xff] %v1012_v31  ;;  %v997_v33 = vadd.f32 %v939_v32, %v499_v29 }
 0x18d   : > { %1029 = vst [vmem:[%s2211_s28 + $0x70] sm:$0xff] %v997_v33  ;;  %v889_v34 = vpop.f32.mrf.mxu2 }
 0x18e   : > { %v978_v36 = vpop.f32.mrf.mxu3 }
 0x18f   : > { %v979_v37 = vadd.f32 %v978_v36, %v889_v34  ;;  %v851_v38 = vpop.f32.mrf.mxu0 }
 0x190   : > { %v940_v40 = vpop.f32.mrf.mxu1 }
 0x191   : > { %v1013_v41 = vadd.f32 %v979_v37, %v515_v35  ;;  %v941_v42 = vadd.f32 %v940_v40, %v851_v38 }
 0x193   : > { %1045 = vst [vmem:[%s2211_s28 + $0xf0] sm:$0xff] %v1013_v41  ;;  %v998_v43 = vadd.f32 %v941_v42, %v500_v39 }
 0x195   : > { %1030 = vst [vmem:[%s2211_s28 + $0x78] sm:$0xff] %v998_v43  ;;  %v891_v44 = vpop.f32.mrf.mxu2 }
 0x196   : > { %v980_v46 = vpop.f32.mrf.mxu3 }
 0x197   : > { %v981_v47 = vadd.f32 %v980_v46, %v891_v44  ;;  %1050 = sbr.rel (%p1632_p5) target bundleno = 466 (0x1d2), region = 78 }
 0x199   : > { %v1014_v48 = vadd.f32 %v981_v47, %v516_v45 }
 0x19b   : > { %1046 = vst [vmem:[%s2211_s28 + $0xf8] sm:$0xff] %v1014_v48 }
 0x19c   : > { %v1051_v49 = vld [vmem:[%s2211_s28] sm:$0xff]  ;;  %v1052_v50 = vld [vmem:[%s2211_s28 + $0x8] sm:$0xff]  ;;  %v1053_v52 = vld [vmem:[%s2211_s28 + $0x10] sm:$0xff] }
 0x19d   : > { %v1691_v51 = vpack.c.bf16 %v1052_v50, %v1051_v49  ;;  %v1054_v53 = vld [vmem:[%s2211_s28 + $0x18] sm:$0xff]  ;;  %v2407_v55 = vld [vmem:[%s2211_s28 + $0x20] sm:$0xff]  ;;  %v2410_v56 = vld [vmem:[%s2211_s28 + $0x28] sm:$0xff] }
 0x19e   : > { %v1696_v54 = vpack.c.bf16 %v1054_v53, %v1053_v52  ;;  %v1701_v57 = vpack.c.bf16 %v2410_v56, %v2407_v55  ;;  %v2416_v58 = vld [vmem:[%s2211_s28 + $0x30] sm:$0xff]  ;;  %v2419_v59 = vld [vmem:[%s2211_s28 + $0x38] sm:$0xff]  ;;  %v2424_v61 = vld [vmem:[%s2211_s28 + $0x40] sm:$0xff] }
 0x19f   : > { %1692 = vst [vmem:[%s2215_s18] sm:$0xff] %v1691_v51   ;;  %v1706_v60 = vpack.c.bf16 %v2419_v59, %v2416_v58  ;;  %v2427_v62 = vld [vmem:[%s2211_s28 + $0x48] sm:$0xff]  ;;  %v2434_v0 = vld [vmem:[%s2211_s28 + $0x50] sm:$0xff]  ;;  %v2437_v1 = vld [vmem:[%s2211_s28 + $0x58] sm:$0xff] }
 0x1a0   : > { %1768 = vst [vmem:[%s2215_s18 + $0x8] sm:$0xff] %v1696_v54   ;;  %v1711_v63 = vpack.c.bf16 %v2427_v62, %v2424_v61  ;;  %v1716_v2 = vpack.c.bf16 %v2437_v1, %v2434_v0  ;;  %v2443_v3 = vld [vmem:[%s2211_s28 + $0x60] sm:$0xff]  ;;  %v2446_v4 = vld [vmem:[%s2211_s28 + $0x68] sm:$0xff]  ;;  %v2451_v6 = vld [vmem:[%s2211_s28 + $0x70] sm:$0xff] }
 0x1a1   : > { %1769 = vst [vmem:[%s2215_s18 + $0x10] sm:$0xff] %v1701_v57   ;;  %v1721_v5 = vpack.c.bf16 %v2446_v4, %v2443_v3  ;;  %v2454_v7 = vld [vmem:[%s2211_s28 + $0x78] sm:$0xff]  ;;  %v2461_v9 = vld [vmem:[%s2211_s28 + $0x80] sm:$0xff]  ;;  %v2464_v10 = vld [vmem:[%s2211_s28 + $0x88] sm:$0xff] }
 0x1a2   : > { %1770 = vst [vmem:[%s2215_s18 + $0x18] sm:$0xff] %v1706_v60   ;;  %v1726_v8 = vpack.c.bf16 %v2454_v7, %v2451_v6  ;;  %v1731_v11 = vpack.c.bf16 %v2464_v10, %v2461_v9  ;;  %v2470_v12 = vld [vmem:[%s2211_s28 + $0x90] sm:$0xff]  ;;  %v2473_v13 = vld [vmem:[%s2211_s28 + $0x98] sm:$0xff]  ;;  %v1147_v14 = vld [vmem:[%s2206_s29] sm:$0xff] }
 0x1a3   : > { %1771 = vst [vmem:[%s2215_s18 + $0x20] sm:$0xff] %v1711_v63   ;;  %v1736_v15 = vpack.c.bf16 %v2473_v13, %v2470_v12  ;;  %v2479_v16 = vld [vmem:[%s2211_s28 + $0xa0] sm:$0xff]  ;;  %v2482_v17 = vld [vmem:[%s2211_s28 + $0xa8] sm:$0xff]  ;;  %v1149_v20 = vld [vmem:[%s2206_s29 + $0x10] sm:$0xff]  ;;  %v1179_v23 = vadd.f32 %v1147_v14, %v1051_v49 }
 0x1a4   : > { %1772 = vst [vmem:[%s2215_s18 + $0x28] sm:$0xff] %v1716_v2   ;;  %v1148_v18 = vld [vmem:[%s2206_s29 + $0x8] sm:$0xff]  ;;  %v1741_v19 = vpack.c.bf16 %v2482_v17, %v2479_v16  ;;  %v2491_v21 = vld [vmem:[%s2211_s28 + $0xb0] sm:$0xff]  ;;  %v2494_v22 = vld [vmem:[%s2211_s28 + $0xb8] sm:$0xff]  ;;  %v1181_v33 = vadd.f32 %v1149_v20, %v1053_v52 }
 0x1a5   : > { %1773 = vst [vmem:[%s2215_s18 + $0x30] sm:$0xff] %v1721_v5   ;;  %v1150_v24 = vld [vmem:[%s2206_s29 + $0x18] sm:$0xff]  ;;  %v1746_v25 = vpack.c.bf16 %v2494_v22, %v2491_v21  ;;  %v2501_v26 = vld [vmem:[%s2211_s28 + $0xc0] sm:$0xff]  ;;  %v2504_v27 = vld [vmem:[%s2211_s28 + $0xc8] sm:$0xff]  ;;  %v1180_v28 = vadd.f32 %v1148_v18, %v1052_v50  ;;  %v1211_v42 = vmul.f32 0.25, %v1179_v23 }
 0x1a6   : > { %1774 = vst [vmem:[%s2215_s18 + $0x38] sm:$0xff] %v1726_v8   ;;  %v1151_v29 = vld [vmem:[%s2206_s29 + $0x20] sm:$0xff]  ;;  %v1751_v30 = vpack.c.bf16 %v2504_v27, %v2501_v26  ;;  %v2510_v31 = vld [vmem:[%s2211_s28 + $0xd0] sm:$0xff]  ;;  %v2513_v32 = vld [vmem:[%s2211_s28 + $0xd8] sm:$0xff]  ;;  %v1182_v38 = vadd.f32 %v1150_v24, %v1054_v53 }
 0x1a7   : > { %1775 = vst [vmem:[%s2215_s18 + $0x40] sm:$0xff] %v1731_v11   ;;  %v1152_v34 = vld [vmem:[%s2206_s29 + $0x28] sm:$0xff]  ;;  %v1153_v35 = vld [vmem:[%s2206_s29 + $0x30] sm:$0xff]  ;;  %v1154_v36 = vld [vmem:[%s2206_s29 + $0x38] sm:$0xff]  ;;  %v1756_v37 = vpack.c.bf16 %v2513_v32, %v2510_v31  ;;  %v1183_v43 = vadd.f32 %v1151_v29, %v2407_v55  ;;  %v1212_v48 = vmul.f32 0.25, %v1180_v28 }
 0x1a8   : > { %1776 = vst [vmem:[%s2215_s18 + $0x48] sm:$0xff] %v1736_v15   ;;  %v1155_v39 = vld [vmem:[%s2206_s29 + $0x40] sm:$0xff]  ;;  %v2527_v41 = vld [vmem:[%s2211_s28 + $0xe8] sm:$0xff]  ;;  %v2535_v46 = vld [vmem:[%s2211_s28 + $0xf0] sm:$0xff]  ;;  %v1184_v49 = vadd.f32 %v1152_v34, %v2410_v56  ;;  %v1185_v20 = vadd.f32 %v1153_v35, %v2416_v58  ;;  %v1214_v28 = vmul.f32 0.25, %v1182_v38  ;;  %v1186_v29 = vadd.f32 %v1154_v36, %v2419_v59 }
 0x1a9   : > { %1777 = vst [vmem:[%s2215_s18 + $0x50] sm:$0xff] %v1741_v19   ;;  %v2524_v40 = vld [vmem:[%s2211_s28 + $0xe0] sm:$0xff]  ;;  %v1156_v44 = vld [vmem:[%s2206_s29 + $0x48] sm:$0xff]  ;;  %v2538_v47 = vld [vmem:[%s2211_s28 + $0xf8] sm:$0xff]  ;;  %v1213_v19 = vmul.f32 0.25, %v1181_v33  ;;  %v1215_v33 = vmul.f32 0.25, %v1183_v43  ;;  %v1187_v35 = vadd.f32 %v1155_v39, %v2424_v61 }
 0x1aa   : > { %1778 = vst [vmem:[%s2215_s18 + $0x58] sm:$0xff] %v1746_v25   ;;  %v1761_v45 = vpack.c.bf16 %v2527_v41, %v2524_v40  ;;  %v1157_v50 = vld [vmem:[%s2206_s29 + $0x50] sm:$0xff]  ;;  %v1158_v51 = vld [vmem:[%s2206_s29 + $0x58] sm:$0xff]  ;;  %v1159_v52 = vld [vmem:[%s2206_s29 + $0x60] sm:$0xff]  ;;  %v1766_v18 = vpack.c.bf16 %v2538_v47, %v2535_v46  ;;  %v1217_v59 = vmul.f32 0.25, %v1185_v20  ;;  %v1218_v38 = vmul.f32 0.25, %v1186_v29 }
 0x1ab   : > { %1779 = vst [vmem:[%s2215_s18 + $0x60] sm:$0xff] %v1751_v30   ;;  %v1160_v53 = vld [vmem:[%s2206_s29 + $0x68] sm:$0xff]  ;;  %v1161_v54 = vld [vmem:[%s2206_s29 + $0x70] sm:$0xff]  ;;  %v1162_v55 = vld [vmem:[%s2206_s29 + $0x78] sm:$0xff]  ;;  %v1189_v36 = vadd.f32 %v1157_v50, %v2434_v0  ;;  %v1219_v43 = vmul.f32 0.25, %v1187_v35  ;;  %v1191_v61 = vadd.f32 %v1159_v52, %v2443_v3 }
 0x1ac   : > { %1780 = vst [vmem:[%s2215_s18 + $0x68] sm:$0xff] %v1756_v37   ;;  %v1163_v57 = vld [vmem:[%s2206_s29 + $0x80] sm:$0xff]  ;;  %v1164_v60 = vld [vmem:[%s2206_s29 + $0x88] sm:$0xff]  ;;  %v1165_v63 = vld [vmem:[%s2206_s29 + $0x90] sm:$0xff]  ;;  %v1216_v37 = vmul.f32 0.25, %v1184_v49  ;;  %v1193_v0 = vadd.f32 %v1161_v54, %v2451_v6 }
 0x1ad   : > { %v1166_v2 = vld [vmem:[%s2206_s29 + $0x98] sm:$0xff]  ;;  %v1167_v5 = vld [vmem:[%s2206_s29 + $0xa0] sm:$0xff]  ;;  %v1168_v8 = vld [vmem:[%s2206_s29 + $0xa8] sm:$0xff]  ;;  %1781 = vst [vmem:[%s2215_s18 + $0x70] sm:$0xff] %v1761_v45   ;;  %v1188_v45 = vadd.f32 %v1156_v44, %v2427_v62  ;;  %v1192_v62 = vadd.f32 %v1160_v53, %v2446_v4  ;;  %v1195_v3 = vadd.f32 %v1163_v57, %v2461_v9  ;;  %v1196_v4 = vadd.f32 %v1164_v60, %v2464_v10 }
 0x1ae   : > { %v1169_v56 = vld [vmem:[%s2206_s29 + $0xb0] sm:$0xff]  ;;  %v1170_v11 = vld [vmem:[%s2206_s29 + $0xb8] sm:$0xff]  ;;  %v2556_v14 = vld [vmem:[%s2206_s29 + $0xc0] sm:$0xff]  ;;  %1782 = vst [vmem:[%s2215_s18 + $0x78] sm:$0xff] %v1766_v18   ;;  %v1190_v18 = vadd.f32 %v1158_v51, %v2437_v1  ;;  %v1194_v1 = vadd.f32 %v1162_v55, %v2454_v7  ;;  %v1225_v50 = vmul.f32 0.25, %v1193_v0  ;;  %v1197_v6 = vadd.f32 %v1165_v63, %v2470_v12 }
 0x1af   : > { %v2559_v15 = vld [vmem:[%s2206_s29 + $0xc8] sm:$0xff]  ;;  %v2565_v23 = vld [vmem:[%s2206_s29 + $0xd0] sm:$0xff]  ;;  %v2568_v24 = vld [vmem:[%s2206_s29 + $0xd8] sm:$0xff]  ;;  %v1220_v39 = vmul.f32 0.25, %v1188_v45  ;;  %v1224_v49 = vmul.f32 0.25, %v1192_v62  ;;  %v1198_v7 = vadd.f32 %v1166_v2, %v2473_v13  ;;  %v1227_v52 = vmul.f32 0.25, %v1195_v3 }
 0x1b0   : > { %v2572_v25 = vld [vmem:[%s2206_s29 + $0xe0] sm:$0xff]  ;;  %v2576_v30 = vld [vmem:[%s2206_s29 + $0xe8] sm:$0xff]  ;;  %v2580_v34 = vld [vmem:[%s2206_s29 + $0xf0] sm:$0xff]  ;;  %v1222_v44 = vmul.f32 0.25, %v1190_v18  ;;  %v1226_v51 = vmul.f32 0.25, %v1194_v1  ;;  %v1199_v9 = vadd.f32 %v1167_v5, %v2479_v16  ;;  %v1228_v53 = vmul.f32 0.25, %v1196_v4 }
 0x1b1   : > { %v2583_v58 = vld [vmem:[%s2206_s29 + $0xf8] sm:$0xff]  ;;  %v1200_v10 = vadd.f32 %v1168_v8, %v2482_v17  ;;  %v1229_v54 = vmul.f32 0.25, %v1197_v6  ;;  %v1201_v12 = vadd.f32 %v1169_v56, %v2491_v21  ;;  %v1230_v55 = vmul.f32 0.25, %v1198_v7 }
 0x1b2   : > { %1243 = vst [vmem:[%s2211_s28] sm:$0xff] %v1211_v42  ;;  %v1221_v42 = vmul.f32 0.25, %v1189_v36  ;;  %v1202_v13 = vadd.f32 %v1170_v11, %v2494_v22  ;;  %v1231_v57 = vmul.f32 0.25, %v1199_v9  ;;  %v1203_v16 = vadd.f32 %v2556_v14, %v2501_v26 }
 0x1b3   : > { %1244 = vst [vmem:[%s2211_s28 + $0x8] sm:$0xff] %v1212_v48  ;;  %v1223_v48 = vmul.f32 0.25, %v1191_v61  ;;  %v1232_v60 = vmul.f32 0.25, %v1200_v10  ;;  %v1204_v17 = vadd.f32 %v2559_v15, %v2504_v27  ;;  %v1233_v21 = vmul.f32 0.25, %v1201_v12 }
 0x1b4   : > { %1245 = vst [vmem:[%s2211_s28 + $0x10] sm:$0xff] %v1213_v19  ;;  %v1205_v63 = vadd.f32 %v2565_v23, %v2510_v31  ;;  %v1234_v22 = vmul.f32 0.25, %v1202_v13  ;;  %v1206_v2 = vadd.f32 %v2568_v24, %v2513_v32  ;;  %v1235_v26 = vmul.f32 0.25, %v1203_v16 }
 0x1b5   : > { %1246 = vst [vmem:[%s2211_s28 + $0x18] sm:$0xff] %v1214_v28  ;;  %v1207_v5 = vadd.f32 %v2572_v25, %v2524_v40  ;;  %v1236_v27 = vmul.f32 0.25, %v1204_v17  ;;  %v1208_v31 = vadd.f32 %v2576_v30, %v2527_v41  ;;  %v1209_v32 = vadd.f32 %v2580_v34, %v2535_v46 }
 0x1b6   : > { %1247 = vst [vmem:[%s2211_s28 + $0x20] sm:$0xff] %v1215_v33  ;;  %v1237_v8 = vmul.f32 0.25, %v1205_v63  ;;  %v1238_v56 = vmul.f32 0.25, %v1206_v2  ;;  %v1210_v40 = vadd.f32 %v2583_v58, %v2538_v47 }
 0x1b7   : > { %1248 = vst [vmem:[%s2211_s28 + $0x28] sm:$0xff] %v1216_v37  ;;  %v1239_v11 = vmul.f32 0.25, %v1207_v5  ;;  %v1240_v14 = vmul.f32 0.25, %v1208_v31  ;;  %v1241_v41 = vmul.f32 0.25, %v1209_v32 }
 0x1b8   : > { %1249 = vst [vmem:[%s2211_s28 + $0x30] sm:$0xff] %v1217_v59  ;;  %v1242_v15 = vmul.f32 0.25, %v1210_v40 }
 0x1b9   : > { %1250 = vst [vmem:[%s2211_s28 + $0x38] sm:$0xff] %v1218_v38 }
 0x1ba   : > { %1251 = vst [vmem:[%s2211_s28 + $0x40] sm:$0xff] %v1219_v43 }
 0x1bb   : > { %1252 = vst [vmem:[%s2211_s28 + $0x48] sm:$0xff] %v1220_v39 }
 0x1bc   : > { %1253 = vst [vmem:[%s2211_s28 + $0x50] sm:$0xff] %v1221_v42 }
 0x1bd   : > { %1254 = vst [vmem:[%s2211_s28 + $0x58] sm:$0xff] %v1222_v44 }
 0x1be   : > { %1255 = vst [vmem:[%s2211_s28 + $0x60] sm:$0xff] %v1223_v48 }
 0x1bf   : > { %1256 = vst [vmem:[%s2211_s28 + $0x68] sm:$0xff] %v1224_v49 }
 0x1c0   : > { %1257 = vst [vmem:[%s2211_s28 + $0x70] sm:$0xff] %v1225_v50 }
 0x1c1   : > { %1258 = vst [vmem:[%s2211_s28 + $0x78] sm:$0xff] %v1226_v51 }
 0x1c2   : > { %1259 = vst [vmem:[%s2211_s28 + $0x80] sm:$0xff] %v1227_v52 }
 0x1c3   : > { %1260 = vst [vmem:[%s2211_s28 + $0x88] sm:$0xff] %v1228_v53 }
 0x1c4   : > { %1261 = vst [vmem:[%s2211_s28 + $0x90] sm:$0xff] %v1229_v54 }
 0x1c5   : > { %1262 = vst [vmem:[%s2211_s28 + $0x98] sm:$0xff] %v1230_v55 }
 0x1c6   : > { %1263 = vst [vmem:[%s2211_s28 + $0xa0] sm:$0xff] %v1231_v57 }
 0x1c7   : > { %1264 = vst [vmem:[%s2211_s28 + $0xa8] sm:$0xff] %v1232_v60 }
 0x1c8   : > { %1265 = vst [vmem:[%s2211_s28 + $0xb0] sm:$0xff] %v1233_v21 }
 0x1c9   : > { %1266 = vst [vmem:[%s2211_s28 + $0xb8] sm:$0xff] %v1234_v22 }
 0x1ca   : > { %1267 = vst [vmem:[%s2211_s28 + $0xc0] sm:$0xff] %v1235_v26 }
 0x1cb   : > { %1268 = vst [vmem:[%s2211_s28 + $0xc8] sm:$0xff] %v1236_v27 }
 0x1cc   : > { %1269 = vst [vmem:[%s2211_s28 + $0xd0] sm:$0xff] %v1237_v8 }
 0x1cd   : > { %1270 = vst [vmem:[%s2211_s28 + $0xd8] sm:$0xff] %v1238_v56 }
 0x1ce   : > { %1271 = vst [vmem:[%s2211_s28 + $0xe0] sm:$0xff] %v1239_v11 }
 0x1cf   : > { %1272 = vst [vmem:[%s2211_s28 + $0xe8] sm:$0xff] %v1240_v14 }
 0x1d0   : > { %1273 = vst [vmem:[%s2211_s28 + $0xf0] sm:$0xff] %v1241_v41 }
 0x1d1   : > { %1274 = vst [vmem:[%s2211_s28 + $0xf8] sm:$0xff] %v1242_v15 }
 0x1d2 PF: > { %s1687_s20 = sshll.u32 %s1987_s21, 7  ;;  %s1297_s29 = sshll.u32 %s2215_s18, 4  ;;  %s1298_s29 = int_to_ptr.vmem [resolvable:$true] %s1297_s29 }
 0x1d3   : > { %s1296_s6 = scalar_lea.hbm %s2704_s4, %s1687_s20  ;;  %s1281_s0 = scalar_lea.sflag [#allocation4], %s394_s14 }
 0x1d4   : > { %s1299_s5 = sshll.u32 %s1296_s6, 4  ;;  %s1909_s21 = scalar_lea.hbm %s2704_s4, 256  ;;  %s1300_s5 = int_to_ptr.hbm [resolvable:$true] %s1299_s5 }
 0x1d5   : > { %s1903_s13 = sshra.s32 %s1300_s5, 4  ;;  %s1904_s13 = int_to_ptr.hbm [resolvable:$true] %s1903_s13 }
 0x1d6   : > { %s1905_s25 = scalar_lea.hbm %s1904_s13, 128  ;;  %p1910_p10 = scmp.lt.s32.totalorder %s1904_s13, %s2704_s4 }
 0x1d7   : > { %p1906_p6 = scmp.ne.s32.totalorder %s1904_s13, %s1905_s25  ;;  %p1911_p11 = scmp.lt.s32.totalorder %s1909_s21, %s1905_s25 }
 0x1d9   : > { %p1907_p8 = pnand %p1906_p6, %p2101_p7  ;;  %p1912_p13 = por %p1911_p11, %p1910_p10 }
 0x1db   : > { %p1908_p9 = pneg %p1907_p8 }
 0x1dd   : > { %p1913_p0 = pnand %p1912_p13, %p1908_p9 }
 0x1df   : > { %1916 = shalt.err (!%p1913_p0)
}
 0x1e0   : > { %s2002_s14 = smov 64   ;;  %s2003_s18 = smov 4  }
 0x1e1   : > { %1799 = dma.vmem_to_hbm [thread:$0]  (%p2101_p7), %s1298_s29, 2048, %s1300_s5, %s1281_s0, %s2002_s14, %s2002_s14, %s2003_s18  }
 0x1e2 PF: > { %p1805_p1 = scmp.ge.s32.totalorder %s1999_s24, 2  ;;  %s1322_s20 = sand.u32 1, %s1963_s15  }
 0x1e3   : > { %s1323_s27 = scalar_lea.sflag [#allocation4], %s1322_s20 }
 0x1e4   : > { %p1802_p2 = pnand %p1805_p1, %p2109_p12 }
 0x1e6   : > { %p1803_p3 = pneg %p1802_p2 }
 0x1e8   : > { %1958 = dma.done.wait (%p1803_p3), %s1323_s27, 2048  }
 0x1e9   : > { %1960 = vsyncadd (%p1803_p3), %s1323_s27, 4294965248  ;;  %s18_s24 = sadd.s32 1, %s1999_s24   ;;  %s2714_s7 = sld [smem:[#allocation6_spill]] }
 0x1ea   : > { %p15_p4 = scmp.ge.s32.totalorder %s18_s24, 6   ;;  %s2715_s9 = sld [smem:[#allocation7_spill]] }
 0x1eb   : > { %s2716_s15 = smov %s1967_s16  ;;  %s2717_s16 = smov %s1971_s17 }
 0x1ec   : > { %s2718_s17 = smov %s2114_s11  ;;  %s2719_s18 = smov %s1979_s19 }
 0x1ed   : > { %s2720_s19 = smov %s2117_s12  ;;  %s2721_s20 = smov %s1991_s22 }
 0x1ee   : > { %s2722_s21 = smov %s1995_s23  ;;  %17 = sbr.rel (!%p15_p4) target bundleno = 8 (0x8), region = 134 }
 0x1ef   : > { %s2723_s22 = smov %s2714_s7 }
 0x1f0   : > { %s2724_s23 = smov %s2715_s9 }
 0x1f3   :  { %1329 = vsyncpa [#allocation4], 1 }
 0x1f4   :  { %1331 = vsyncpa [#allocation4 + $0x1], 1 }

// kernel: dlightgcn_forward.4
= control target key start
LH: loop header
LB: loop body
LE: loop exit
PB: predicated region body
PF: predicated region fallthrough
CT: control target
= control target key end

     0   :  { %s1884_s15 = smov 0   ;;  %s1886_s16 = smov 0   ;;  %s2474_s0 = inlined_call_operand.vmem [shape: bf16[512,512], index: 0, kind: input, shape index: {}]   ;;  %s2475_s1 = inlined_call_operand.vmem [shape: bf16[512,128], index: 1, kind: input, shape index: {}]   ;;  %s2476_s2 = inlined_call_operand.vmem [shape: f32[512,128], index: 2, kind: input, shape index: {}, may-alias: {2,3}]   ;;  %s2477_s3 = inlined_call_operand.vmem [shape: f32[512,128], index: 3, kind: output, shape index: {0}, may-alias: {2,3}]   ;;  %s2478_s4 = inlined_call_operand.vmem [shape: bf16[512,128], index: 4, kind: output, shape index: {1}]  }
   0x1   :  { %s1888_s17 = smov 0   ;;  %s1890_s18 = smov 0  }
   0x2   :  { %s1892_s19 = smov 0   ;;  %s1894_s20 = smov 0  }
   0x3   :  { %s1896_s21 = smov 0  }
   0x4 LB: > { %s24_s22 = sadd.s32 1, %s1848_s19  ;;  %s27_s23 = sadd.s32 1, %s1852_s20  ;;  %s1856_s21 = sphi %s1896_s21, %s15_s21   ;;  %s1852_s20 = sphi %s1894_s20, %s2493_s20   ;;  %s1848_s19 = sphi %s1892_s19, %s2492_s19   ;;  %s1844_s18 = sphi %s1890_s18, %s2491_s18   ;;  %s1840_s17 = sphi %s1888_s17, %s2490_s17   ;;  %s1836_s16 = sphi %s1886_s16, %s2489_s16   ;;  %s1832_s15 = sphi %s1884_s15, %s2488_s15  }
   0x5   : > { %p25_p0 = scmp.ge.s32.totalorder %s24_s22, 2  ;;  %p43_p1 = scmp.ne.s32.totalorder %s1836_s16, %s1832_s15 }
   0x6   : > { %p44_p2 = scmp.eq.s32.totalorder %s1856_s21, 0  ;;  %s36_s27 = sadd.s32 1, %s1836_s16 }
   0x7   : > { %s2495_s22 = smov (%p25_p0, %s24_s22), 0  ;;  %s2497_s23 = smov (!%p25_p0, %s27_s23), %s1852_s20 }
   0x8   : > { %p45_p3 = por %p44_p2, %p43_p1  ;;  %p29_p4 = scmp.ge.s32.totalorder %s2497_s23, 2 }
   0x9   : > { %s32_s24 = ssub.s32 %s1848_s19, %s2495_s22  ;;  %p1373_p6 = scmp.ge.s32.totalorder %s1856_s21, 4 }
   0xa   : > { %s2499_s23 = smov (%p29_p4, %s2497_s23), 0 }
   0xb   : > { %s31_s25 = ssub.s32 %s1852_s20, %s2499_s23  ;;  %171 = sbr.rel (%p1373_p6) target bundleno = 55 (0x37), region = 20 }
   0xc   : > { %s33_s26 = sor.u32 %s32_s24, %s31_s25 }
   0xd   : > { %p34_p5 = scmp.eq.s32.totalorder %s33_s26, 0 }
   0xf   : > { %s1935_s28 = scalar_select %p34_p5, %s1836_s16, %s36_s27  }
  0x10   : > { %174 = sbr.rel (!%p45_p3) target bundleno = 55 (0x37), region = 24  ;;  %s176_s29 = sand.u32 (%p45_p3), 1, %s1836_s16  }
  0x11   : > { %s1376_s30 = sshll.u32 (%p45_p3), %s1848_s19, 1  ;;  %s1374_s5 = sshll.u32 (%p45_p3), %s176_s29, 8 }
  0x12   : > { %s1585_s6 = sshll.u32 (%p45_p3), %s1852_s20, 7  ;;  %s1949_s12 = scalar_lea.vmem (%p45_p3), [#allocation2], %s1374_s5 }
  0x13   : > { %s182_s7 = sadd.s32 (%p45_p3), %s1585_s6, %s1376_s30 }
  0x14   : > { %s1378_s8 = sshll.u32 (%p45_p3), %s182_s7, 2 }
  0x15   : > { %s1944_s11 = scalar_lea.vmem %s2474_s0, %s1378_s8 }
  0x16   : > { %v275_v0 = vld [vmem:[%s1944_s11] sm:$0xff]  ;;  %v277_v1 = vld [vmem:[%s1944_s11 + $0x10] sm:$0xff] }
  0x17   : > { %v279_v2 = vld [vmem:[%s1944_s11 + $0x20] sm:$0xff]  ;;  %276 = vst [vmem:[%s1949_s12] sm:$0xff] %v275_v0  ;;  %v281_v3 = vld [vmem:[%s1944_s11 + $0x30] sm:$0xff] }
  0x18   : > { %278 = vst [vmem:[%s1949_s12 + $0x8] sm:$0xff] %v277_v1  ;;  %v283_v4 = vld [vmem:[%s1944_s11 + $0x40] sm:$0xff]  ;;  %v285_v5 = vld [vmem:[%s1944_s11 + $0x50] sm:$0xff] }
  0x19   : > { %280 = vst [vmem:[%s1949_s12 + $0x10] sm:$0xff] %v279_v2  ;;  %v287_v6 = vld [vmem:[%s1944_s11 + $0x60] sm:$0xff]  ;;  %v289_v7 = vld [vmem:[%s1944_s11 + $0x70] sm:$0xff] }
  0x1a   : > { %282 = vst [vmem:[%s1949_s12 + $0x18] sm:$0xff] %v281_v3  ;;  %v291_v8 = vld [vmem:[%s1944_s11 + $0x80] sm:$0xff]  ;;  %v293_v9 = vld [vmem:[%s1944_s11 + $0x90] sm:$0xff] }
  0x1b   : > { %284 = vst [vmem:[%s1949_s12 + $0x20] sm:$0xff] %v283_v4  ;;  %v295_v10 = vld [vmem:[%s1944_s11 + $0xa0] sm:$0xff]  ;;  %v297_v11 = vld [vmem:[%s1944_s11 + $0xb0] sm:$0xff] }
  0x1c   : > { %286 = vst [vmem:[%s1949_s12 + $0x28] sm:$0xff] %v285_v5  ;;  %v299_v12 = vld [vmem:[%s1944_s11 + $0xc0] sm:$0xff]  ;;  %v301_v13 = vld [vmem:[%s1944_s11 + $0xd0] sm:$0xff] }
  0x1d   : > { %288 = vst [vmem:[%s1949_s12 + $0x30] sm:$0xff] %v287_v6  ;;  %v303_v14 = vld [vmem:[%s1944_s11 + $0xe0] sm:$0xff]  ;;  %v305_v15 = vld [vmem:[%s1944_s11 + $0xf0] sm:$0xff] }
  0x1e   : > { %290 = vst [vmem:[%s1949_s12 + $0x38] sm:$0xff] %v289_v7  ;;  %v307_v16 = vld [vmem:[%s1944_s11 + $0x100] sm:$0xff]  ;;  %v309_v17 = vld [vmem:[%s1944_s11 + $0x110] sm:$0xff] }
  0x1f   : > { %292 = vst [vmem:[%s1949_s12 + $0x40] sm:$0xff] %v291_v8  ;;  %v311_v18 = vld [vmem:[%s1944_s11 + $0x120] sm:$0xff]  ;;  %v313_v19 = vld [vmem:[%s1944_s11 + $0x130] sm:$0xff] }
  0x20   : > { %294 = vst [vmem:[%s1949_s12 + $0x48] sm:$0xff] %v293_v9  ;;  %v315_v20 = vld [vmem:[%s1944_s11 + $0x140] sm:$0xff]  ;;  %v317_v21 = vld [vmem:[%s1944_s11 + $0x150] sm:$0xff] }
  0x21   : > { %296 = vst [vmem:[%s1949_s12 + $0x50] sm:$0xff] %v295_v10  ;;  %v319_v22 = vld [vmem:[%s1944_s11 + $0x160] sm:$0xff]  ;;  %v321_v23 = vld [vmem:[%s1944_s11 + $0x170] sm:$0xff] }
  0x22   : > { %298 = vst [vmem:[%s1949_s12 + $0x58] sm:$0xff] %v297_v11  ;;  %v323_v24 = vld [vmem:[%s1944_s11 + $0x180] sm:$0xff]  ;;  %v325_v25 = vld [vmem:[%s1944_s11 + $0x190] sm:$0xff] }
  0x23   : > { %300 = vst [vmem:[%s1949_s12 + $0x60] sm:$0xff] %v299_v12  ;;  %v327_v26 = vld [vmem:[%s1944_s11 + $0x1a0] sm:$0xff]  ;;  %v329_v27 = vld [vmem:[%s1944_s11 + $0x1b0] sm:$0xff] }
  0x24   : > { %302 = vst [vmem:[%s1949_s12 + $0x68] sm:$0xff] %v301_v13  ;;  %v331_v28 = vld [vmem:[%s1944_s11 + $0x1c0] sm:$0xff]  ;;  %v333_v29 = vld [vmem:[%s1944_s11 + $0x1d0] sm:$0xff] }
  0x25   : > { %304 = vst [vmem:[%s1949_s12 + $0x70] sm:$0xff] %v303_v14  ;;  %v335_v30 = vld [vmem:[%s1944_s11 + $0x1e0] sm:$0xff]  ;;  %v337_v31 = vld [vmem:[%s1944_s11 + $0x1f0] sm:$0xff] }
  0x26   : > { %306 = vst [vmem:[%s1949_s12 + $0x78] sm:$0xff] %v305_v15 }
  0x27   : > { %308 = vst [vmem:[%s1949_s12 + $0x80] sm:$0xff] %v307_v16 }
  0x28   : > { %310 = vst [vmem:[%s1949_s12 + $0x88] sm:$0xff] %v309_v17 }
  0x29   : > { %312 = vst [vmem:[%s1949_s12 + $0x90] sm:$0xff] %v311_v18 }
  0x2a   : > { %314 = vst [vmem:[%s1949_s12 + $0x98] sm:$0xff] %v313_v19 }
  0x2b   : > { %316 = vst [vmem:[%s1949_s12 + $0xa0] sm:$0xff] %v315_v20 }
  0x2c   : > { %318 = vst [vmem:[%s1949_s12 + $0xa8] sm:$0xff] %v317_v21 }
  0x2d   : > { %320 = vst [vmem:[%s1949_s12 + $0xb0] sm:$0xff] %v319_v22 }
  0x2e   : > { %322 = vst [vmem:[%s1949_s12 + $0xb8] sm:$0xff] %v321_v23 }
  0x2f   : > { %324 = vst [vmem:[%s1949_s12 + $0xc0] sm:$0xff] %v323_v24 }
  0x30   : > { %326 = vst [vmem:[%s1949_s12 + $0xc8] sm:$0xff] %v325_v25 }
  0x31   : > { %328 = vst [vmem:[%s1949_s12 + $0xd0] sm:$0xff] %v327_v26 }
  0x32   : > { %330 = vst [vmem:[%s1949_s12 + $0xd8] sm:$0xff] %v329_v27 }
  0x33   : > { %332 = vst [vmem:[%s1949_s12 + $0xe0] sm:$0xff] %v331_v28 }
  0x34   : > { %334 = vst [vmem:[%s1949_s12 + $0xe8] sm:$0xff] %v333_v29 }
  0x35   : > { %336 = vst [vmem:[%s1949_s12 + $0xf0] sm:$0xff] %v335_v30 }
  0x36   : > { %338 = vst [vmem:[%s1949_s12 + $0xf8] sm:$0xff] %v337_v31 }
  0x37 PF: > { %p1379_p7 = scmp.ge.s32.totalorder %s1856_s21, 1  ;;  %p352_p8 = scmp.lt.s32.totalorder %s1856_s21, 5 }
  0x39   : > { %p353_p9 = pnand %p1379_p7, %p352_p8 }
  0x3a   : > { %s359_s13 = sand.u32 (!%p353_p9), 1, %s1832_s15   ;;  %s1381_s14 = sshll.u32 (!%p353_p9), %s1844_s18, 5 }
  0x3b   : > { %356 = sbr.rel (%p353_p9) target bundleno = 450 (0x1c2), region = 66  ;;  %s1380_s24 = sshll.u32 (!%p353_p9), %s359_s13, 8 }
  0x3c   : > { %p397_p10 = scmp.lt.s32.totalorder (!%p353_p9), %s1381_s14, 63  ;;  %s2031_s18 = scalar_lea.vmem (!%p353_p9), [#allocation2], %s1380_s24 }
  0x3d   : > { %p1387_p11 = scmp.ne.s32.totalorder (!%p353_p9), %s1840_s17, 0 }
  0x40   : > { %s2501_s14 = smov (!%p397_p10, %s1381_s14), 63  ;;  %417 = sbr.rel (%p1387_p11) target bundleno = 102 (0x66), region = 74 }
  0x41   : > { %s1382_s25 = sshll.u32 %s2501_s14, 3  ;;  %s1386_s26 = sshll.u32 %s2501_s14, 2 }
  0x42   : > { %s2019_s30 = scalar_lea.vmem %s2476_s2, %s1382_s25  ;;  %s2024_s7 = scalar_lea.vmem %s2477_s3, %s1382_s25 }
  0x43   : > { %s2029_s15 = scalar_lea.vmem %s2478_s4, %s1386_s26 }
  0x45   : > { %v1858_v32 = vmov 0.0  }
  0x46   : > { %418 = vst [vmem:[%s2024_s7] sm:$0xff] %v1858_v32 }
  0x47   : > { %419 = vst [vmem:[%s2024_s7 + $0x8] sm:$0xff] %v1858_v32 }
  0x48   : > { %420 = vst [vmem:[%s2024_s7 + $0x10] sm:$0xff] %v1858_v32 }
  0x49   : > { %421 = vst [vmem:[%s2024_s7 + $0x18] sm:$0xff] %v1858_v32 }
  0x4a   : > { %422 = vst [vmem:[%s2024_s7 + $0x20] sm:$0xff] %v1858_v32 }
  0x4b   : > { %423 = vst [vmem:[%s2024_s7 + $0x28] sm:$0xff] %v1858_v32 }
  0x4c   : > { %424 = vst [vmem:[%s2024_s7 + $0x30] sm:$0xff] %v1858_v32 }
  0x4d   : > { %425 = vst [vmem:[%s2024_s7 + $0x38] sm:$0xff] %v1858_v32 }
  0x4e   : > { %426 = vst [vmem:[%s2024_s7 + $0x40] sm:$0xff] %v1858_v32 }
  0x4f   : > { %427 = vst [vmem:[%s2024_s7 + $0x48] sm:$0xff] %v1858_v32 }
  0x50   : > { %428 = vst [vmem:[%s2024_s7 + $0x50] sm:$0xff] %v1858_v32 }
  0x51   : > { %429 = vst [vmem:[%s2024_s7 + $0x58] sm:$0xff] %v1858_v32 }
  0x52   : > { %430 = vst [vmem:[%s2024_s7 + $0x60] sm:$0xff] %v1858_v32 }
  0x53   : > { %431 = vst [vmem:[%s2024_s7 + $0x68] sm:$0xff] %v1858_v32 }
  0x54   : > { %432 = vst [vmem:[%s2024_s7 + $0x70] sm:$0xff] %v1858_v32 }
  0x55   : > { %433 = vst [vmem:[%s2024_s7 + $0x78] sm:$0xff] %v1858_v32 }
  0x56   : > { %434 = vst [vmem:[%s2024_s7 + $0x80] sm:$0xff] %v1858_v32 }
  0x57   : > { %435 = vst [vmem:[%s2024_s7 + $0x88] sm:$0xff] %v1858_v32 }
  0x58   : > { %436 = vst [vmem:[%s2024_s7 + $0x90] sm:$0xff] %v1858_v32 }
  0x59   : > { %437 = vst [vmem:[%s2024_s7 + $0x98] sm:$0xff] %v1858_v32 }
  0x5a   : > { %438 = vst [vmem:[%s2024_s7 + $0xa0] sm:$0xff] %v1858_v32 }
  0x5b   : > { %439 = vst [vmem:[%s2024_s7 + $0xa8] sm:$0xff] %v1858_v32 }
  0x5c   : > { %440 = vst [vmem:[%s2024_s7 + $0xb0] sm:$0xff] %v1858_v32 }
  0x5d   : > { %441 = vst [vmem:[%s2024_s7 + $0xb8] sm:$0xff] %v1858_v32 }
  0x5e   : > { %442 = vst [vmem:[%s2024_s7 + $0xc0] sm:$0xff] %v1858_v32 }
  0x5f   : > { %443 = vst [vmem:[%s2024_s7 + $0xc8] sm:$0xff] %v1858_v32 }
  0x60   : > { %444 = vst [vmem:[%s2024_s7 + $0xd0] sm:$0xff] %v1858_v32 }
  0x61   : > { %445 = vst [vmem:[%s2024_s7 + $0xd8] sm:$0xff] %v1858_v32 }
  0x62   : > { %446 = vst [vmem:[%s2024_s7 + $0xe0] sm:$0xff] %v1858_v32 }
  0x63   : > { %447 = vst [vmem:[%s2024_s7 + $0xe8] sm:$0xff] %v1858_v32 }
  0x64   : > { %448 = vst [vmem:[%s2024_s7 + $0xf0] sm:$0xff] %v1858_v32 }
  0x65   : > { %449 = vst [vmem:[%s2024_s7 + $0xf8] sm:$0xff] %v1858_v32 }
  0x66 PF: > { %s1388_s10 = sshll.u32 %s1840_s17, 8  ;;  %v1392_v47 = vld [vmem:[%s2031_s18] sm:$0xf]  ;;  %v1603_v49 = vld [vmem:[%s2031_s18 + $0x4] sm:$0xf0]  ;;  %p1582_p12 = scmp.ne.s32.totalorder %s1840_s17, 1 }
  0x67   : > { %s451_s11 = sshra.s32 %s1388_s10, 3  ;;  %v1456_v50 = vld [vmem:[%s2031_s18 + $0x80] sm:$0xf]  ;;  %v1619_v52 = vld [vmem:[%s2031_s18 + $0x84] sm:$0xf0]  ;;  %v1393_v57 = vor.u32 %v1603_v49, %v1392_v47 }
  0x68   : > { %s1389_s12 = sshll.u32 %s451_s11, 2  ;;  %v1602_v53 = vld [vmem:[%s2031_s18 + $0x4] sm:$0xf]  ;;  %v1394_v54 = vld [vmem:[%s2031_s18 + $0x8] sm:$0xf0]  ;;  %v1457_v58 = vor.u32 %v1619_v52, %v1456_v50 }
  0x69   : > { %s2070_s24 = scalar_lea.vmem %s2475_s1, %s1389_s12  ;;  %v1618_v55 = vld [vmem:[%s2031_s18 + $0x84] sm:$0xf]  ;;  %v1458_v56 = vld [vmem:[%s2031_s18 + $0x88] sm:$0xf0]  ;;  %v1397_v59 = vor.u32 %v1602_v53, %v1394_v54  ;;  %v1400_v61 = vld [vmem:[%s2031_s18 + $0x10] sm:$0xf] }
  0x6a   : > { %v1593_v33 = vld [vmem:[%s2070_s24 + $0x38] sm:$0xff]  ;;  %v1592_v35 = vld [vmem:[%s2070_s24 + $0x30] sm:$0xff]  ;;  %v1591_v37 = vld [vmem:[%s2070_s24 + $0x28] sm:$0xff]  ;;  %v1461_v60 = vor.u32 %v1618_v55, %v1458_v56 }
  0x6b   : > { %v1601_v34 = vld [vmem:[%s2070_s24 + $0x78] sm:$0xff]  ;;  %807 = vmatpush.bf16.msra.mxu0 %v1593_v33  ;;  %1729 = vmatpush.bf16.msra.mxu2 %v1593_v33  ;;  %v1600_v36 = vld [vmem:[%s2070_s24 + $0x70] sm:$0xff]  ;;  %v1599_v38 = vld [vmem:[%s2070_s24 + $0x68] sm:$0xff] }
  0x6c   : > { %896 = vmatpush.bf16.msra.mxu1 %v1601_v34  ;;  %1737 = vmatpush.bf16.msra.mxu3 %v1601_v34  ;;  %v1590_v39 = vld [vmem:[%s2070_s24 + $0x20] sm:$0xff]  ;;  %v1589_v41 = vld [vmem:[%s2070_s24 + $0x18] sm:$0xff]  ;;  %v1588_v43 = vld [vmem:[%s2070_s24 + $0x10] sm:$0xff] }
  0x6d   : > { %v1598_v40 = vld [vmem:[%s2070_s24 + $0x60] sm:$0xff]  ;;  %v1597_v42 = vld [vmem:[%s2070_s24 + $0x58] sm:$0xff]  ;;  %v1596_v44 = vld [vmem:[%s2070_s24 + $0x50] sm:$0xff] }
  0x6e   : > { %v1587_v45 = vld [vmem:[%s2070_s24 + $0x8] sm:$0xff]  ;;  %v1586_v48 = vld [vmem:[%s2070_s24] sm:$0xff]  ;;  %v1605_v62 = vld [vmem:[%s2031_s18 + $0x14] sm:$0xf0] }
  0x6f   : > { %808 = vmatpush.bf16.msra.mxu0 %v1592_v35  ;;  %1730 = vmatpush.bf16.msra.mxu2 %v1592_v35  ;;  %v1595_v46 = vld [vmem:[%s2070_s24 + $0x48] sm:$0xff]  ;;  %v1594_v51 = vld [vmem:[%s2070_s24 + $0x40] sm:$0xff]  ;;  %v1464_v63 = vld [vmem:[%s2031_s18 + $0x90] sm:$0xf]  ;;  %v1401_v5 = vor.u32 %v1605_v62, %v1400_v61 }
  0x70   : > { %897 = vmatpush.bf16.msra.mxu1 %v1600_v36  ;;  %1738 = vmatpush.bf16.msra.mxu3 %v1600_v36  ;;  %v1621_v0 = vld [vmem:[%s2031_s18 + $0x94] sm:$0xf0]  ;;  %v1604_v1 = vld [vmem:[%s2031_s18 + $0x14] sm:$0xf]  ;;  %v1402_v2 = vld [vmem:[%s2031_s18 + $0x18] sm:$0xf0] }
  0x71   : > { %v1620_v3 = vld [vmem:[%s2031_s18 + $0x94] sm:$0xf]  ;;  %v1466_v4 = vld [vmem:[%s2031_s18 + $0x98] sm:$0xf0]  ;;  %v1465_v6 = vor.u32 %v1621_v0, %v1464_v63  ;;  %v1405_v7 = vor.u32 %v1604_v1, %v1402_v2  ;;  %v1408_v9 = vld [vmem:[%s2031_s18 + $0x20] sm:$0xf] }
  0x72   : > { %v1469_v8 = vor.u32 %v1620_v3, %v1466_v4  ;;  %v1607_v10 = vld [vmem:[%s2031_s18 + $0x24] sm:$0xf0]  ;;  %v1472_v11 = vld [vmem:[%s2031_s18 + $0xa0] sm:$0xf]  ;;  %v1606_v13 = vld [vmem:[%s2031_s18 + $0x24] sm:$0xf] }
  0x73   : > { %809 = vmatpush.bf16.msra.mxu0 %v1591_v37  ;;  %1731 = vmatpush.bf16.msra.mxu2 %v1591_v37  ;;  %v1623_v12 = vld [vmem:[%s2031_s18 + $0xa4] sm:$0xf0]  ;;  %v1410_v14 = vld [vmem:[%s2031_s18 + $0x28] sm:$0xf0]  ;;  %v1622_v15 = vld [vmem:[%s2031_s18 + $0xa4] sm:$0xf]  ;;  %v1409_v17 = vor.u32 %v1607_v10, %v1408_v9 }
  0x74   : > { %898 = vmatpush.bf16.msra.mxu1 %v1599_v38  ;;  %1739 = vmatpush.bf16.msra.mxu3 %v1599_v38  ;;  %v1474_v16 = vld [vmem:[%s2031_s18 + $0xa8] sm:$0xf0]  ;;  %v1473_v18 = vor.u32 %v1623_v12, %v1472_v11  ;;  %v1413_v19 = vor.u32 %v1606_v13, %v1410_v14  ;;  %v1416_v21 = vld [vmem:[%s2031_s18 + $0x30] sm:$0xf]  ;;  %v1609_v22 = vld [vmem:[%s2031_s18 + $0x34] sm:$0xf0] }
  0x75   : > { %v1477_v20 = vor.u32 %v1622_v15, %v1474_v16  ;;  %v1480_v23 = vld [vmem:[%s2031_s18 + $0xb0] sm:$0xf]  ;;  %v1625_v24 = vld [vmem:[%s2031_s18 + $0xb4] sm:$0xf0]  ;;  %v1608_v25 = vld [vmem:[%s2031_s18 + $0x34] sm:$0xf]  ;;  %v1417_v29 = vor.u32 %v1609_v22, %v1416_v21 }
  0x76   : > { %v1418_v26 = vld [vmem:[%s2031_s18 + $0x38] sm:$0xf0]  ;;  %v1624_v27 = vld [vmem:[%s2031_s18 + $0xb4] sm:$0xf]  ;;  %v1481_v30 = vor.u32 %v1625_v24, %v1480_v23  ;;  %v1424_v33 = vld [vmem:[%s2031_s18 + $0x40] sm:$0xf] }
  0x77   : > { %810 = vmatpush.bf16.msra.mxu0 %v1590_v39  ;;  %1732 = vmatpush.bf16.msra.mxu2 %v1590_v39  ;;  %v1482_v28 = vld [vmem:[%s2031_s18 + $0xb8] sm:$0xf0]  ;;  %v1421_v31 = vor.u32 %v1608_v25, %v1418_v26  ;;  %v1611_v34 = vld [vmem:[%s2031_s18 + $0x44] sm:$0xf0]  ;;  %v1488_v35 = vld [vmem:[%s2031_s18 + $0xc0] sm:$0xf] }
  0x78   : > { %899 = vmatpush.bf16.msra.mxu1 %v1598_v40  ;;  %1740 = vmatpush.bf16.msra.mxu3 %v1598_v40  ;;  %v1485_v32 = vor.u32 %v1624_v27, %v1482_v28  ;;  %v1627_v36 = vld [vmem:[%s2031_s18 + $0xc4] sm:$0xf0]  ;;  %v1610_v37 = vld [vmem:[%s2031_s18 + $0x44] sm:$0xf]  ;;  %v1426_v38 = vld [vmem:[%s2031_s18 + $0x48] sm:$0xf0] }
  0x79   : > { %v1626_v39 = vld [vmem:[%s2031_s18 + $0xc4] sm:$0xf]  ;;  %v1490_v40 = vld [vmem:[%s2031_s18 + $0xc8] sm:$0xf0]  ;;  %v1496_v47 = vld [vmem:[%s2031_s18 + $0xd0] sm:$0xf] }
  0x7a   : > { %v1612_v49 = vld [vmem:[%s2031_s18 + $0x54] sm:$0xf]  ;;  %v1434_v50 = vld [vmem:[%s2031_s18 + $0x58] sm:$0xf0]  ;;  %v1614_v61 = vld [vmem:[%s2031_s18 + $0x64] sm:$0xf] }
  0x7b   : > { %811 = vmatpush.bf16.msra.mxu0 %v1589_v41  ;;  %1733 = vmatpush.bf16.msra.mxu2 %v1589_v41  ;;  %v1425_v41 = vor.u32 %v1611_v34, %v1424_v33  ;;  %v1498_v52 = vld [vmem:[%s2031_s18 + $0xd8] sm:$0xf0]  ;;  %v1437_v55 = vor.u32 %v1612_v49, %v1434_v50  ;;  %v1442_v62 = vld [vmem:[%s2031_s18 + $0x68] sm:$0xf0]  ;;  %v1630_v63 = vld [vmem:[%s2031_s18 + $0xe4] sm:$0xf] }
  0x7c   : > { %900 = vmatpush.bf16.msra.mxu1 %v1597_v42  ;;  %1741 = vmatpush.bf16.msra.mxu3 %v1597_v42  ;;  %v1489_v42 = vor.u32 %v1627_v36, %v1488_v35  ;;  %v1506_v0 = vld [vmem:[%s2031_s18 + $0xe8] sm:$0xf0]  ;;  %v1445_v3 = vor.u32 %v1614_v61, %v1442_v62  ;;  %v1616_v9 = vld [vmem:[%s2031_s18 + $0x74] sm:$0xf]  ;;  %v1450_v10 = vld [vmem:[%s2031_s18 + $0x78] sm:$0xf0] }
  0x7d   : > { %v1509_v4 = vor.u32 %v1630_v63, %v1506_v0  ;;  %v1632_v11 = vld [vmem:[%s2031_s18 + $0xf4] sm:$0xf]  ;;  %v1514_v12 = vld [vmem:[%s2031_s18 + $0xf8] sm:$0xf0]  ;;  %v1453_v15 = vor.u32 %v1616_v9, %v1450_v10  ;;  %v503_v23 = vld [vmem:[%s2024_s7 + $0x80] sm:$0xff] }
  0x7e   : > { %v1517_v16 = vor.u32 %v1632_v11, %v1514_v12  ;;  %v488_v27 = vld [vmem:[%s2024_s7 + $0x8] sm:$0xff]  ;;  %v507_v63 = vld [vmem:[%s2024_s7 + $0xa0] sm:$0xff] }
  0x7f   : > { %812 = vmatpush.bf16.msra.mxu0 %v1588_v43  ;;  %1734 = vmatpush.bf16.msra.mxu2 %v1588_v43  ;;  %v1429_v43 = vor.u32 %v1610_v37, %v1426_v38  ;;  %v504_v33 = vld [vmem:[%s2024_s7 + $0x88] sm:$0xff]  ;;  %v489_v37 = vld [vmem:[%s2024_s7 + $0x10] sm:$0xff] }
  0x80   : > { %901 = vmatpush.bf16.msra.mxu1 %v1596_v44  ;;  %1742 = vmatpush.bf16.msra.mxu3 %v1596_v44  ;;  %v1493_v44 = vor.u32 %v1626_v39, %v1490_v40  ;;  %v508_v9 = vld [vmem:[%s2024_s7 + $0xa8] sm:$0xff] }
  0x83   : > { %813 = vmatpush.bf16.msra.mxu0 %v1587_v45  ;;  %1735 = vmatpush.bf16.msra.mxu2 %v1587_v45  ;;  %v1432_v45 = vld [vmem:[%s2031_s18 + $0x50] sm:$0xf] }
  0x84   : > { %902 = vmatpush.bf16.msra.mxu1 %v1595_v46  ;;  %1743 = vmatpush.bf16.msra.mxu3 %v1595_v46  ;;  %v1613_v46 = vld [vmem:[%s2031_s18 + $0x54] sm:$0xf0] }
  0x85   : > { %v1433_v53 = vor.u32 %v1613_v46, %v1432_v45 }
  0x87   : > { %814 = vmatpush.bf16.msra.mxu0 %v1586_v48  ;;  %1736 = vmatpush.bf16.msra.mxu2 %v1586_v48  ;;  %v1629_v48 = vld [vmem:[%s2031_s18 + $0xd4] sm:$0xf0] }
  0x88   : > { %903 = vmatpush.bf16.msra.mxu1 %v1594_v51  ;;  %1744 = vmatpush.bf16.msra.mxu3 %v1594_v51  ;;  %v1628_v51 = vld [vmem:[%s2031_s18 + $0xd4] sm:$0xf]  ;;  %v1497_v54 = vor.u32 %v1629_v48, %v1496_v47  ;;  %v490_v47 = vld [vmem:[%s2024_s7 + $0x18] sm:$0xff] }
  0x89   : > { %v1501_v56 = vor.u32 %v1628_v51, %v1498_v52 }
  0x8a   : > { %815 = vmatmul.bf16.vlgmr.msra.gmra.mxu0 %v1393_v57  ;;  %855 = vmatmul.bf16.vlgmr.msra.gmra.mxu2 %v1457_v58  ;;  %v1440_v57 = vld [vmem:[%s2031_s18 + $0x60] sm:$0xf]  ;;  %v1615_v58 = vld [vmem:[%s2031_s18 + $0x64] sm:$0xf0] }
  0x8b   : > { %904 = vmatmul.bf16.vlgmr.msra.gmra.mxu1 %v1397_v59  ;;  %944 = vmatmul.bf16.vlgmr.msra.gmra.mxu3 %v1461_v60  ;;  %v1504_v59 = vld [vmem:[%s2031_s18 + $0xe0] sm:$0xf]  ;;  %v1631_v60 = vld [vmem:[%s2031_s18 + $0xe4] sm:$0xf0]  ;;  %v1441_v1 = vor.u32 %v1615_v58, %v1440_v57 }
  0x8c   : > { %v1505_v2 = vor.u32 %v1631_v60, %v1504_v59  ;;  %v491_v57 = vld [vmem:[%s2024_s7 + $0x20] sm:$0xff] }
  0x9a   : > { %820 = vmatmul.bf16.gmra.mxu0 %v1401_v5  ;;  %860 = vmatmul.bf16.gmra.mxu2 %v1465_v6  ;;  %v1448_v5 = vld [vmem:[%s2031_s18 + $0x70] sm:$0xf]  ;;  %v1617_v6 = vld [vmem:[%s2031_s18 + $0x74] sm:$0xf0] }
  0x9b   : > { %909 = vmatmul.bf16.gmra.mxu1 %v1405_v7  ;;  %949 = vmatmul.bf16.gmra.mxu3 %v1469_v8  ;;  %v1512_v7 = vld [vmem:[%s2031_s18 + $0xf0] sm:$0xf]  ;;  %v1633_v8 = vld [vmem:[%s2031_s18 + $0xf4] sm:$0xf0]  ;;  %v1449_v13 = vor.u32 %v1617_v6, %v1448_v5 }
  0x9c   : > { %v1513_v14 = vor.u32 %v1633_v8, %v1512_v7 }
  0xaa   : > { %825 = vmatmul.bf16.gmra.mxu0 %v1409_v17  ;;  %865 = vmatmul.bf16.gmra.mxu2 %v1473_v18  ;;  %v487_v18 = vld [vmem:[%s2024_s7] sm:$0xff] }
  0xab   : > { %914 = vmatmul.bf16.gmra.mxu1 %v1413_v19  ;;  %954 = vmatmul.bf16.gmra.mxu3 %v1477_v20 }
  0xba   : > { %830 = vmatmul.bf16.gmra.mxu0 %v1417_v29  ;;  %870 = vmatmul.bf16.gmra.mxu2 %v1481_v30 }
  0xbb   : > { %919 = vmatmul.bf16.gmra.mxu1 %v1421_v31  ;;  %959 = vmatmul.bf16.gmra.mxu3 %v1485_v32 }
  0xca   : > { %835 = vmatmul.bf16.gmra.mxu0 %v1425_v41  ;;  %875 = vmatmul.bf16.gmra.mxu2 %v1489_v42 }
  0xcb   : > { %924 = vmatmul.bf16.gmra.mxu1 %v1429_v43  ;;  %964 = vmatmul.bf16.gmra.mxu3 %v1493_v44  ;;  %v505_v43 = vld [vmem:[%s2024_s7 + $0x90] sm:$0xff] }
  0xda   : > { %840 = vmatmul.bf16.gmra.mxu0 %v1433_v53  ;;  %880 = vmatmul.bf16.gmra.mxu2 %v1497_v54  ;;  %v506_v53 = vld [vmem:[%s2024_s7 + $0x98] sm:$0xff] }
  0xdb   : > { %929 = vmatmul.bf16.gmra.mxu1 %v1437_v55  ;;  %969 = vmatmul.bf16.gmra.mxu3 %v1501_v56 }
  0xea   : > { %845 = vmatmul.bf16.gmra.mxu0 %v1441_v1  ;;  %885 = vmatmul.bf16.gmra.mxu2 %v1505_v2 }
  0xeb   : > { %934 = vmatmul.bf16.gmra.mxu1 %v1445_v3  ;;  %974 = vmatmul.bf16.gmra.mxu3 %v1509_v4  ;;  %v492_v3 = vld [vmem:[%s2024_s7 + $0x28] sm:$0xff] }
  0xfa   : > { %850 = vmatmul.bf16.gmra.mxu0 %v1449_v13  ;;  %890 = vmatmul.bf16.gmra.mxu2 %v1513_v14  ;;  %v493_v13 = vld [vmem:[%s2024_s7 + $0x30] sm:$0xff] }
  0xfb   : > { %939 = vmatmul.bf16.gmra.mxu1 %v1453_v15  ;;  %979 = vmatmul.bf16.gmra.mxu3 %v1517_v16 }
 0x107   : > { %v816_v17 = vpop.f32.mrf.mxu0 }
 0x108   : > { %v905_v19 = vpop.f32.mrf.mxu1 }
 0x109   : > { %v906_v20 = vadd.f32 %v905_v19, %v816_v17  ;;  %v509_v19 = vld [vmem:[%s2024_s7 + $0xb0] sm:$0xff] }
 0x10b   : > { %v985_v21 = vadd.f32 %v906_v20, %v487_v18 }
 0x10d   : > { %1017 = vst [vmem:[%s2024_s7] sm:$0xff] %v985_v21  ;;  %v856_v22 = vpop.f32.mrf.mxu2 }
 0x10e   : > { %v945_v24 = vpop.f32.mrf.mxu3 }
 0x10f   : > { %v946_v25 = vadd.f32 %v945_v24, %v856_v22  ;;  %v818_v26 = vpop.f32.mrf.mxu0 }
 0x110   : > { %v907_v28 = vpop.f32.mrf.mxu1 }
 0x111   : > { %v1001_v29 = vadd.f32 %v946_v25, %v503_v23  ;;  %v908_v30 = vadd.f32 %v907_v28, %v818_v26  ;;  %v494_v23 = vld [vmem:[%s2024_s7 + $0x38] sm:$0xff] }
 0x113   : > { %1033 = vst [vmem:[%s2024_s7 + $0x80] sm:$0xff] %v1001_v29  ;;  %v986_v31 = vadd.f32 %v908_v30, %v488_v27  ;;  %v510_v29 = vld [vmem:[%s2024_s7 + $0xb8] sm:$0xff] }
 0x115   : > { %1018 = vst [vmem:[%s2024_s7 + $0x8] sm:$0xff] %v986_v31  ;;  %v858_v32 = vpop.f32.mrf.mxu2 }
 0x116   : > { %v947_v34 = vpop.f32.mrf.mxu3 }
 0x117   : > { %v948_v35 = vadd.f32 %v947_v34, %v858_v32  ;;  %v821_v36 = vpop.f32.mrf.mxu0 }
 0x118   : > { %v910_v38 = vpop.f32.mrf.mxu1 }
 0x119   : > { %v1002_v39 = vadd.f32 %v948_v35, %v504_v33  ;;  %v911_v40 = vadd.f32 %v910_v38, %v821_v36  ;;  %v495_v33 = vld [vmem:[%s2024_s7 + $0x40] sm:$0xff] }
 0x11b   : > { %1034 = vst [vmem:[%s2024_s7 + $0x88] sm:$0xff] %v1002_v39  ;;  %v987_v41 = vadd.f32 %v911_v40, %v489_v37  ;;  %v511_v39 = vld [vmem:[%s2024_s7 + $0xc0] sm:$0xff] }
 0x11d   : > { %1019 = vst [vmem:[%s2024_s7 + $0x10] sm:$0xff] %v987_v41  ;;  %v861_v42 = vpop.f32.mrf.mxu2 }
 0x11e   : > { %v950_v44 = vpop.f32.mrf.mxu3 }
 0x11f   : > { %v951_v45 = vadd.f32 %v950_v44, %v861_v42  ;;  %v823_v46 = vpop.f32.mrf.mxu0 }
 0x120   : > { %v912_v48 = vpop.f32.mrf.mxu1 }
 0x121   : > { %v1003_v49 = vadd.f32 %v951_v45, %v505_v43  ;;  %v913_v50 = vadd.f32 %v912_v48, %v823_v46  ;;  %v496_v43 = vld [vmem:[%s2024_s7 + $0x48] sm:$0xff] }
 0x123   : > { %1035 = vst [vmem:[%s2024_s7 + $0x90] sm:$0xff] %v1003_v49  ;;  %v988_v51 = vadd.f32 %v913_v50, %v490_v47  ;;  %v512_v49 = vld [vmem:[%s2024_s7 + $0xc8] sm:$0xff] }
 0x125   : > { %1020 = vst [vmem:[%s2024_s7 + $0x18] sm:$0xff] %v988_v51  ;;  %v863_v52 = vpop.f32.mrf.mxu2 }
 0x126   : > { %v952_v54 = vpop.f32.mrf.mxu3 }
 0x127   : > { %v953_v55 = vadd.f32 %v952_v54, %v863_v52  ;;  %v826_v56 = vpop.f32.mrf.mxu0 }
 0x128   : > { %v915_v58 = vpop.f32.mrf.mxu1 }
 0x129   : > { %v1004_v59 = vadd.f32 %v953_v55, %v506_v53  ;;  %v916_v60 = vadd.f32 %v915_v58, %v826_v56  ;;  %v497_v53 = vld [vmem:[%s2024_s7 + $0x50] sm:$0xff] }
 0x12b   : > { %1036 = vst [vmem:[%s2024_s7 + $0x98] sm:$0xff] %v1004_v59  ;;  %v989_v61 = vadd.f32 %v916_v60, %v491_v57  ;;  %v513_v59 = vld [vmem:[%s2024_s7 + $0xd0] sm:$0xff] }
 0x12d   : > { %1021 = vst [vmem:[%s2024_s7 + $0x20] sm:$0xff] %v989_v61  ;;  %v866_v62 = vpop.f32.mrf.mxu2 }
 0x12e   : > { %v955_v0 = vpop.f32.mrf.mxu3 }
 0x12f   : > { %v956_v1 = vadd.f32 %v955_v0, %v866_v62  ;;  %v828_v2 = vpop.f32.mrf.mxu0 }
 0x130   : > { %v917_v4 = vpop.f32.mrf.mxu1 }
 0x131   : > { %v1005_v5 = vadd.f32 %v956_v1, %v507_v63  ;;  %v918_v6 = vadd.f32 %v917_v4, %v828_v2  ;;  %v498_v63 = vld [vmem:[%s2024_s7 + $0x58] sm:$0xff] }
 0x133   : > { %1037 = vst [vmem:[%s2024_s7 + $0xa0] sm:$0xff] %v1005_v5  ;;  %v990_v7 = vadd.f32 %v918_v6, %v492_v3  ;;  %v514_v5 = vld [vmem:[%s2024_s7 + $0xd8] sm:$0xff] }
 0x135   : > { %1022 = vst [vmem:[%s2024_s7 + $0x28] sm:$0xff] %v990_v7  ;;  %v868_v8 = vpop.f32.mrf.mxu2 }
 0x136   : > { %v957_v10 = vpop.f32.mrf.mxu3 }
 0x137   : > { %v958_v11 = vadd.f32 %v957_v10, %v868_v8  ;;  %v831_v12 = vpop.f32.mrf.mxu0 }
 0x138   : > { %v920_v14 = vpop.f32.mrf.mxu1 }
 0x139   : > { %v1006_v15 = vadd.f32 %v958_v11, %v508_v9  ;;  %v921_v16 = vadd.f32 %v920_v14, %v831_v12  ;;  %v499_v9 = vld [vmem:[%s2024_s7 + $0x60] sm:$0xff] }
 0x13b   : > { %1038 = vst [vmem:[%s2024_s7 + $0xa8] sm:$0xff] %v1006_v15  ;;  %v991_v17 = vadd.f32 %v921_v16, %v493_v13  ;;  %v515_v15 = vld [vmem:[%s2024_s7 + $0xe0] sm:$0xff] }
 0x13d   : > { %1023 = vst [vmem:[%s2024_s7 + $0x30] sm:$0xff] %v991_v17  ;;  %v871_v18 = vpop.f32.mrf.mxu2 }
 0x13e   : > { %v960_v20 = vpop.f32.mrf.mxu3 }
 0x13f   : > { %v961_v21 = vadd.f32 %v960_v20, %v871_v18  ;;  %v833_v22 = vpop.f32.mrf.mxu0 }
 0x140   : > { %v922_v24 = vpop.f32.mrf.mxu1 }
 0x141   : > { %v1007_v25 = vadd.f32 %v961_v21, %v509_v19  ;;  %v923_v26 = vadd.f32 %v922_v24, %v833_v22  ;;  %v500_v19 = vld [vmem:[%s2024_s7 + $0x68] sm:$0xff] }
 0x143   : > { %1039 = vst [vmem:[%s2024_s7 + $0xb0] sm:$0xff] %v1007_v25  ;;  %v992_v27 = vadd.f32 %v923_v26, %v494_v23  ;;  %v516_v25 = vld [vmem:[%s2024_s7 + $0xe8] sm:$0xff] }
 0x145   : > { %1024 = vst [vmem:[%s2024_s7 + $0x38] sm:$0xff] %v992_v27  ;;  %v873_v28 = vpop.f32.mrf.mxu2 }
 0x146   : > { %v962_v30 = vpop.f32.mrf.mxu3 }
 0x147   : > { %v963_v31 = vadd.f32 %v962_v30, %v873_v28  ;;  %v836_v32 = vpop.f32.mrf.mxu0 }
 0x148   : > { %v925_v34 = vpop.f32.mrf.mxu1 }
 0x149   : > { %v1008_v35 = vadd.f32 %v963_v31, %v510_v29  ;;  %v926_v36 = vadd.f32 %v925_v34, %v836_v32  ;;  %v501_v29 = vld [vmem:[%s2024_s7 + $0x70] sm:$0xff] }
 0x14b   : > { %1040 = vst [vmem:[%s2024_s7 + $0xb8] sm:$0xff] %v1008_v35  ;;  %v993_v37 = vadd.f32 %v926_v36, %v495_v33  ;;  %v517_v35 = vld [vmem:[%s2024_s7 + $0xf0] sm:$0xff] }
 0x14d   : > { %1025 = vst [vmem:[%s2024_s7 + $0x40] sm:$0xff] %v993_v37  ;;  %v876_v38 = vpop.f32.mrf.mxu2 }
 0x14e   : > { %v965_v40 = vpop.f32.mrf.mxu3 }
 0x14f   : > { %v966_v41 = vadd.f32 %v965_v40, %v876_v38  ;;  %v838_v42 = vpop.f32.mrf.mxu0 }
 0x150   : > { %v927_v44 = vpop.f32.mrf.mxu1 }
 0x151   : > { %v1009_v45 = vadd.f32 %v966_v41, %v511_v39  ;;  %v928_v46 = vadd.f32 %v927_v44, %v838_v42  ;;  %v502_v39 = vld [vmem:[%s2024_s7 + $0x78] sm:$0xff] }
 0x153   : > { %1041 = vst [vmem:[%s2024_s7 + $0xc0] sm:$0xff] %v1009_v45  ;;  %v994_v47 = vadd.f32 %v928_v46, %v496_v43  ;;  %v518_v45 = vld [vmem:[%s2024_s7 + $0xf8] sm:$0xff] }
 0x155   : > { %1026 = vst [vmem:[%s2024_s7 + $0x48] sm:$0xff] %v994_v47  ;;  %v878_v48 = vpop.f32.mrf.mxu2 }
 0x156   : > { %v967_v50 = vpop.f32.mrf.mxu3 }
 0x157   : > { %v968_v51 = vadd.f32 %v967_v50, %v878_v48  ;;  %v841_v52 = vpop.f32.mrf.mxu0 }
 0x158   : > { %v930_v54 = vpop.f32.mrf.mxu1 }
 0x159   : > { %v1010_v55 = vadd.f32 %v968_v51, %v512_v49  ;;  %v931_v56 = vadd.f32 %v930_v54, %v841_v52 }
 0x15b   : > { %1042 = vst [vmem:[%s2024_s7 + $0xc8] sm:$0xff] %v1010_v55  ;;  %v995_v57 = vadd.f32 %v931_v56, %v497_v53 }
 0x15d   : > { %1027 = vst [vmem:[%s2024_s7 + $0x50] sm:$0xff] %v995_v57  ;;  %v881_v58 = vpop.f32.mrf.mxu2 }
 0x15e   : > { %v970_v60 = vpop.f32.mrf.mxu3 }
 0x15f   : > { %v971_v61 = vadd.f32 %v970_v60, %v881_v58  ;;  %v843_v62 = vpop.f32.mrf.mxu0 }
 0x160   : > { %v932_v0 = vpop.f32.mrf.mxu1 }
 0x161   : > { %v1011_v1 = vadd.f32 %v971_v61, %v513_v59  ;;  %v933_v2 = vadd.f32 %v932_v0, %v843_v62 }
 0x163   : > { %1043 = vst [vmem:[%s2024_s7 + $0xd0] sm:$0xff] %v1011_v1  ;;  %v996_v3 = vadd.f32 %v933_v2, %v498_v63 }
 0x165   : > { %1028 = vst [vmem:[%s2024_s7 + $0x58] sm:$0xff] %v996_v3  ;;  %v883_v4 = vpop.f32.mrf.mxu2 }
 0x166   : > { %v972_v6 = vpop.f32.mrf.mxu3 }
 0x167   : > { %v973_v7 = vadd.f32 %v972_v6, %v883_v4  ;;  %v846_v8 = vpop.f32.mrf.mxu0 }
 0x168   : > { %v935_v10 = vpop.f32.mrf.mxu1 }
 0x169   : > { %v1012_v11 = vadd.f32 %v973_v7, %v514_v5  ;;  %v936_v12 = vadd.f32 %v935_v10, %v846_v8 }
 0x16b   : > { %1044 = vst [vmem:[%s2024_s7 + $0xd8] sm:$0xff] %v1012_v11  ;;  %v997_v13 = vadd.f32 %v936_v12, %v499_v9 }
 0x16d   : > { %1029 = vst [vmem:[%s2024_s7 + $0x60] sm:$0xff] %v997_v13  ;;  %v886_v14 = vpop.f32.mrf.mxu2 }
 0x16e   : > { %v975_v16 = vpop.f32.mrf.mxu3 }
 0x16f   : > { %v976_v17 = vadd.f32 %v975_v16, %v886_v14  ;;  %v848_v18 = vpop.f32.mrf.mxu0 }
 0x170   : > { %v937_v20 = vpop.f32.mrf.mxu1 }
 0x171   : > { %v1013_v21 = vadd.f32 %v976_v17, %v515_v15  ;;  %v938_v22 = vadd.f32 %v937_v20, %v848_v18 }
 0x173   : > { %1045 = vst [vmem:[%s2024_s7 + $0xe0] sm:$0xff] %v1013_v21  ;;  %v998_v23 = vadd.f32 %v938_v22, %v500_v19 }
 0x175   : > { %1030 = vst [vmem:[%s2024_s7 + $0x68] sm:$0xff] %v998_v23  ;;  %v888_v24 = vpop.f32.mrf.mxu2 }
 0x176   : > { %v977_v26 = vpop.f32.mrf.mxu3 }
 0x177   : > { %v978_v27 = vadd.f32 %v977_v26, %v888_v24  ;;  %v851_v28 = vpop.f32.mrf.mxu0 }
 0x178   : > { %v940_v30 = vpop.f32.mrf.mxu1 }
 0x179   : > { %v1014_v31 = vadd.f32 %v978_v27, %v516_v25  ;;  %v941_v32 = vadd.f32 %v940_v30, %v851_v28 }
 0x17b   : > { %1046 = vst [vmem:[%s2024_s7 + $0xe8] sm:$0xff] %v1014_v31  ;;  %v999_v33 = vadd.f32 %v941_v32, %v501_v29 }
 0x17d   : > { %1031 = vst [vmem:[%s2024_s7 + $0x70] sm:$0xff] %v999_v33  ;;  %v891_v34 = vpop.f32.mrf.mxu2 }
 0x17e   : > { %v980_v36 = vpop.f32.mrf.mxu3 }
 0x17f   : > { %v981_v37 = vadd.f32 %v980_v36, %v891_v34  ;;  %v853_v38 = vpop.f32.mrf.mxu0 }
 0x180   : > { %v942_v40 = vpop.f32.mrf.mxu1 }
 0x181   : > { %v1015_v41 = vadd.f32 %v981_v37, %v517_v35  ;;  %v943_v42 = vadd.f32 %v942_v40, %v853_v38 }
 0x183   : > { %1047 = vst [vmem:[%s2024_s7 + $0xf0] sm:$0xff] %v1015_v41  ;;  %v1000_v43 = vadd.f32 %v943_v42, %v502_v39 }
 0x185   : > { %1032 = vst [vmem:[%s2024_s7 + $0x78] sm:$0xff] %v1000_v43  ;;  %v893_v44 = vpop.f32.mrf.mxu2 }
 0x186   : > { %v982_v46 = vpop.f32.mrf.mxu3 }
 0x187   : > { %v983_v47 = vadd.f32 %v982_v46, %v893_v44  ;;  %1052 = sbr.rel (%p1582_p12) target bundleno = 450 (0x1c2), region = 78 }
 0x189   : > { %v1016_v48 = vadd.f32 %v983_v47, %v518_v45 }
 0x18b   : > { %1048 = vst [vmem:[%s2024_s7 + $0xf8] sm:$0xff] %v1016_v48 }
 0x18c   : > { %v1053_v49 = vld [vmem:[%s2024_s7] sm:$0xff]  ;;  %v2219_v50 = vld [vmem:[%s2024_s7 + $0x8] sm:$0xff]  ;;  %v2223_v52 = vld [vmem:[%s2024_s7 + $0x10] sm:$0xff] }
 0x18d   : > { %v1637_v51 = vpack.c.bf16 %v2219_v50, %v1053_v49  ;;  %v2226_v53 = vld [vmem:[%s2024_s7 + $0x18] sm:$0xff]  ;;  %v2231_v55 = vld [vmem:[%s2024_s7 + $0x20] sm:$0xff]  ;;  %v2235_v56 = vld [vmem:[%s2024_s7 + $0x28] sm:$0xff] }
 0x18e   : > { %v1642_v54 = vpack.c.bf16 %v2226_v53, %v2223_v52  ;;  %v1647_v57 = vpack.c.bf16 %v2235_v56, %v2231_v55  ;;  %v2241_v58 = vld [vmem:[%s2024_s7 + $0x30] sm:$0xff]  ;;  %v2244_v59 = vld [vmem:[%s2024_s7 + $0x38] sm:$0xff]  ;;  %v2249_v61 = vld [vmem:[%s2024_s7 + $0x40] sm:$0xff] }
 0x18f   : > { %1638 = vst [vmem:[%s2029_s15] sm:$0xff] %v1637_v51   ;;  %v1652_v60 = vpack.c.bf16 %v2244_v59, %v2241_v58  ;;  %v2252_v62 = vld [vmem:[%s2024_s7 + $0x48] sm:$0xff]  ;;  %v2258_v0 = vld [vmem:[%s2024_s7 + $0x50] sm:$0xff]  ;;  %v2262_v1 = vld [vmem:[%s2024_s7 + $0x58] sm:$0xff] }
 0x190   : > { %1714 = vst [vmem:[%s2029_s15 + $0x8] sm:$0xff] %v1642_v54   ;;  %v1657_v63 = vpack.c.bf16 %v2252_v62, %v2249_v61  ;;  %v1662_v2 = vpack.c.bf16 %v2262_v1, %v2258_v0  ;;  %v2268_v3 = vld [vmem:[%s2024_s7 + $0x60] sm:$0xff]  ;;  %v2271_v4 = vld [vmem:[%s2024_s7 + $0x68] sm:$0xff]  ;;  %v2276_v6 = vld [vmem:[%s2024_s7 + $0x70] sm:$0xff] }
 0x191   : > { %1715 = vst [vmem:[%s2029_s15 + $0x10] sm:$0xff] %v1647_v57   ;;  %v1667_v5 = vpack.c.bf16 %v2271_v4, %v2268_v3  ;;  %v2279_v7 = vld [vmem:[%s2024_s7 + $0x78] sm:$0xff]  ;;  %v2285_v9 = vld [vmem:[%s2024_s7 + $0x80] sm:$0xff]  ;;  %v2289_v10 = vld [vmem:[%s2024_s7 + $0x88] sm:$0xff] }
 0x192   : > { %1716 = vst [vmem:[%s2029_s15 + $0x18] sm:$0xff] %v1652_v60   ;;  %v1672_v8 = vpack.c.bf16 %v2279_v7, %v2276_v6  ;;  %v1677_v11 = vpack.c.bf16 %v2289_v10, %v2285_v9  ;;  %v2295_v12 = vld [vmem:[%s2024_s7 + $0x90] sm:$0xff]  ;;  %v2298_v13 = vld [vmem:[%s2024_s7 + $0x98] sm:$0xff]  ;;  %v2303_v15 = vld [vmem:[%s2024_s7 + $0xa0] sm:$0xff] }
 0x193   : > { %1717 = vst [vmem:[%s2029_s15 + $0x20] sm:$0xff] %v1657_v63   ;;  %v1682_v14 = vpack.c.bf16 %v2298_v13, %v2295_v12  ;;  %v2306_v16 = vld [vmem:[%s2024_s7 + $0xa8] sm:$0xff]  ;;  %v2312_v18 = vld [vmem:[%s2024_s7 + $0xb0] sm:$0xff]  ;;  %v2316_v19 = vld [vmem:[%s2024_s7 + $0xb8] sm:$0xff] }
 0x194   : > { %1718 = vst [vmem:[%s2029_s15 + $0x28] sm:$0xff] %v1662_v2   ;;  %v1687_v17 = vpack.c.bf16 %v2306_v16, %v2303_v15  ;;  %v1692_v20 = vpack.c.bf16 %v2316_v19, %v2312_v18  ;;  %v2322_v21 = vld [vmem:[%s2024_s7 + $0xc0] sm:$0xff]  ;;  %v2325_v22 = vld [vmem:[%s2024_s7 + $0xc8] sm:$0xff]  ;;  %v2331_v25 = vld [vmem:[%s2024_s7 + $0xd0] sm:$0xff] }
 0x195   : > { %1719 = vst [vmem:[%s2029_s15 + $0x30] sm:$0xff] %v1667_v5   ;;  %v1149_v23 = vld [vmem:[%s2019_s30] sm:$0xff]  ;;  %v1697_v24 = vpack.c.bf16 %v2325_v22, %v2322_v21  ;;  %v2334_v26 = vld [vmem:[%s2024_s7 + $0xd8] sm:$0xff]  ;;  %v1150_v27 = vld [vmem:[%s2019_s30 + $0x8] sm:$0xff] }
 0x196   : > { %1720 = vst [vmem:[%s2029_s15 + $0x38] sm:$0xff] %v1672_v8   ;;  %v1151_v28 = vld [vmem:[%s2019_s30 + $0x10] sm:$0xff]  ;;  %v1702_v29 = vpack.c.bf16 %v2334_v26, %v2331_v25  ;;  %v2342_v30 = vld [vmem:[%s2024_s7 + $0xe0] sm:$0xff]  ;;  %v1152_v31 = vld [vmem:[%s2019_s30 + $0x18] sm:$0xff]  ;;  %v1181_v34 = vadd.f32 %v1149_v23, %v1053_v49  ;;  %v1182_v39 = vadd.f32 %v1150_v27, %v2219_v50 }
 0x197   : > { %1721 = vst [vmem:[%s2029_s15 + $0x40] sm:$0xff] %v1677_v11   ;;  %v1153_v32 = vld [vmem:[%s2019_s30 + $0x20] sm:$0xff]  ;;  %v2348_v33 = vld [vmem:[%s2024_s7 + $0xe8] sm:$0xff]  ;;  %v2355_v37 = vld [vmem:[%s2024_s7 + $0xf0] sm:$0xff]  ;;  %v1184_v27 = vadd.f32 %v1152_v31, %v2226_v53 }
 0x198   : > { %1722 = vst [vmem:[%s2029_s15 + $0x48] sm:$0xff] %v1682_v14   ;;  %v1154_v35 = vld [vmem:[%s2019_s30 + $0x28] sm:$0xff]  ;;  %v1707_v36 = vpack.c.bf16 %v2348_v33, %v2342_v30  ;;  %v2358_v38 = vld [vmem:[%s2024_s7 + $0xf8] sm:$0xff]  ;;  %v1155_v40 = vld [vmem:[%s2019_s30 + $0x30] sm:$0xff] }
 0x199   : > { %1723 = vst [vmem:[%s2029_s15 + $0x50] sm:$0xff] %v1687_v17   ;;  %v1156_v41 = vld [vmem:[%s2019_s30 + $0x38] sm:$0xff]  ;;  %v1157_v42 = vld [vmem:[%s2019_s30 + $0x40] sm:$0xff]  ;;  %v1158_v43 = vld [vmem:[%s2019_s30 + $0x48] sm:$0xff]  ;;  %v1712_v14 = vpack.c.bf16 %v2358_v38, %v2355_v37  ;;  %v1183_v17 = vadd.f32 %v1151_v28, %v2223_v52  ;;  %v1186_v52 = vadd.f32 %v1154_v35, %v2235_v56  ;;  %v1187_v28 = vadd.f32 %v1155_v40, %v2241_v58 }
 0x19a   : > { %1724 = vst [vmem:[%s2029_s15 + $0x58] sm:$0xff] %v1692_v20   ;;  %v1159_v44 = vld [vmem:[%s2019_s30 + $0x50] sm:$0xff]  ;;  %v1160_v45 = vld [vmem:[%s2019_s30 + $0x58] sm:$0xff]  ;;  %v1161_v46 = vld [vmem:[%s2019_s30 + $0x60] sm:$0xff]  ;;  %v1188_v53 = vadd.f32 %v1156_v41, %v2244_v59  ;;  %v1189_v31 = vadd.f32 %v1157_v42, %v2249_v61 }
 0x19b   : > { %2482 = vst [vmem:[#allocation3_spill] sm:$0xff] %v2342_v30  ;;  %v1162_v47 = vld [vmem:[%s2019_s30 + $0x68] sm:$0xff]  ;;  %v1163_v48 = vld [vmem:[%s2019_s30 + $0x70] sm:$0xff]  ;;  %v1164_v49 = vld [vmem:[%s2019_s30 + $0x78] sm:$0xff]  ;;  %v1191_v56 = vadd.f32 %v1159_v44, %v2258_v0  ;;  %v1192_v58 = vadd.f32 %v1160_v45, %v2262_v1  ;;  %v1193_v59 = vadd.f32 %v1161_v46, %v2268_v3 }
 0x19c   : > { %1725 = vst [vmem:[%s2029_s15 + $0x60] sm:$0xff] %v1697_v24   ;;  %v1165_v50 = vld [vmem:[%s2019_s30 + $0x80] sm:$0xff]  ;;  %v1166_v51 = vld [vmem:[%s2019_s30 + $0x88] sm:$0xff]  ;;  %v1167_v54 = vld [vmem:[%s2019_s30 + $0x90] sm:$0xff]  ;;  %v1194_v61 = vadd.f32 %v1162_v47, %v2271_v4  ;;  %v1196_v0 = vadd.f32 %v1164_v49, %v2279_v7 }
 0x19d   : > { %2483 = vst [vmem:[#allocation4_spill] sm:$0xff] %v2348_v33  ;;  %v1168_v57 = vld [vmem:[%s2019_s30 + $0x98] sm:$0xff]  ;;  %v1169_v60 = vld [vmem:[%s2019_s30 + $0xa0] sm:$0xff]  ;;  %v1170_v63 = vld [vmem:[%s2019_s30 + $0xa8] sm:$0xff]  ;;  %v1197_v1 = vadd.f32 %v1165_v50, %v2285_v9  ;;  %v1198_v3 = vadd.f32 %v1166_v51, %v2289_v10  ;;  %v1199_v4 = vadd.f32 %v1167_v54, %v2295_v12 }
 0x19e   : > { %1726 = vst [vmem:[%s2029_s15 + $0x68] sm:$0xff] %v1702_v29   ;;  %v1171_v2 = vld [vmem:[%s2019_s30 + $0xb0] sm:$0xff]  ;;  %v1172_v5 = vld [vmem:[%s2019_s30 + $0xb8] sm:$0xff]  ;;  %v1173_v8 = vld [vmem:[%s2019_s30 + $0xc0] sm:$0xff]  ;;  %v1201_v7 = vadd.f32 %v1169_v60, %v2303_v15  ;;  %v1202_v9 = vadd.f32 %v1170_v63, %v2306_v16 }
 0x19f   : > { %2484 = vst [vmem:[#allocation5_spill] sm:$0xff] %v2358_v38  ;;  %v1174_v11 = vld [vmem:[%s2019_s30 + $0xc8] sm:$0xff]  ;;  %v1175_v20 = vld [vmem:[%s2019_s30 + $0xd0] sm:$0xff]  ;;  %v1176_v23 = vld [vmem:[%s2019_s30 + $0xd8] sm:$0xff]  ;;  %v1185_v38 = vadd.f32 %v1153_v32, %v2231_v55  ;;  %v1190_v55 = vadd.f32 %v1158_v43, %v2252_v62  ;;  %v1195_v62 = vadd.f32 %v1163_v48, %v2276_v6  ;;  %v1200_v6 = vadd.f32 %v1168_v57, %v2298_v13 }
 0x1a0   : > { %1727 = vst [vmem:[%s2029_s15 + $0x70] sm:$0xff] %v1707_v36   ;;  %v1177_v24 = vld [vmem:[%s2019_s30 + $0xe0] sm:$0xff]  ;;  %v1178_v29 = vld [vmem:[%s2019_s30 + $0xe8] sm:$0xff]  ;;  %v1179_v33 = vld [vmem:[%s2019_s30 + $0xf0] sm:$0xff]  ;;  %v1203_v10 = vadd.f32 %v1171_v2, %v2312_v18  ;;  %v1204_v12 = vadd.f32 %v1172_v5, %v2316_v19  ;;  %v1205_v13 = vadd.f32 %v1173_v8, %v2322_v21  ;;  %v1206_v15 = vadd.f32 %v1174_v11, %v2325_v22 }
 0x1a1   : > { %1728 = vst [vmem:[%s2029_s15 + $0x78] sm:$0xff] %v1712_v14   ;;  %v1180_v30 = vld [vmem:[%s2019_s30 + $0xf8] sm:$0xff]  ;;  %v1207_v16 = vadd.f32 %v1175_v20, %v2331_v25  ;;  %v1208_v18 = vadd.f32 %v1176_v23, %v2334_v26  ;;  %v1211_v21 = vadd.f32 %v1179_v33, %v2355_v37 }
 0x1a2   : > { %1213 = vst [vmem:[%s2024_s7] sm:$0xff] %v1181_v34  ;;  %v2485_v32 = vld [vmem:[#allocation3_spill] sm:$0xff] }
 0x1a3   : > { %1214 = vst [vmem:[%s2024_s7 + $0x8] sm:$0xff] %v1182_v39  ;;  %v1209_v19 = vadd.f32 %v1177_v24, %v2485_v32 }
 0x1a4   : > { %1215 = vst [vmem:[%s2024_s7 + $0x10] sm:$0xff] %v1183_v17  ;;  %v2486_v34 = vld [vmem:[#allocation4_spill] sm:$0xff] }
 0x1a5   : > { %1216 = vst [vmem:[%s2024_s7 + $0x18] sm:$0xff] %v1184_v27  ;;  %v1210_v35 = vadd.f32 %v1178_v29, %v2486_v34 }
 0x1a6   : > { %1217 = vst [vmem:[%s2024_s7 + $0x20] sm:$0xff] %v1185_v38  ;;  %v2487_v36 = vld [vmem:[#allocation5_spill] sm:$0xff] }
 0x1a7   : > { %1218 = vst [vmem:[%s2024_s7 + $0x28] sm:$0xff] %v1186_v52  ;;  %v1212_v22 = vadd.f32 %v1180_v30, %v2487_v36 }
 0x1a8   : > { %1219 = vst [vmem:[%s2024_s7 + $0x30] sm:$0xff] %v1187_v28 }
 0x1a9   : > { %1220 = vst [vmem:[%s2024_s7 + $0x38] sm:$0xff] %v1188_v53 }
 0x1aa   : > { %1221 = vst [vmem:[%s2024_s7 + $0x40] sm:$0xff] %v1189_v31 }
 0x1ab   : > { %1222 = vst [vmem:[%s2024_s7 + $0x48] sm:$0xff] %v1190_v55 }
 0x1ac   : > { %1223 = vst [vmem:[%s2024_s7 + $0x50] sm:$0xff] %v1191_v56 }
 0x1ad   : > { %1224 = vst [vmem:[%s2024_s7 + $0x58] sm:$0xff] %v1192_v58 }
 0x1ae   : > { %1225 = vst [vmem:[%s2024_s7 + $0x60] sm:$0xff] %v1193_v59 }
 0x1af   : > { %1226 = vst [vmem:[%s2024_s7 + $0x68] sm:$0xff] %v1194_v61 }
 0x1b0   : > { %1227 = vst [vmem:[%s2024_s7 + $0x70] sm:$0xff] %v1195_v62 }
 0x1b1   : > { %1228 = vst [vmem:[%s2024_s7 + $0x78] sm:$0xff] %v1196_v0 }
 0x1b2   : > { %1229 = vst [vmem:[%s2024_s7 + $0x80] sm:$0xff] %v1197_v1 }
 0x1b3   : > { %1230 = vst [vmem:[%s2024_s7 + $0x88] sm:$0xff] %v1198_v3 }
 0x1b4   : > { %1231 = vst [vmem:[%s2024_s7 + $0x90] sm:$0xff] %v1199_v4 }
 0x1b5   : > { %1232 = vst [vmem:[%s2024_s7 + $0x98] sm:$0xff] %v1200_v6 }
 0x1b6   : > { %1233 = vst [vmem:[%s2024_s7 + $0xa0] sm:$0xff] %v1201_v7 }
 0x1b7   : > { %1234 = vst [vmem:[%s2024_s7 + $0xa8] sm:$0xff] %v1202_v9 }
 0x1b8   : > { %1235 = vst [vmem:[%s2024_s7 + $0xb0] sm:$0xff] %v1203_v10 }
 0x1b9   : > { %1236 = vst [vmem:[%s2024_s7 + $0xb8] sm:$0xff] %v1204_v12 }
 0x1ba   : > { %1237 = vst [vmem:[%s2024_s7 + $0xc0] sm:$0xff] %v1205_v13 }
 0x1bb   : > { %1238 = vst [vmem:[%s2024_s7 + $0xc8] sm:$0xff] %v1206_v15 }
 0x1bc   : > { %1239 = vst [vmem:[%s2024_s7 + $0xd0] sm:$0xff] %v1207_v16 }
 0x1bd   : > { %1240 = vst [vmem:[%s2024_s7 + $0xd8] sm:$0xff] %v1208_v18 }
 0x1be   : > { %1241 = vst [vmem:[%s2024_s7 + $0xe0] sm:$0xff] %v1209_v19 }
 0x1bf   : > { %1242 = vst [vmem:[%s2024_s7 + $0xe8] sm:$0xff] %v1210_v35 }
 0x1c0   : > { %1243 = vst [vmem:[%s2024_s7 + $0xf0] sm:$0xff] %v1211_v21 }
 0x1c1   : > { %1244 = vst [vmem:[%s2024_s7 + $0xf8] sm:$0xff] %v1212_v22 }
 0x1c2 PF: > { %s15_s21 = sadd.s32 1, %s1856_s21   ;;  %s2488_s15 = smov %s1836_s16 }
 0x1c3   : > { %p12_p13 = scmp.ge.s32.totalorder %s15_s21, 6   ;;  %s2489_s16 = smov %s1935_s28 }
 0x1c4   : > { %s2490_s17 = smov %s1848_s19  ;;  %s2491_s18 = smov %s1852_s20 }
 0x1c5   : > { %s2492_s19 = smov %s2495_s22  ;;  %s2493_s20 = smov %s2499_s23 }
 0x1c6   :  { %14 = sbr.rel (!%p12_p13) target bundleno = 4 (0x4), region = 129 }

</bundles_post_ra>
